<compile_context>
chip_gen: v7x
topology: tpu7x:2x2x1
jax: 0.10.0
libtpu: 0.0.40
codegen_flags: <defaults>
</compile_context>

<pallas_src>
import jax
import jax.numpy as jnp
from jax import lax
from jax.experimental import pallas as pl
from jax.experimental.pallas import tpu as pltpu


def rho(x):
    # rho(x) = x.clamp(min=0).clamp(max=1)
    return jnp.clip(x, 0.0, 1.0)


def _round_up(x, m):
    return ((x + m - 1) // m) * m


def _pad2d(x, rows, cols):
    r, c = x.shape
    if r == rows and c == cols:
        return x
    return jnp.zeros((rows, cols), x.dtype).at[:r, :c].set(x)


def _tpu_hw():
    """Return (vmem_capacity_bytes, preferred max batch tile, #TensorCores per device)."""
    kind = ""
    try:
        kind = jax.devices()[0].device_kind.lower()
    except Exception:
        pass
    try:
        vmem_cap = int(pltpu.get_tpu_info().vmem_capacity_bytes)
    except Exception:
        vmem_cap = 64 << 20            # conservative (v7x-sized) fallback
    is_v5e = ("v5e" in kind) or ("v5 lite" in kind) or ("v5lite" in kind)
    # v5e's MXU is 4x128x128: 256-row tiles buy nothing and double the live working set.
    max_bt = 128 if is_v5e else 256
    # Chips with 2 TensorCores per device (v7x, v4/v5p megacore) need >=2 grid steps for
    # the "parallel" batch axis to shard across cores.
    two_tc = ("v7" in kind) or ("v4" in kind) or \
             ("v5" in kind and not is_v5e and "lite" not in kind)
    return vmem_cap, max_bt, (2 if two_tc else 1)


def make_vfcont(size_tab, T, dt, no_clamp=False,
                weight_dtype=jnp.bfloat16, batch_tile=None):
    """Build (prep_params, forward) for a fixed layer structure (size_tab is static).

    weight_dtype=jnp.bfloat16 (default) feeds the MXU natively with f32 accumulation;
    pass jnp.float32 for bit-closeness to the PyTorch reference.
    """
    ns = len(size_tab) - 1
    assert ns >= 2, "VFcont forward assumes at least two state layers (ns >= 2)"
    nsyn = 2 * (ns - 1) + 1
    P = [_round_up(d, 128) for d in size_tab]   # lane-padded feature widths
    T = int(T)
    dt = float(dt)
    one_minus_dt = float(1.0 - dt)

    # ------------------------- parameter packing (host, once) -------------------------
    def prep_params(Ws, bs):
        """dt is folded into weights/biases; both matmul orientations are shipped
        pre-transposed to (in, out) so in-loop dots never transpose; weights are cast to
        weight_dtype; everything is zero-padded to lane multiples.
        Ws/bs follow the module layout: Ws[2i]/bs[2i] forward synapse, Ws[2i+1] backward
        synapse (tied transpose at angle=0, or the masked variant for angle>0), Ws[-1]/bs[-1]
        the data synapse."""
        wts, biases = [], []
        for i in range(ns - 1):                              # forward synapses w[2i]
            W = jnp.asarray(Ws[2 * i], jnp.float32)          # (size_tab[i], size_tab[i+1])
            wts.append(_pad2d((dt * W.T).astype(weight_dtype), P[i + 1], P[i]))
        for i in range(ns - 1):                              # backward synapses w[2i+1]
            Wb = jnp.asarray(Ws[2 * i + 1], jnp.float32)     # (size_tab[i+1], size_tab[i])
            wts.append(_pad2d((dt * Wb.T).astype(weight_dtype), P[i], P[i + 1]))
        W = jnp.asarray(Ws[-1], jnp.float32)                 # (size_tab[-2], size_tab[-1])
        wts.append(_pad2d((dt * W.T).astype(weight_dtype), P[ns], P[ns - 1]))
        # Biases stay f32 (added to f32 accumulators); dt folded.
        for i in range(ns - 1):
            b = jnp.asarray(bs[2 * i], jnp.float32).reshape(1, -1)
            biases.append(_pad2d(dt * b, 1, P[i]))
        b = jnp.asarray(bs[-1], jnp.float32).reshape(1, -1)
        biases.append(_pad2d(dt * b, 1, P[ns - 1]))
        return wts, biases

    # ------------------------------------ kernel ------------------------------------
    def _build_kernel(bt, unroll):
        def kernel(*refs):
            data_ref = refs[0]
            s_in = refs[1:1 + ns]
            w = refs[1 + ns:1 + ns + nsyn]
            b = refs[1 + ns + nsyn:1 + ns + nsyn + ns]
            s_out = refs[1 + ns + nsyn + ns:]

            cdt = w[0].dtype                                       # MXU input dtype (bf16)
            wfw = [w[i][...] for i in range(ns - 1)]               # (P[i+1], P[i]), dt folded
            wbw = [w[ns - 1 + i][...] for i in range(ns - 1)]      # (P[i],   P[i+1]), dt folded
            wlast = w[nsyn - 1][...]                               # (P[ns],  P[ns-1]), dt folded
            b_row = [b[i][...] for i in range(ns)]                 # (1, P[i]) f32, dt folded

            # Loop-invariant input-layer drive  dt*(w[-1](rho(data)) + bias): computed ONCE.
            data_drive = (jnp.dot(rho(data_ref[...]).astype(cdt), wlast,
                                  preferred_element_type=jnp.float32)
                          + b_row[ns - 1])

            def drives(rc):
                # dt is folded into weights/biases -> these are dt * (synaptic drive).
                d = [None] * ns
                d[0] = jnp.dot(rc[1], wfw[0], preferred_element_type=jnp.float32) + b_row[0]
                for i in range(1, ns - 1):
                    d[i] = (jnp.dot(rc[i + 1], wfw[i], preferred_element_type=jnp.float32)
                            + jnp.dot(rc[i - 1], wbw[i - 1], preferred_element_type=jnp.float32)
                            + b_row[i])
                d[ns - 1] = data_drive + jnp.dot(rc[ns - 2], wbw[ns - 2],
                                                 preferred_element_type=jnp.float32)
                return d

            s0 = tuple(s_in[i][...] for i in range(ns))

            if no_clamp:
                def body(_, s):
                    rc = tuple(rho(s[i]).astype(cdt) for i in range(ns))
                    d = drives(rc)
                    # s + dt*dsdt == (1-dt)*s + dt*(drive)
                    return tuple(one_minus_dt * s[i] + d[i] for i in range(ns))
                s_final = lax.fori_loop(0, T, body, s0, unroll=unroll)
            else:
                # After the clamp s is already in [0,1]; rho() is only needed on the initial
                # state. Carry (s, rho(s)) so arbitrary initial states keep exact semantics.
                r0 = tuple(rho(s0[i]).astype(cdt) for i in range(ns))

                def body(_, carry):
                    s, rc = carry
                    d = drives(rc)
                    new_s = tuple(jnp.clip(one_minus_dt * s[i] + d[i], 0.0, 1.0)
                                  for i in range(ns))
                    new_r = tuple(new_s[i].astype(cdt) for i in range(ns))
                    return (new_s, new_r)

                s_final, _ = lax.fori_loop(0, T, body, (s0, r0), unroll=unroll)

            for i in range(ns):
                s_out[i][...] = s_final[i].astype(s_out[i].dtype)

        return kernel

    # ------------------------------- wrapper / pallas_call -------------------------------
    def forward(data, s_list, params):
        wts, biases = params
        batch = data.shape[0]
        vmem_cap, max_bt, num_tc = _tpu_hw()

        w_bytes = sum(int(x.size) * x.dtype.itemsize for x in wts)   # single-buffered
        b_bytes = sum(int(x.size) * 4 for x in biases)

        def vmem_need(bt_):
            io_tiles = 4 * bt_ * (P[ns] + 2 * sum(P[:ns])) * 2        # double-buffered batch tiles
            live = 4 * bt_ * (2 * sum(P[:ns]) + 2 * max(P))           # loop-carried s/r + temporaries
            return w_bytes + b_bytes + io_tiles + live

        if batch_tile is not None:
            bt = batch_tile
        else:
            bt = max(8, min(max_bt, _round_up(batch, 8)))
            if num_tc >= 2 and batch > 8:
                # guarantee >=2 grid steps so both TensorCores get work (v7x megacore).
                bt = min(bt, _round_up(-(-batch // num_tc), 8))
            while bt > 8 and vmem_need(bt) > int(0.70 * vmem_cap):
                bt = max(8, _round_up(bt // 2, 8))

        pb = _round_up(batch, bt)
        grid_steps = pb // bt

        data_p = _pad2d(data.astype(jnp.float32), pb, P[ns])
        s_p = [_pad2d(s_list[i].astype(jnp.float32), pb, P[i]) for i in range(ns)]

        # States live in VMEM tiles (not registers): full unroll only for tiny working sets.
        live_iter_bytes = 4 * bt * sum(P[:ns]) * 3
        if T <= 16 and live_iter_bytes <= (1 << 20):
            unroll = True
        elif live_iter_bytes <= (4 << 20):
            unroll = 4
        else:
            unroll = 2

        # Roofline hint for XLA's scheduler (FLOPs counted after the data-drive hoist).
        flops_hoist = 2 * bt * P[ns] * P[ns - 1]
        flops_iter = sum(4 * bt * P[i + 1] * P[i] for i in range(ns - 1))
        cost = pl.CostEstimate(
            flops=grid_steps * (flops_hoist + T * flops_iter),
            transcendentals=0,
            bytes_accessed=w_bytes + b_bytes + 4 * (pb * P[ns] + 2 * pb * sum(P[:ns])))

        # Chip-aware VMEM budget (v7x has only 64 MiB physical VMEM).
        vmem_limit = int(min(max(int(1.3 * vmem_need(bt)) + (4 << 20), 32 << 20),
                             int(0.80 * vmem_cap)))

        out_shape = tuple(jax.ShapeDtypeStruct((pb, P[i]), jnp.float32) for i in range(ns))
        out_specs = tuple(pl.BlockSpec((bt, P[i]), lambda g: (g, 0)) for i in range(ns))
        kernel = _build_kernel(bt, unroll)

        def run(single_buffer_consts):
            if single_buffer_consts:
                # Constant index map -> fetched once; double buffering them is pure VMEM waste.
                def const_spec(shp):
                    return pl.BlockSpec(shp, lambda g: (0, 0), pipeline_mode=pl.Buffered(1))
            else:
                def const_spec(shp):
                    return pl.BlockSpec(shp, lambda g: (0, 0))
            in_specs = (
                [pl.BlockSpec((bt, P[ns]), lambda g: (g, 0))]
                + [pl.BlockSpec((bt, P[i]), lambda g: (g, 0)) for i in range(ns)]
                + [const_spec(x.shape) for x in wts]
                + [const_spec(x.shape) for x in biases]
            )
            fn = pl.pallas_call(
                kernel,
                out_shape=out_shape,
                grid_spec=pltpu.PrefetchScalarGridSpec(
                    num_scalar_prefetch=0,
                    grid=(grid_steps,),
                    in_specs=in_specs,
                    out_specs=out_specs,
                ),
                compiler_params=pltpu.CompilerParams(
                    dimension_semantics=("parallel",),
                    vmem_limit_bytes=vmem_limit,
                ),
                cost_estimate=cost,
            )
            return fn(data_p, *s_p, *wts, *biases)

        try:
            out = run(True)
        except Exception:
            # pipeline_mode=pl.Buffered(1) not supported on this JAX/Mosaic version:
            # fall back to default double-buffered weight specs (correctness unaffected).
            out = run(False)

        # strip batch/lane padding
        return [out[i][:batch, :size_tab[i]] for i in range(ns)]

    return prep_params, forward


def init_params(size_tab, key):
    """Deterministic init mimicking nn.Linear (uniform(-1/sqrt(fan_in), 1/sqrt(fan_in)))
    with the tied-transpose backward weights from VFcont.__init__ (angle=0)."""
    ns = len(size_tab) - 1
    keys = jax.random.split(key, 2 * ns)
    ki = 0
    Ws, bs = [], []
    for i in range(ns - 1):
        out_f, in_f = size_tab[i], size_tab[i + 1]
        bound = 1.0 / (in_f ** 0.5)
        W = jax.random.uniform(keys[ki], (out_f, in_f), jnp.float32, -bound, bound); ki += 1
        b = jax.random.uniform(keys[ki], (out_f,), jnp.float32, -bound, bound); ki += 1
        Ws.append(W); bs.append(b)
        Ws.append(W.T); bs.append(None)      # w[2i+1].weight = w[2i].weight.T, no bias
    out_f, in_f = size_tab[-2], size_tab[-1]
    bound = 1.0 / (in_f ** 0.5)
    W = jax.random.uniform(keys[ki], (out_f, in_f), jnp.float32, -bound, bound); ki += 1
    b = jax.random.uniform(keys[ki], (out_f,), jnp.float32, -bound, bound); ki += 1
    Ws.append(W); bs.append(b)
    return Ws, bs


def reference_forward(data, s_list, Ws, bs, size_tab, T, dt, no_clamp):
    """Pure-JAX f32 reference mirroring the PyTorch forward (method='nograd', beta=0)."""
    ns = len(size_tab) - 1
    nsyn = 2 * (ns - 1) + 1
    s = list(s_list)

    def lin(wi, x):
        y = jnp.dot(x, Ws[wi].T, precision=lax.Precision.HIGHEST)
        if bs[wi] is not None:
            y = y + bs[wi]
        return y

    for _ in range(T):
        dsdt = [None] * ns
        dsdt[0] = -s[0] + lin(0, rho(s[1]))
        for i in range(1, ns - 1):
            dsdt[i] = -s[i] + lin(2 * i, rho(s[i + 1])) + lin(2 * i - 1, rho(s[i - 1]))
        dsdt[ns - 1] = -s[-1] + lin(nsyn - 1, rho(data)) + lin(nsyn - 2, rho(s[-2]))
        for i in range(ns):
            new_s = s[i] + dt * dsdt[i]
            if not no_clamp:
                new_s = jnp.clip(new_s, 0.0, 1.0)
            s[i] = new_s
    return s


if __name__ == "__main__":
    # Small "args" consistent with the module: size_tab = [output, hidden, input]
    size_tab = [16, 32, 64]
    T = 10
    dt = 0.2
    no_clamp = False
    batch = 8
    ns = len(size_tab) - 1

    key = jax.random.PRNGKey(0)
    k_w, k_d = jax.random.split(key)
    Ws, bs = init_params(size_tab, k_w)

    data = jax.random.uniform(k_d, (batch, size_tab[-1]), jnp.float32)
    # initHidden(batch): zero states
    s_list = [jnp.zeros((batch, size_tab[i]), jnp.float32) for i in range(ns)]

    prep_params, fwd = make_vfcont(size_tab, T, dt, no_clamp)
    params = prep_params(Ws, bs)

    out = fwd(data, s_list, params)
    out = jax.block_until_ready(out)

    ref = reference_forward(data, s_list, Ws, bs, size_tab, T, dt, no_clamp)
    for o, r in zip(out, ref):
        assert o.shape == r.shape
        # bf16 MXU inputs with f32 accumulation: slightly looser tolerance than pure f32.
        err = float(jnp.max(jnp.abs(o - r)))
        assert err < 3e-2, err

    print("KERNEL_OK")
</pallas_src>

<mosaic_0001>
module attributes {stable_mosaic.version = 11 : i64} {
  func.func @kernel(%arg0: i32, %arg1: memref<8x128xf32, #tpu.memory_space<vmem>>, %arg2: memref<8x128xf32, #tpu.memory_space<vmem>>, %arg3: memref<8x128xf32, #tpu.memory_space<vmem>>, %arg4: memref<128x128xbf16, #tpu.memory_space<vmem>>, %arg5: memref<128x128xbf16, #tpu.memory_space<vmem>>, %arg6: memref<128x128xbf16, #tpu.memory_space<vmem>>, %arg7: memref<1x128xf32, #tpu.memory_space<vmem>>, %arg8: memref<1x128xf32, #tpu.memory_space<vmem>>, %arg9: memref<8x128xf32, #tpu.memory_space<vmem>>, %arg10: memref<8x128xf32, #tpu.memory_space<vmem>>) attributes {dimension_semantics = [#tpu.dimension_semantics<parallel>], iteration_bounds = array<i64: 1>, scalar_prefetch = 0 : i64, scratch_operands = 0 : i64, tpu.core_type = #tpu.core_type<tc>, window_params = [{transform_indices = @transform_0, window_bounds = array<i64: 8, 128>}, {transform_indices = @transform_1, window_bounds = array<i64: 8, 128>}, {transform_indices = @transform_2, window_bounds = array<i64: 8, 128>}, {pipeline_mode = #tpu.pipeline_mode<synchronous>, transform_indices = @transform_3, window_bounds = array<i64: 128, 128>}, {pipeline_mode = #tpu.pipeline_mode<synchronous>, transform_indices = @transform_4, window_bounds = array<i64: 128, 128>}, {pipeline_mode = #tpu.pipeline_mode<synchronous>, transform_indices = @transform_5, window_bounds = array<i64: 128, 128>}, {pipeline_mode = #tpu.pipeline_mode<synchronous>, transform_indices = @transform_6, window_bounds = array<i64: 1, 128>}, {pipeline_mode = #tpu.pipeline_mode<synchronous>, transform_indices = @transform_7, window_bounds = array<i64: 1, 128>}, {transform_indices = @transform_8, window_bounds = array<i64: 8, 128>}, {transform_indices = @transform_9, window_bounds = array<i64: 8, 128>}]} {
    %c0 = arith.constant 0 : index
    %c0_0 = arith.constant 0 : index
    %0 = vector.load %arg4[%c0, %c0_0] : memref<128x128xbf16, #tpu.memory_space<vmem>>, vector<128x128xbf16>
    %c0_1 = arith.constant 0 : index
    %c0_2 = arith.constant 0 : index
    %1 = vector.load %arg5[%c0_1, %c0_2] : memref<128x128xbf16, #tpu.memory_space<vmem>>, vector<128x128xbf16>
    %c0_3 = arith.constant 0 : index
    %c0_4 = arith.constant 0 : index
    %2 = vector.load %arg6[%c0_3, %c0_4] : memref<128x128xbf16, #tpu.memory_space<vmem>>, vector<128x128xbf16>
    %c0_5 = arith.constant 0 : index
    %c0_6 = arith.constant 0 : index
    %3 = vector.load %arg7[%c0_5, %c0_6] : memref<1x128xf32, #tpu.memory_space<vmem>>, vector<1x128xf32>
    %c0_7 = arith.constant 0 : index
    %c0_8 = arith.constant 0 : index
    %4 = vector.load %arg8[%c0_7, %c0_8] : memref<1x128xf32, #tpu.memory_space<vmem>>, vector<1x128xf32>
    %c0_9 = arith.constant 0 : index
    %c0_10 = arith.constant 0 : index
    %5 = vector.load %arg1[%c0_9, %c0_10] : memref<8x128xf32, #tpu.memory_space<vmem>>, vector<8x128xf32>
    %cst = arith.constant 0.000000e+00 : f32
    %cst_11 = arith.constant 1.000000e+00 : f32
    %6 = vector.broadcast %cst : f32 to vector<8x128xf32>
    %7 = arith.maximumf %6, %5 : vector<8x128xf32>
    %8 = vector.broadcast %cst_11 : f32 to vector<8x128xf32>
    %9 = arith.minimumf %8, %7 : vector<8x128xf32>
    %10 = arith.truncf %9 : vector<8x128xf32> to vector<8x128xbf16>
    %cst_12 = arith.constant dense<0.000000e+00> : vector<8x128xf32>
    %11 = tpu.matmul %10, %2, %cst_12 {dimension_numbers = #tpu.dot_dimension_numbers<[1], [0], [0], [1], [0, 0, 1, 1], [], []>} : vector<8x128xbf16>, vector<128x128xbf16>, vector<8x128xf32> -> vector<8x128xf32>
    %12 = vector.broadcast %4 : vector<1x128xf32> to vector<8x128xf32>
    %13 = arith.addf %11, %12 : vector<8x128xf32>
    %c0_13 = arith.constant 0 : index
    %c0_14 = arith.constant 0 : index
    %14 = vector.load %arg2[%c0_13, %c0_14] : memref<8x128xf32, #tpu.memory_space<vmem>>, vector<8x128xf32>
    %c0_15 = arith.constant 0 : index
    %c0_16 = arith.constant 0 : index
    %15 = vector.load %arg3[%c0_15, %c0_16] : memref<8x128xf32, #tpu.memory_space<vmem>>, vector<8x128xf32>
    %cst_17 = arith.constant 0.000000e+00 : f32
    %cst_18 = arith.constant 1.000000e+00 : f32
    %16 = vector.broadcast %cst_17 : f32 to vector<8x128xf32>
    %17 = arith.maximumf %16, %14 : vector<8x128xf32>
    %18 = vector.broadcast %cst_18 : f32 to vector<8x128xf32>
    %19 = arith.minimumf %18, %17 : vector<8x128xf32>
    %20 = arith.truncf %19 : vector<8x128xf32> to vector<8x128xbf16>
    %cst_19 = arith.constant 0.000000e+00 : f32
    %cst_20 = arith.constant 1.000000e+00 : f32
    %21 = vector.broadcast %cst_19 : f32 to vector<8x128xf32>
    %22 = arith.maximumf %21, %15 : vector<8x128xf32>
    %23 = vector.broadcast %cst_20 : f32 to vector<8x128xf32>
    %24 = arith.minimumf %23, %22 : vector<8x128xf32>
    %25 = arith.truncf %24 : vector<8x128xf32> to vector<8x128xbf16>
    %c0_i32 = arith.constant 0 : i32
    %cst_21 = arith.constant dense<0.000000e+00> : vector<8x128xf32>
    %26 = tpu.matmul %25, %0, %cst_21 {dimension_numbers = #tpu.dot_dimension_numbers<[1], [0], [0], [1], [0, 0, 1, 1], [], []>} : vector<8x128xbf16>, vector<128x128xbf16>, vector<8x128xf32> -> vector<8x128xf32>
    %27 = vector.broadcast %3 : vector<1x128xf32> to vector<8x128xf32>
    %28 = arith.addf %26, %27 : vector<8x128xf32>
    %cst_22 = arith.constant dense<0.000000e+00> : vector<8x128xf32>
    %29 = tpu.matmul %20, %1, %cst_22 {dimension_numbers = #tpu.dot_dimension_numbers<[1], [0], [0], [1], [0, 0, 1, 1], [], []>} : vector<8x128xbf16>, vector<128x128xbf16>, vector<8x128xf32> -> vector<8x128xf32>
    %30 = arith.addf %13, %29 : vector<8x128xf32>
    %cst_23 = arith.constant 8.000000e-01 : f32
    %31 = vector.broadcast %cst_23 : f32 to vector<8x128xf32>
    %32 = arith.mulf %31, %14 : vector<8x128xf32>
    %33 = arith.addf %32, %28 : vector<8x128xf32>
    %cst_24 = arith.constant 0.000000e+00 : f32
    %cst_25 = arith.constant 1.000000e+00 : f32
    %34 = vector.broadcast %cst_24 : f32 to vector<8x128xf32>
    %35 = arith.maximumf %34, %33 : vector<8x128xf32>
    %36 = vector.broadcast %cst_25 : f32 to vector<8x128xf32>
    %37 = arith.minimumf %36, %35 : vector<8x128xf32>
    %cst_26 = arith.constant 8.000000e-01 : f32
    %38 = vector.broadcast %cst_26 : f32 to vector<8x128xf32>
    %39 = arith.mulf %38, %15 : vector<8x128xf32>
    %40 = arith.addf %39, %30 : vector<8x128xf32>
    %cst_27 = arith.constant 0.000000e+00 : f32
    %cst_28 = arith.constant 1.000000e+00 : f32
    %41 = vector.broadcast %cst_27 : f32 to vector<8x128xf32>
    %42 = arith.maximumf %41, %40 : vector<8x128xf32>
    %43 = vector.broadcast %cst_28 : f32 to vector<8x128xf32>
    %44 = arith.minimumf %43, %42 : vector<8x128xf32>
    %45 = arith.truncf %37 : vector<8x128xf32> to vector<8x128xbf16>
    %46 = arith.truncf %44 : vector<8x128xf32> to vector<8x128xbf16>
    %c1_i32 = arith.constant 1 : i32
    %cst_29 = arith.constant dense<0.000000e+00> : vector<8x128xf32>
    %47 = tpu.matmul %46, %0, %cst_29 {dimension_numbers = #tpu.dot_dimension_numbers<[1], [0], [0], [1], [0, 0, 1, 1], [], []>} : vector<8x128xbf16>, vector<128x128xbf16>, vector<8x128xf32> -> vector<8x128xf32>
    %48 = vector.broadcast %3 : vector<1x128xf32> to vector<8x128xf32>
    %49 = arith.addf %47, %48 : vector<8x128xf32>
    %cst_30 = arith.constant dense<0.000000e+00> : vector<8x128xf32>
    %50 = tpu.matmul %45, %1, %cst_30 {dimension_numbers = #tpu.dot_dimension_numbers<[1], [0], [0], [1], [0, 0, 1, 1], [], []>} : vector<8x128xbf16>, vector<128x128xbf16>, vector<8x128xf32> -> vector<8x128xf32>
    %51 = arith.addf %13, %50 : vector<8x128xf32>
    %cst_31 = arith.constant 8.000000e-01 : f32
    %52 = vector.broadcast %cst_31 : f32 to vector<8x128xf32>
    %53 = arith.mulf %52, %37 : vector<8x128xf32>
    %54 = arith.addf %53, %49 : vector<8x128xf32>
    %cst_32 = arith.constant 0.000000e+00 : f32
    %cst_33 = arith.constant 1.000000e+00 : f32
    %55 = vector.broadcast %cst_32 : f32 to vector<8x128xf32>
    %56 = arith.maximumf %55, %54 : vector<8x128xf32>
    %57 = vector.broadcast %cst_33 : f32 to vector<8x128xf32>
    %58 = arith.minimumf %57, %56 : vector<8x128xf32>
    %cst_34 = arith.constant 8.000000e-01 : f32
    %59 = vector.broadcast %cst_34 : f32 to vector<8x128xf32>
    %60 = arith.mulf %59, %44 : vector<8x128xf32>
    %61 = arith.addf %60, %51 : vector<8x128xf32>
    %cst_35 = arith.constant 0.000000e+00 : f32
    %cst_36 = arith.constant 1.000000e+00 : f32
    %62 = vector.broadcast %cst_35 : f32 to vector<8x128xf32>
    %63 = arith.maximumf %62, %61 : vector<8x128xf32>
    %64 = vector.broadcast %cst_36 : f32 to vector<8x128xf32>
    %65 = arith.minimumf %64, %63 : vector<8x128xf32>
    %66 = arith.truncf %58 : vector<8x128xf32> to vector<8x128xbf16>
    %67 = arith.truncf %65 : vector<8x128xf32> to vector<8x128xbf16>
    %c2_i32 = arith.constant 2 : i32
    %cst_37 = arith.constant dense<0.000000e+00> : vector<8x128xf32>
    %68 = tpu.matmul %67, %0, %cst_37 {dimension_numbers = #tpu.dot_dimension_numbers<[1], [0], [0], [1], [0, 0, 1, 1], [], []>} : vector<8x128xbf16>, vector<128x128xbf16>, vector<8x128xf32> -> vector<8x128xf32>
    %69 = vector.broadcast %3 : vector<1x128xf32> to vector<8x128xf32>
    %70 = arith.addf %68, %69 : vector<8x128xf32>
    %cst_38 = arith.constant dense<0.000000e+00> : vector<8x128xf32>
    %71 = tpu.matmul %66, %1, %cst_38 {dimension_numbers = #tpu.dot_dimension_numbers<[1], [0], [0], [1], [0, 0, 1, 1], [], []>} : vector<8x128xbf16>, vector<128x128xbf16>, vector<8x128xf32> -> vector<8x128xf32>
    %72 = arith.addf %13, %71 : vector<8x128xf32>
    %cst_39 = arith.constant 8.000000e-01 : f32
    %73 = vector.broadcast %cst_39 : f32 to vector<8x128xf32>
    %74 = arith.mulf %73, %58 : vector<8x128xf32>
    %75 = arith.addf %74, %70 : vector<8x128xf32>
    %cst_40 = arith.constant 0.000000e+00 : f32
    %cst_41 = arith.constant 1.000000e+00 : f32
    %76 = vector.broadcast %cst_40 : f32 to vector<8x128xf32>
    %77 = arith.maximumf %76, %75 : vector<8x128xf32>
    %78 = vector.broadcast %cst_41 : f32 to vector<8x128xf32>
    %79 = arith.minimumf %78, %77 : vector<8x128xf32>
    %cst_42 = arith.constant 8.000000e-01 : f32
    %80 = vector.broadcast %cst_42 : f32 to vector<8x128xf32>
    %81 = arith.mulf %80, %65 : vector<8x128xf32>
    %82 = arith.addf %81, %72 : vector<8x128xf32>
    %cst_43 = arith.constant 0.000000e+00 : f32
    %cst_44 = arith.constant 1.000000e+00 : f32
    %83 = vector.broadcast %cst_43 : f32 to vector<8x128xf32>
    %84 = arith.maximumf %83, %82 : vector<8x128xf32>
    %85 = vector.broadcast %cst_44 : f32 to vector<8x128xf32>
    %86 = arith.minimumf %85, %84 : vector<8x128xf32>
    %87 = arith.truncf %79 : vector<8x128xf32> to vector<8x128xbf16>
    %88 = arith.truncf %86 : vector<8x128xf32> to vector<8x128xbf16>
    %c3_i32 = arith.constant 3 : i32
    %cst_45 = arith.constant dense<0.000000e+00> : vector<8x128xf32>
    %89 = tpu.matmul %88, %0, %cst_45 {dimension_numbers = #tpu.dot_dimension_numbers<[1], [0], [0], [1], [0, 0, 1, 1], [], []>} : vector<8x128xbf16>, vector<128x128xbf16>, vector<8x128xf32> -> vector<8x128xf32>
    %90 = vector.broadcast %3 : vector<1x128xf32> to vector<8x128xf32>
    %91 = arith.addf %89, %90 : vector<8x128xf32>
    %cst_46 = arith.constant dense<0.000000e+00> : vector<8x128xf32>
    %92 = tpu.matmul %87, %1, %cst_46 {dimension_numbers = #tpu.dot_dimension_numbers<[1], [0], [0], [1], [0, 0, 1, 1], [], []>} : vector<8x128xbf16>, vector<128x128xbf16>, vector<8x128xf32> -> vector<8x128xf32>
    %93 = arith.addf %13, %92 : vector<8x128xf32>
    %cst_47 = arith.constant 8.000000e-01 : f32
    %94 = vector.broadcast %cst_47 : f32 to vector<8x128xf32>
    %95 = arith.mulf %94, %79 : vector<8x128xf32>
    %96 = arith.addf %95, %91 : vector<8x128xf32>
    %cst_48 = arith.constant 0.000000e+00 : f32
    %cst_49 = arith.constant 1.000000e+00 : f32
    %97 = vector.broadcast %cst_48 : f32 to vector<8x128xf32>
    %98 = arith.maximumf %97, %96 : vector<8x128xf32>
    %99 = vector.broadcast %cst_49 : f32 to vector<8x128xf32>
    %100 = arith.minimumf %99, %98 : vector<8x128xf32>
    %cst_50 = arith.constant 8.000000e-01 : f32
    %101 = vector.broadcast %cst_50 : f32 to vector<8x128xf32>
    %102 = arith.mulf %101, %86 : vector<8x128xf32>
    %103 = arith.addf %102, %93 : vector<8x128xf32>
    %cst_51 = arith.constant 0.000000e+00 : f32
    %cst_52 = arith.constant 1.000000e+00 : f32
    %104 = vector.broadcast %cst_51 : f32 to vector<8x128xf32>
    %105 = arith.maximumf %104, %103 : vector<8x128xf32>
    %106 = vector.broadcast %cst_52 : f32 to vector<8x128xf32>
    %107 = arith.minimumf %106, %105 : vector<8x128xf32>
    %108 = arith.truncf %100 : vector<8x128xf32> to vector<8x128xbf16>
    %109 = arith.truncf %107 : vector<8x128xf32> to vector<8x128xbf16>
    %c4_i32 = arith.constant 4 : i32
    %cst_53 = arith.constant dense<0.000000e+00> : vector<8x128xf32>
    %110 = tpu.matmul %109, %0, %cst_53 {dimension_numbers = #tpu.dot_dimension_numbers<[1], [0], [0], [1], [0, 0, 1, 1], [], []>} : vector<8x128xbf16>, vector<128x128xbf16>, vector<8x128xf32> -> vector<8x128xf32>
    %111 = vector.broadcast %3 : vector<1x128xf32> to vector<8x128xf32>
    %112 = arith.addf %110, %111 : vector<8x128xf32>
    %cst_54 = arith.constant dense<0.000000e+00> : vector<8x128xf32>
    %113 = tpu.matmul %108, %1, %cst_54 {dimension_numbers = #tpu.dot_dimension_numbers<[1], [0], [0], [1], [0, 0, 1, 1], [], []>} : vector<8x128xbf16>, vector<128x128xbf16>, vector<8x128xf32> -> vector<8x128xf32>
    %114 = arith.addf %13, %113 : vector<8x128xf32>
    %cst_55 = arith.constant 8.000000e-01 : f32
    %115 = vector.broadcast %cst_55 : f32 to vector<8x128xf32>
    %116 = arith.mulf %115, %100 : vector<8x128xf32>
    %117 = arith.addf %116, %112 : vector<8x128xf32>
    %cst_56 = arith.constant 0.000000e+00 : f32
    %cst_57 = arith.constant 1.000000e+00 : f32
    %118 = vector.broadcast %cst_56 : f32 to vector<8x128xf32>
    %119 = arith.maximumf %118, %117 : vector<8x128xf32>
    %120 = vector.broadcast %cst_57 : f32 to vector<8x128xf32>
    %121 = arith.minimumf %120, %119 : vector<8x128xf32>
    %cst_58 = arith.constant 8.000000e-01 : f32
    %122 = vector.broadcast %cst_58 : f32 to vector<8x128xf32>
    %123 = arith.mulf %122, %107 : vector<8x128xf32>
    %124 = arith.addf %123, %114 : vector<8x128xf32>
    %cst_59 = arith.constant 0.000000e+00 : f32
    %cst_60 = arith.constant 1.000000e+00 : f32
    %125 = vector.broadcast %cst_59 : f32 to vector<8x128xf32>
    %126 = arith.maximumf %125, %124 : vector<8x128xf32>
    %127 = vector.broadcast %cst_60 : f32 to vector<8x128xf32>
    %128 = arith.minimumf %127, %126 : vector<8x128xf32>
    %129 = arith.truncf %121 : vector<8x128xf32> to vector<8x128xbf16>
    %130 = arith.truncf %128 : vector<8x128xf32> to vector<8x128xbf16>
    %c5_i32 = arith.constant 5 : i32
    %cst_61 = arith.constant dense<0.000000e+00> : vector<8x128xf32>
    %131 = tpu.matmul %130, %0, %cst_61 {dimension_numbers = #tpu.dot_dimension_numbers<[1], [0], [0], [1], [0, 0, 1, 1], [], []>} : vector<8x128xbf16>, vector<128x128xbf16>, vector<8x128xf32> -> vector<8x128xf32>
    %132 = vector.broadcast %3 : vector<1x128xf32> to vector<8x128xf32>
    %133 = arith.addf %131, %132 : vector<8x128xf32>
    %cst_62 = arith.constant dense<0.000000e+00> : vector<8x128xf32>
    %134 = tpu.matmul %129, %1, %cst_62 {dimension_numbers = #tpu.dot_dimension_numbers<[1], [0], [0], [1], [0, 0, 1, 1], [], []>} : vector<8x128xbf16>, vector<128x128xbf16>, vector<8x128xf32> -> vector<8x128xf32>
    %135 = arith.addf %13, %134 : vector<8x128xf32>
    %cst_63 = arith.constant 8.000000e-01 : f32
    %136 = vector.broadcast %cst_63 : f32 to vector<8x128xf32>
    %137 = arith.mulf %136, %121 : vector<8x128xf32>
    %138 = arith.addf %137, %133 : vector<8x128xf32>
    %cst_64 = arith.constant 0.000000e+00 : f32
    %cst_65 = arith.constant 1.000000e+00 : f32
    %139 = vector.broadcast %cst_64 : f32 to vector<8x128xf32>
    %140 = arith.maximumf %139, %138 : vector<8x128xf32>
    %141 = vector.broadcast %cst_65 : f32 to vector<8x128xf32>
    %142 = arith.minimumf %141, %140 : vector<8x128xf32>
    %cst_66 = arith.constant 8.000000e-01 : f32
    %143 = vector.broadcast %cst_66 : f32 to vector<8x128xf32>
    %144 = arith.mulf %143, %128 : vector<8x128xf32>
    %145 = arith.addf %144, %135 : vector<8x128xf32>
    %cst_67 = arith.constant 0.000000e+00 : f32
    %cst_68 = arith.constant 1.000000e+00 : f32
    %146 = vector.broadcast %cst_67 : f32 to vector<8x128xf32>
    %147 = arith.maximumf %146, %145 : vector<8x128xf32>
    %148 = vector.broadcast %cst_68 : f32 to vector<8x128xf32>
    %149 = arith.minimumf %148, %147 : vector<8x128xf32>
    %150 = arith.truncf %142 : vector<8x128xf32> to vector<8x128xbf16>
    %151 = arith.truncf %149 : vector<8x128xf32> to vector<8x128xbf16>
    %c6_i32 = arith.constant 6 : i32
    %cst_69 = arith.constant dense<0.000000e+00> : vector<8x128xf32>
    %152 = tpu.matmul %151, %0, %cst_69 {dimension_numbers = #tpu.dot_dimension_numbers<[1], [0], [0], [1], [0, 0, 1, 1], [], []>} : vector<8x128xbf16>, vector<128x128xbf16>, vector<8x128xf32> -> vector<8x128xf32>
    %153 = vector.broadcast %3 : vector<1x128xf32> to vector<8x128xf32>
    %154 = arith.addf %152, %153 : vector<8x128xf32>
    %cst_70 = arith.constant dense<0.000000e+00> : vector<8x128xf32>
    %155 = tpu.matmul %150, %1, %cst_70 {dimension_numbers = #tpu.dot_dimension_numbers<[1], [0], [0], [1], [0, 0, 1, 1], [], []>} : vector<8x128xbf16>, vector<128x128xbf16>, vector<8x128xf32> -> vector<8x128xf32>
    %156 = arith.addf %13, %155 : vector<8x128xf32>
    %cst_71 = arith.constant 8.000000e-01 : f32
    %157 = vector.broadcast %cst_71 : f32 to vector<8x128xf32>
    %158 = arith.mulf %157, %142 : vector<8x128xf32>
    %159 = arith.addf %158, %154 : vector<8x128xf32>
    %cst_72 = arith.constant 0.000000e+00 : f32
    %cst_73 = arith.constant 1.000000e+00 : f32
    %160 = vector.broadcast %cst_72 : f32 to vector<8x128xf32>
    %161 = arith.maximumf %160, %159 : vector<8x128xf32>
    %162 = vector.broadcast %cst_73 : f32 to vector<8x128xf32>
    %163 = arith.minimumf %162, %161 : vector<8x128xf32>
    %cst_74 = arith.constant 8.000000e-01 : f32
    %164 = vector.broadcast %cst_74 : f32 to vector<8x128xf32>
    %165 = arith.mulf %164, %149 : vector<8x128xf32>
    %166 = arith.addf %165, %156 : vector<8x128xf32>
    %cst_75 = arith.constant 0.000000e+00 : f32
    %cst_76 = arith.constant 1.000000e+00 : f32
    %167 = vector.broadcast %cst_75 : f32 to vector<8x128xf32>
    %168 = arith.maximumf %167, %166 : vector<8x128xf32>
    %169 = vector.broadcast %cst_76 : f32 to vector<8x128xf32>
    %170 = arith.minimumf %169, %168 : vector<8x128xf32>
    %171 = arith.truncf %163 : vector<8x128xf32> to vector<8x128xbf16>
    %172 = arith.truncf %170 : vector<8x128xf32> to vector<8x128xbf16>
    %c7_i32 = arith.constant 7 : i32
    %cst_77 = arith.constant dense<0.000000e+00> : vector<8x128xf32>
    %173 = tpu.matmul %172, %0, %cst_77 {dimension_numbers = #tpu.dot_dimension_numbers<[1], [0], [0], [1], [0, 0, 1, 1], [], []>} : vector<8x128xbf16>, vector<128x128xbf16>, vector<8x128xf32> -> vector<8x128xf32>
    %174 = vector.broadcast %3 : vector<1x128xf32> to vector<8x128xf32>
    %175 = arith.addf %173, %174 : vector<8x128xf32>
    %cst_78 = arith.constant dense<0.000000e+00> : vector<8x128xf32>
    %176 = tpu.matmul %171, %1, %cst_78 {dimension_numbers = #tpu.dot_dimension_numbers<[1], [0], [0], [1], [0, 0, 1, 1], [], []>} : vector<8x128xbf16>, vector<128x128xbf16>, vector<8x128xf32> -> vector<8x128xf32>
    %177 = arith.addf %13, %176 : vector<8x128xf32>
    %cst_79 = arith.constant 8.000000e-01 : f32
    %178 = vector.broadcast %cst_79 : f32 to vector<8x128xf32>
    %179 = arith.mulf %178, %163 : vector<8x128xf32>
    %180 = arith.addf %179, %175 : vector<8x128xf32>
    %cst_80 = arith.constant 0.000000e+00 : f32
    %cst_81 = arith.constant 1.000000e+00 : f32
    %181 = vector.broadcast %cst_80 : f32 to vector<8x128xf32>
    %182 = arith.maximumf %181, %180 : vector<8x128xf32>
    %183 = vector.broadcast %cst_81 : f32 to vector<8x128xf32>
    %184 = arith.minimumf %183, %182 : vector<8x128xf32>
    %cst_82 = arith.constant 8.000000e-01 : f32
    %185 = vector.broadcast %cst_82 : f32 to vector<8x128xf32>
    %186 = arith.mulf %185, %170 : vector<8x128xf32>
    %187 = arith.addf %186, %177 : vector<8x128xf32>
    %cst_83 = arith.constant 0.000000e+00 : f32
    %cst_84 = arith.constant 1.000000e+00 : f32
    %188 = vector.broadcast %cst_83 : f32 to vector<8x128xf32>
    %189 = arith.maximumf %188, %187 : vector<8x128xf32>
    %190 = vector.broadcast %cst_84 : f32 to vector<8x128xf32>
    %191 = arith.minimumf %190, %189 : vector<8x128xf32>
    %192 = arith.truncf %184 : vector<8x128xf32> to vector<8x128xbf16>
    %193 = arith.truncf %191 : vector<8x128xf32> to vector<8x128xbf16>
    %c8_i32 = arith.constant 8 : i32
    %cst_85 = arith.constant dense<0.000000e+00> : vector<8x128xf32>
    %194 = tpu.matmul %193, %0, %cst_85 {dimension_numbers = #tpu.dot_dimension_numbers<[1], [0], [0], [1], [0, 0, 1, 1], [], []>} : vector<8x128xbf16>, vector<128x128xbf16>, vector<8x128xf32> -> vector<8x128xf32>
    %195 = vector.broadcast %3 : vector<1x128xf32> to vector<8x128xf32>
    %196 = arith.addf %194, %195 : vector<8x128xf32>
    %cst_86 = arith.constant dense<0.000000e+00> : vector<8x128xf32>
    %197 = tpu.matmul %192, %1, %cst_86 {dimension_numbers = #tpu.dot_dimension_numbers<[1], [0], [0], [1], [0, 0, 1, 1], [], []>} : vector<8x128xbf16>, vector<128x128xbf16>, vector<8x128xf32> -> vector<8x128xf32>
    %198 = arith.addf %13, %197 : vector<8x128xf32>
    %cst_87 = arith.constant 8.000000e-01 : f32
    %199 = vector.broadcast %cst_87 : f32 to vector<8x128xf32>
    %200 = arith.mulf %199, %184 : vector<8x128xf32>
    %201 = arith.addf %200, %196 : vector<8x128xf32>
    %cst_88 = arith.constant 0.000000e+00 : f32
    %cst_89 = arith.constant 1.000000e+00 : f32
    %202 = vector.broadcast %cst_88 : f32 to vector<8x128xf32>
    %203 = arith.maximumf %202, %201 : vector<8x128xf32>
    %204 = vector.broadcast %cst_89 : f32 to vector<8x128xf32>
    %205 = arith.minimumf %204, %203 : vector<8x128xf32>
    %cst_90 = arith.constant 8.000000e-01 : f32
    %206 = vector.broadcast %cst_90 : f32 to vector<8x128xf32>
    %207 = arith.mulf %206, %191 : vector<8x128xf32>
    %208 = arith.addf %207, %198 : vector<8x128xf32>
    %cst_91 = arith.constant 0.000000e+00 : f32
    %cst_92 = arith.constant 1.000000e+00 : f32
    %209 = vector.broadcast %cst_91 : f32 to vector<8x128xf32>
    %210 = arith.maximumf %209, %208 : vector<8x128xf32>
    %211 = vector.broadcast %cst_92 : f32 to vector<8x128xf32>
    %212 = arith.minimumf %211, %210 : vector<8x128xf32>
    %213 = arith.truncf %205 : vector<8x128xf32> to vector<8x128xbf16>
    %214 = arith.truncf %212 : vector<8x128xf32> to vector<8x128xbf16>
    %c9_i32 = arith.constant 9 : i32
    %cst_93 = arith.constant dense<0.000000e+00> : vector<8x128xf32>
    %215 = tpu.matmul %214, %0, %cst_93 {dimension_numbers = #tpu.dot_dimension_numbers<[1], [0], [0], [1], [0, 0, 1, 1], [], []>} : vector<8x128xbf16>, vector<128x128xbf16>, vector<8x128xf32> -> vector<8x128xf32>
    %216 = vector.broadcast %3 : vector<1x128xf32> to vector<8x128xf32>
    %217 = arith.addf %215, %216 : vector<8x128xf32>
    %cst_94 = arith.constant dense<0.000000e+00> : vector<8x128xf32>
    %218 = tpu.matmul %213, %1, %cst_94 {dimension_numbers = #tpu.dot_dimension_numbers<[1], [0], [0], [1], [0, 0, 1, 1], [], []>} : vector<8x128xbf16>, vector<128x128xbf16>, vector<8x128xf32> -> vector<8x128xf32>
    %219 = arith.addf %13, %218 : vector<8x128xf32>
    %cst_95 = arith.constant 8.000000e-01 : f32
    %220 = vector.broadcast %cst_95 : f32 to vector<8x128xf32>
    %221 = arith.mulf %220, %205 : vector<8x128xf32>
    %222 = arith.addf %221, %217 : vector<8x128xf32>
    %cst_96 = arith.constant 0.000000e+00 : f32
    %cst_97 = arith.constant 1.000000e+00 : f32
    %223 = vector.broadcast %cst_96 : f32 to vector<8x128xf32>
    %224 = arith.maximumf %223, %222 : vector<8x128xf32>
    %225 = vector.broadcast %cst_97 : f32 to vector<8x128xf32>
    %226 = arith.minimumf %225, %224 : vector<8x128xf32>
    %cst_98 = arith.constant 8.000000e-01 : f32
    %227 = vector.broadcast %cst_98 : f32 to vector<8x128xf32>
    %228 = arith.mulf %227, %212 : vector<8x128xf32>
    %229 = arith.addf %228, %219 : vector<8x128xf32>
    %cst_99 = arith.constant 0.000000e+00 : f32
    %cst_100 = arith.constant 1.000000e+00 : f32
    %230 = vector.broadcast %cst_99 : f32 to vector<8x128xf32>
    %231 = arith.maximumf %230, %229 : vector<8x128xf32>
    %232 = vector.broadcast %cst_100 : f32 to vector<8x128xf32>
    %233 = arith.minimumf %232, %231 : vector<8x128xf32>
    %234 = arith.truncf %226 : vector<8x128xf32> to vector<8x128xbf16>
    %235 = arith.truncf %233 : vector<8x128xf32> to vector<8x128xbf16>
    %c0_101 = arith.constant 0 : index
    %c0_102 = arith.constant 0 : index
    %236 = vector.load %arg9[%c0_101, %c0_102] : memref<8x128xf32, #tpu.memory_space<vmem>>, vector<8x128xf32>
    tpu.vector_store %arg9[%c0_101, %c0_102], %226 {strides = array<i32>} : memref<8x128xf32, #tpu.memory_space<vmem>>, vector<8x128xf32>,
    %c0_103 = arith.constant 0 : index
    %c0_104 = arith.constant 0 : index
    %237 = vector.load %arg10[%c0_103, %c0_104] : memref<8x128xf32, #tpu.memory_space<vmem>>, vector<8x128xf32>
    tpu.vector_store %arg10[%c0_103, %c0_104], %233 {strides = array<i32>} : memref<8x128xf32, #tpu.memory_space<vmem>>, vector<8x128xf32>,
    return
  }
  func.func @transform_0(%arg0: i32) -> (i32, i32) {
    %c0_i32 = arith.constant 0 : i32
    %c0_i32_0 = arith.constant 0 : i32
    return %arg0, %c0_i32 : i32, i32
  }
  func.func @transform_1(%arg0: i32) -> (i32, i32) {
    %c0_i32 = arith.constant 0 : i32
    %c0_i32_0 = arith.constant 0 : i32
    return %arg0, %c0_i32 : i32, i32
  }
  func.func @transform_2(%arg0: i32) -> (i32, i32) {
    %c0_i32 = arith.constant 0 : i32
    %c0_i32_0 = arith.constant 0 : i32
    return %arg0, %c0_i32 : i32, i32
  }
  func.func @transform_3(%arg0: i32) -> (i32, i32) {
    %c0_i32 = arith.constant 0 : i32
    %c0_i32_0 = arith.constant 0 : i32
    %c0_i32_1 = arith.constant 0 : i32
    return %c0_i32, %c0_i32_0 : i32, i32
  }
  func.func @transform_4(%arg0: i32) -> (i32, i32) {
    %c0_i32 = arith.constant 0 : i32
    %c0_i32_0 = arith.constant 0 : i32
    %c0_i32_1 = arith.constant 0 : i32
    return %c0_i32, %c0_i32_0 : i32, i32
  }
  func.func @transform_5(%arg0: i32) -> (i32, i32) {
    %c0_i32 = arith.constant 0 : i32
    %c0_i32_0 = arith.constant 0 : i32
    %c0_i32_1 = arith.constant 0 : i32
    return %c0_i32, %c0_i32_0 : i32, i32
  }
  func.func @transform_6(%arg0: i32) -> (i32, i32) {
    %c0_i32 = arith.constant 0 : i32
    %c0_i32_0 = arith.constant 0 : i32
    %c0_i32_1 = arith.constant 0 : i32
    return %c0_i32, %c0_i32_0 : i32, i32
  }
  func.func @transform_7(%arg0: i32) -> (i32, i32) {
    %c0_i32 = arith.constant 0 : i32
    %c0_i32_0 = arith.constant 0 : i32
    %c0_i32_1 = arith.constant 0 : i32
    return %c0_i32, %c0_i32_0 : i32, i32
  }
  func.func @transform_8(%arg0: i32) -> (i32, i32) {
    %c0_i32 = arith.constant 0 : i32
    %c0_i32_0 = arith.constant 0 : i32
    return %arg0, %c0_i32 : i32, i32
  }
  func.func @transform_9(%arg0: i32) -> (i32, i32) {
    %c0_i32 = arith.constant 0 : i32
    %c0_i32_0 = arith.constant 0 : i32
    return %arg0, %c0_i32 : i32, i32
  }
}

module attributes {stable_mosaic.version = 11 : i64} {
  func.func @kernel(%arg0: i32, %arg1: memref<8x128xf32, #tpu.memory_space<vmem>>, %arg2: memref<8x128xf32, #tpu.memory_space<vmem>>, %arg3: memref<8x128xf32, #tpu.memory_space<vmem>>, %arg4: memref<128x128xbf16, #tpu.memory_space<vmem>>, %arg5: memref<128x128xbf16, #tpu.memory_space<vmem>>, %arg6: memref<128x128xbf16, #tpu.memory_space<vmem>>, %arg7: memref<1x128xf32, #tpu.memory_space<vmem>>, %arg8: memref<1x128xf32, #tpu.memory_space<vmem>>, %arg9: memref<8x128xf32, #tpu.memory_space<vmem>>, %arg10: memref<8x128xf32, #tpu.memory_space<vmem>>) attributes {dimension_semantics = [#tpu.dimension_semantics<parallel>], iteration_bounds = array<i64: 1>, scalar_prefetch = 0 : i64, scratch_operands = 0 : i64, tpu.core_type = #tpu.core_type<tc>, window_params = [{transform_indices = @transform_0, window_bounds = array<i64: 8, 128>}, {transform_indices = @transform_1, window_bounds = array<i64: 8, 128>}, {transform_indices = @transform_2, window_bounds = array<i64: 8, 128>}, {pipeline_mode = #tpu.pipeline_mode<synchronous>, transform_indices = @transform_3, window_bounds = array<i64: 128, 128>}, {pipeline_mode = #tpu.pipeline_mode<synchronous>, transform_indices = @transform_4, window_bounds = array<i64: 128, 128>}, {pipeline_mode = #tpu.pipeline_mode<synchronous>, transform_indices = @transform_5, window_bounds = array<i64: 128, 128>}, {pipeline_mode = #tpu.pipeline_mode<synchronous>, transform_indices = @transform_6, window_bounds = array<i64: 1, 128>}, {pipeline_mode = #tpu.pipeline_mode<synchronous>, transform_indices = @transform_7, window_bounds = array<i64: 1, 128>}, {transform_indices = @transform_8, window_bounds = array<i64: 8, 128>}, {transform_indices = @transform_9, window_bounds = array<i64: 8, 128>}]} {
    %c0 = arith.constant 0 : index
    %c0_0 = arith.constant 0 : index
    %0 = vector.load %arg4[%c0, %c0_0] : memref<128x128xbf16, #tpu.memory_space<vmem>>, vector<128x128xbf16>
    %c0_1 = arith.constant 0 : index
    %c0_2 = arith.constant 0 : index
    %1 = vector.load %arg5[%c0_1, %c0_2] : memref<128x128xbf16, #tpu.memory_space<vmem>>, vector<128x128xbf16>
    %c0_3 = arith.constant 0 : index
    %c0_4 = arith.constant 0 : index
    %2 = vector.load %arg6[%c0_3, %c0_4] : memref<128x128xbf16, #tpu.memory_space<vmem>>, vector<128x128xbf16>
    %c0_5 = arith.constant 0 : index
    %c0_6 = arith.constant 0 : index
    %3 = vector.load %arg7[%c0_5, %c0_6] : memref<1x128xf32, #tpu.memory_space<vmem>>, vector<1x128xf32>
    %c0_7 = arith.constant 0 : index
    %c0_8 = arith.constant 0 : index
    %4 = vector.load %arg8[%c0_7, %c0_8] : memref<1x128xf32, #tpu.memory_space<vmem>>, vector<1x128xf32>
    %c0_9 = arith.constant 0 : index
    %c0_10 = arith.constant 0 : index
    %5 = vector.load %arg1[%c0_9, %c0_10] : memref<8x128xf32, #tpu.memory_space<vmem>>, vector<8x128xf32>
    %cst = arith.constant 0.000000e+00 : f32
    %cst_11 = arith.constant 1.000000e+00 : f32
    %6 = vector.broadcast %cst : f32 to vector<8x128xf32>
    %7 = arith.maximumf %6, %5 : vector<8x128xf32>
    %8 = vector.broadcast %cst_11 : f32 to vector<8x128xf32>
    %9 = arith.minimumf %8, %7 : vector<8x128xf32>
    %10 = arith.truncf %9 : vector<8x128xf32> to vector<8x128xbf16>
    %cst_12 = arith.constant dense<0.000000e+00> : vector<8x128xf32>
    %11 = tpu.matmul %10, %2, %cst_12 {dimension_numbers = #tpu.dot_dimension_numbers<[1], [0], [0], [1], [0, 0, 1, 1], [], []>} : vector<8x128xbf16>, vector<128x128xbf16>, vector<8x128xf32> -> vector<8x128xf32>
    %12 = vector.broadcast %4 : vector<1x128xf32> to vector<8x128xf32>
    %13 = arith.addf %11, %12 : vector<8x128xf32>
    %c0_13 = arith.constant 0 : index
    %c0_14 = arith.constant 0 : index
    %14 = vector.load %arg2[%c0_13, %c0_14] : memref<8x128xf32, #tpu.memory_space<vmem>>, vector<8x128xf32>
    %c0_15 = arith.constant 0 : index
    %c0_16 = arith.constant 0 : index
    %15 = vector.load %arg3[%c0_15, %c0_16] : memref<8x128xf32, #tpu.memory_space<vmem>>, vector<8x128xf32>
    %cst_17 = arith.constant 0.000000e+00 : f32
    %cst_18 = arith.constant 1.000000e+00 : f32
    %16 = vector.broadcast %cst_17 : f32 to vector<8x128xf32>
    %17 = arith.maximumf %16, %14 : vector<8x128xf32>
    %18 = vector.broadcast %cst_18 : f32 to vector<8x128xf32>
    %19 = arith.minimumf %18, %17 : vector<8x128xf32>
    %20 = arith.truncf %19 : vector<8x128xf32> to vector<8x128xbf16>
    %cst_19 = arith.constant 0.000000e+00 : f32
    %cst_20 = arith.constant 1.000000e+00 : f32
    %21 = vector.broadcast %cst_19 : f32 to vector<8x128xf32>
    %22 = arith.maximumf %21, %15 : vector<8x128xf32>
    %23 = vector.broadcast %cst_20 : f32 to vector<8x128xf32>
    %24 = arith.minimumf %23, %22 : vector<8x128xf32>
    %25 = arith.truncf %24 : vector<8x128xf32> to vector<8x128xbf16>
    %c0_i32 = arith.constant 0 : i32
    %cst_21 = arith.constant dense<0.000000e+00> : vector<8x128xf32>
    %26 = tpu.matmul %25, %0, %cst_21 {dimension_numbers = #tpu.dot_dimension_numbers<[1], [0], [0], [1], [0, 0, 1, 1], [], []>} : vector<8x128xbf16>, vector<128x128xbf16>, vector<8x128xf32> -> vector<8x128xf32>
    %27 = vector.broadcast %3 : vector<1x128xf32> to vector<8x128xf32>
    %28 = arith.addf %26, %27 : vector<8x128xf32>
    %cst_22 = arith.constant dense<0.000000e+00> : vector<8x128xf32>
    %29 = tpu.matmul %20, %1, %cst_22 {dimension_numbers = #tpu.dot_dimension_numbers<[1], [0], [0], [1], [0, 0, 1, 1], [], []>} : vector<8x128xbf16>, vector<128x128xbf16>, vector<8x128xf32> -> vector<8x128xf32>
    %30 = arith.addf %13, %29 : vector<8x128xf32>
    %cst_23 = arith.constant 8.000000e-01 : f32
    %31 = vector.broadcast %cst_23 : f32 to vector<8x128xf32>
    %32 = arith.mulf %31, %14 : vector<8x128xf32>
    %33 = arith.addf %32, %28 : vector<8x128xf32>
    %cst_24 = arith.constant 0.000000e+00 : f32
    %cst_25 = arith.constant 1.000000e+00 : f32
    %34 = vector.broadcast %cst_24 : f32 to vector<8x128xf32>
    %35 = arith.maximumf %34, %33 : vector<8x128xf32>
    %36 = vector.broadcast %cst_25 : f32 to vector<8x128xf32>
    %37 = arith.minimumf %36, %35 : vector<8x128xf32>
    %cst_26 = arith.constant 8.000000e-01 : f32
    %38 = vector.broadcast %cst_26 : f32 to vector<8x128xf32>
    %39 = arith.mulf %38, %15 : vector<8x128xf32>
    %40 = arith.addf %39, %30 : vector<8x128xf32>
    %cst_27 = arith.constant 0.000000e+00 : f32
    %cst_28 = arith.constant 1.000000e+00 : f32
    %41 = vector.broadcast %cst_27 : f32 to vector<8x128xf32>
    %42 = arith.maximumf %41, %40 : vector<8x128xf32>
    %43 = vector.broadcast %cst_28 : f32 to vector<8x128xf32>
    %44 = arith.minimumf %43, %42 : vector<8x128xf32>
    %45 = arith.truncf %37 : vector<8x128xf32> to vector<8x128xbf16>
    %46 = arith.truncf %44 : vector<8x128xf32> to vector<8x128xbf16>
    %c1_i32 = arith.constant 1 : i32
    %cst_29 = arith.constant dense<0.000000e+00> : vector<8x128xf32>
    %47 = tpu.matmul %46, %0, %cst_29 {dimension_numbers = #tpu.dot_dimension_numbers<[1], [0], [0], [1], [0, 0, 1, 1], [], []>} : vector<8x128xbf16>, vector<128x128xbf16>, vector<8x128xf32> -> vector<8x128xf32>
    %48 = vector.broadcast %3 : vector<1x128xf32> to vector<8x128xf32>
    %49 = arith.addf %47, %48 : vector<8x128xf32>
    %cst_30 = arith.constant dense<0.000000e+00> : vector<8x128xf32>
    %50 = tpu.matmul %45, %1, %cst_30 {dimension_numbers = #tpu.dot_dimension_numbers<[1], [0], [0], [1], [0, 0, 1, 1], [], []>} : vector<8x128xbf16>, vector<128x128xbf16>, vector<8x128xf32> -> vector<8x128xf32>
    %51 = arith.addf %13, %50 : vector<8x128xf32>
    %cst_31 = arith.constant 8.000000e-01 : f32
    %52 = vector.broadcast %cst_31 : f32 to vector<8x128xf32>
    %53 = arith.mulf %52, %37 : vector<8x128xf32>
    %54 = arith.addf %53, %49 : vector<8x128xf32>
    %cst_32 = arith.constant 0.000000e+00 : f32
    %cst_33 = arith.constant 1.000000e+00 : f32
    %55 = vector.broadcast %cst_32 : f32 to vector<8x128xf32>
    %56 = arith.maximumf %55, %54 : vector<8x128xf32>
    %57 = vector.broadcast %cst_33 : f32 to vector<8x128xf32>
    %58 = arith.minimumf %57, %56 : vector<8x128xf32>
    %cst_34 = arith.constant 8.000000e-01 : f32
    %59 = vector.broadcast %cst_34 : f32 to vector<8x128xf32>
    %60 = arith.mulf %59, %44 : vector<8x128xf32>
    %61 = arith.addf %60, %51 : vector<8x128xf32>
    %cst_35 = arith.constant 0.000000e+00 : f32
    %cst_36 = arith.constant 1.000000e+00 : f32
    %62 = vector.broadcast %cst_35 : f32 to vector<8x128xf32>
    %63 = arith.maximumf %62, %61 : vector<8x128xf32>
    %64 = vector.broadcast %cst_36 : f32 to vector<8x128xf32>
    %65 = arith.minimumf %64, %63 : vector<8x128xf32>
    %66 = arith.truncf %58 : vector<8x128xf32> to vector<8x128xbf16>
    %67 = arith.truncf %65 : vector<8x128xf32> to vector<8x128xbf16>
    %c2_i32 = arith.constant 2 : i32
    %cst_37 = arith.constant dense<0.000000e+00> : vector<8x128xf32>
    %68 = tpu.matmul %67, %0, %cst_37 {dimension_numbers = #tpu.dot_dimension_numbers<[1], [0], [0], [1], [0, 0, 1, 1], [], []>} : vector<8x128xbf16>, vector<128x128xbf16>, vector<8x128xf32> -> vector<8x128xf32>
    %69 = vector.broadcast %3 : vector<1x128xf32> to vector<8x128xf32>
    %70 = arith.addf %68, %69 : vector<8x128xf32>
    %cst_38 = arith.constant dense<0.000000e+00> : vector<8x128xf32>
    %71 = tpu.matmul %66, %1, %cst_38 {dimension_numbers = #tpu.dot_dimension_numbers<[1], [0], [0], [1], [0, 0, 1, 1], [], []>} : vector<8x128xbf16>, vector<128x128xbf16>, vector<8x128xf32> -> vector<8x128xf32>
    %72 = arith.addf %13, %71 : vector<8x128xf32>
    %cst_39 = arith.constant 8.000000e-01 : f32
    %73 = vector.broadcast %cst_39 : f32 to vector<8x128xf32>
    %74 = arith.mulf %73, %58 : vector<8x128xf32>
    %75 = arith.addf %74, %70 : vector<8x128xf32>
    %cst_40 = arith.constant 0.000000e+00 : f32
    %cst_41 = arith.constant 1.000000e+00 : f32
    %76 = vector.broadcast %cst_40 : f32 to vector<8x128xf32>
    %77 = arith.maximumf %76, %75 : vector<8x128xf32>
    %78 = vector.broadcast %cst_41 : f32 to vector<8x128xf32>
    %79 = arith.minimumf %78, %77 : vector<8x128xf32>
    %cst_42 = arith.constant 8.000000e-01 : f32
    %80 = vector.broadcast %cst_42 : f32 to vector<8x128xf32>
    %81 = arith.mulf %80, %65 : vector<8x128xf32>
    %82 = arith.addf %81, %72 : vector<8x128xf32>
    %cst_43 = arith.constant 0.000000e+00 : f32
    %cst_44 = arith.constant 1.000000e+00 : f32
    %83 = vector.broadcast %cst_43 : f32 to vector<8x128xf32>
    %84 = arith.maximumf %83, %82 : vector<8x128xf32>
    %85 = vector.broadcast %cst_44 : f32 to vector<8x128xf32>
    %86 = arith.minimumf %85, %84 : vector<8x128xf32>
    %87 = arith.truncf %79 : vector<8x128xf32> to vector<8x128xbf16>
    %88 = arith.truncf %86 : vector<8x128xf32> to vector<8x128xbf16>
    %c3_i32 = arith.constant 3 : i32
    %cst_45 = arith.constant dense<0.000000e+00> : vector<8x128xf32>
    %89 = tpu.matmul %88, %0, %cst_45 {dimension_numbers = #tpu.dot_dimension_numbers<[1], [0], [0], [1], [0, 0, 1, 1], [], []>} : vector<8x128xbf16>, vector<128x128xbf16>, vector<8x128xf32> -> vector<8x128xf32>
    %90 = vector.broadcast %3 : vector<1x128xf32> to vector<8x128xf32>
    %91 = arith.addf %89, %90 : vector<8x128xf32>
    %cst_46 = arith.constant dense<0.000000e+00> : vector<8x128xf32>
    %92 = tpu.matmul %87, %1, %cst_46 {dimension_numbers = #tpu.dot_dimension_numbers<[1], [0], [0], [1], [0, 0, 1, 1], [], []>} : vector<8x128xbf16>, vector<128x128xbf16>, vector<8x128xf32> -> vector<8x128xf32>
    %93 = arith.addf %13, %92 : vector<8x128xf32>
    %cst_47 = arith.constant 8.000000e-01 : f32
    %94 = vector.broadcast %cst_47 : f32 to vector<8x128xf32>
    %95 = arith.mulf %94, %79 : vector<8x128xf32>
    %96 = arith.addf %95, %91 : vector<8x128xf32>
    %cst_48 = arith.constant 0.000000e+00 : f32
    %cst_49 = arith.constant 1.000000e+00 : f32
    %97 = vector.broadcast %cst_48 : f32 to vector<8x128xf32>
    %98 = arith.maximumf %97, %96 : vector<8x128xf32>
    %99 = vector.broadcast %cst_49 : f32 to vector<8x128xf32>
    %100 = arith.minimumf %99, %98 : vector<8x128xf32>
    %cst_50 = arith.constant 8.000000e-01 : f32
    %101 = vector.broadcast %cst_50 : f32 to vector<8x128xf32>
    %102 = arith.mulf %101, %86 : vector<8x128xf32>
    %103 = arith.addf %102, %93 : vector<8x128xf32>
    %cst_51 = arith.constant 0.000000e+00 : f32
    %cst_52 = arith.constant 1.000000e+00 : f32
    %104 = vector.broadcast %cst_51 : f32 to vector<8x128xf32>
    %105 = arith.maximumf %104, %103 : vector<8x128xf32>
    %106 = vector.broadcast %cst_52 : f32 to vector<8x128xf32>
    %107 = arith.minimumf %106, %105 : vector<8x128xf32>
    %108 = arith.truncf %100 : vector<8x128xf32> to vector<8x128xbf16>
    %109 = arith.truncf %107 : vector<8x128xf32> to vector<8x128xbf16>
    %c4_i32 = arith.constant 4 : i32
    %cst_53 = arith.constant dense<0.000000e+00> : vector<8x128xf32>
    %110 = tpu.matmul %109, %0, %cst_53 {dimension_numbers = #tpu.dot_dimension_numbers<[1], [0], [0], [1], [0, 0, 1, 1], [], []>} : vector<8x128xbf16>, vector<128x128xbf16>, vector<8x128xf32> -> vector<8x128xf32>
    %111 = vector.broadcast %3 : vector<1x128xf32> to vector<8x128xf32>
    %112 = arith.addf %110, %111 : vector<8x128xf32>
    %cst_54 = arith.constant dense<0.000000e+00> : vector<8x128xf32>
    %113 = tpu.matmul %108, %1, %cst_54 {dimension_numbers = #tpu.dot_dimension_numbers<[1], [0], [0], [1], [0, 0, 1, 1], [], []>} : vector<8x128xbf16>, vector<128x128xbf16>, vector<8x128xf32> -> vector<8x128xf32>
    %114 = arith.addf %13, %113 : vector<8x128xf32>
    %cst_55 = arith.constant 8.000000e-01 : f32
    %115 = vector.broadcast %cst_55 : f32 to vector<8x128xf32>
    %116 = arith.mulf %115, %100 : vector<8x128xf32>
    %117 = arith.addf %116, %112 : vector<8x128xf32>
    %cst_56 = arith.constant 0.000000e+00 : f32
    %cst_57 = arith.constant 1.000000e+00 : f32
    %118 = vector.broadcast %cst_56 : f32 to vector<8x128xf32>
    %119 = arith.maximumf %118, %117 : vector<8x128xf32>
    %120 = vector.broadcast %cst_57 : f32 to vector<8x128xf32>
    %121 = arith.minimumf %120, %119 : vector<8x128xf32>
    %cst_58 = arith.constant 8.000000e-01 : f32
    %122 = vector.broadcast %cst_58 : f32 to vector<8x128xf32>
    %123 = arith.mulf %122, %107 : vector<8x128xf32>
    %124 = arith.addf %123, %114 : vector<8x128xf32>
    %cst_59 = arith.constant 0.000000e+00 : f32
    %cst_60 = arith.constant 1.000000e+00 : f32
    %125 = vector.broadcast %cst_59 : f32 to vector<8x128xf32>
    %126 = arith.maximumf %125, %124 : vector<8x128xf32>
    %127 = vector.broadcast %cst_60 : f32 to vector<8x128xf32>
    %128 = arith.minimumf %127, %126 : vector<8x128xf32>
    %129 = arith.truncf %121 : vector<8x128xf32> to vector<8x128xbf16>
    %130 = arith.truncf %128 : vector<8x128xf32> to vector<8x128xbf16>
    %c5_i32 = arith.constant 5 : i32
    %cst_61 = arith.constant dense<0.000000e+00> : vector<8x128xf32>
    %131 = tpu.matmul %130, %0, %cst_61 {dimension_numbers = #tpu.dot_dimension_numbers<[1], [0], [0], [1], [0, 0, 1, 1], [], []>} : vector<8x128xbf16>, vector<128x128xbf16>, vector<8x128xf32> -> vector<8x128xf32>
    %132 = vector.broadcast %3 : vector<1x128xf32> to vector<8x128xf32>
    %133 = arith.addf %131, %132 : vector<8x128xf32>
    %cst_62 = arith.constant dense<0.000000e+00> : vector<8x128xf32>
    %134 = tpu.matmul %129, %1, %cst_62 {dimension_numbers = #tpu.dot_dimension_numbers<[1], [0], [0], [1], [0, 0, 1, 1], [], []>} : vector<8x128xbf16>, vector<128x128xbf16>, vector<8x128xf32> -> vector<8x128xf32>
    %135 = arith.addf %13, %134 : vector<8x128xf32>
    %cst_63 = arith.constant 8.000000e-01 : f32
    %136 = vector.broadcast %cst_63 : f32 to vector<8x128xf32>
    %137 = arith.mulf %136, %121 : vector<8x128xf32>
    %138 = arith.addf %137, %133 : vector<8x128xf32>
    %cst_64 = arith.constant 0.000000e+00 : f32
    %cst_65 = arith.constant 1.000000e+00 : f32
    %139 = vector.broadcast %cst_64 : f32 to vector<8x128xf32>
    %140 = arith.maximumf %139, %138 : vector<8x128xf32>
    %141 = vector.broadcast %cst_65 : f32 to vector<8x128xf32>
    %142 = arith.minimumf %141, %140 : vector<8x128xf32>
    %cst_66 = arith.constant 8.000000e-01 : f32
    %143 = vector.broadcast %cst_66 : f32 to vector<8x128xf32>
    %144 = arith.mulf %143, %128 : vector<8x128xf32>
    %145 = arith.addf %144, %135 : vector<8x128xf32>
    %cst_67 = arith.constant 0.000000e+00 : f32
    %cst_68 = arith.constant 1.000000e+00 : f32
    %146 = vector.broadcast %cst_67 : f32 to vector<8x128xf32>
    %147 = arith.maximumf %146, %145 : vector<8x128xf32>
    %148 = vector.broadcast %cst_68 : f32 to vector<8x128xf32>
    %149 = arith.minimumf %148, %147 : vector<8x128xf32>
    %150 = arith.truncf %142 : vector<8x128xf32> to vector<8x128xbf16>
    %151 = arith.truncf %149 : vector<8x128xf32> to vector<8x128xbf16>
    %c6_i32 = arith.constant 6 : i32
    %cst_69 = arith.constant dense<0.000000e+00> : vector<8x128xf32>
    %152 = tpu.matmul %151, %0, %cst_69 {dimension_numbers = #tpu.dot_dimension_numbers<[1], [0], [0], [1], [0, 0, 1, 1], [], []>} : vector<8x128xbf16>, vector<128x128xbf16>, vector<8x128xf32> -> vector<8x128xf32>
    %153 = vector.broadcast %3 : vector<1x128xf32> to vector<8x128xf32>
    %154 = arith.addf %152, %153 : vector<8x128xf32>
    %cst_70 = arith.constant dense<0.000000e+00> : vector<8x128xf32>
    %155 = tpu.matmul %150, %1, %cst_70 {dimension_numbers = #tpu.dot_dimension_numbers<[1], [0], [0], [1], [0, 0, 1, 1], [], []>} : vector<8x128xbf16>, vector<128x128xbf16>, vector<8x128xf32> -> vector<8x128xf32>
    %156 = arith.addf %13, %155 : vector<8x128xf32>
    %cst_71 = arith.constant 8.000000e-01 : f32
    %157 = vector.broadcast %cst_71 : f32 to vector<8x128xf32>
    %158 = arith.mulf %157, %142 : vector<8x128xf32>
    %159 = arith.addf %158, %154 : vector<8x128xf32>
    %cst_72 = arith.constant 0.000000e+00 : f32
    %cst_73 = arith.constant 1.000000e+00 : f32
    %160 = vector.broadcast %cst_72 : f32 to vector<8x128xf32>
    %161 = arith.maximumf %160, %159 : vector<8x128xf32>
    %162 = vector.broadcast %cst_73 : f32 to vector<8x128xf32>
    %163 = arith.minimumf %162, %161 : vector<8x128xf32>
    %cst_74 = arith.constant 8.000000e-01 : f32
    %164 = vector.broadcast %cst_74 : f32 to vector<8x128xf32>
    %165 = arith.mulf %164, %149 : vector<8x128xf32>
    %166 = arith.addf %165, %156 : vector<8x128xf32>
    %cst_75 = arith.constant 0.000000e+00 : f32
    %cst_76 = arith.constant 1.000000e+00 : f32
    %167 = vector.broadcast %cst_75 : f32 to vector<8x128xf32>
    %168 = arith.maximumf %167, %166 : vector<8x128xf32>
    %169 = vector.broadcast %cst_76 : f32 to vector<8x128xf32>
    %170 = arith.minimumf %169, %168 : vector<8x128xf32>
    %171 = arith.truncf %163 : vector<8x128xf32> to vector<8x128xbf16>
    %172 = arith.truncf %170 : vector<8x128xf32> to vector<8x128xbf16>
    %c7_i32 = arith.constant 7 : i32
    %cst_77 = arith.constant dense<0.000000e+00> : vector<8x128xf32>
    %173 = tpu.matmul %172, %0, %cst_77 {dimension_numbers = #tpu.dot_dimension_numbers<[1], [0], [0], [1], [0, 0, 1, 1], [], []>} : vector<8x128xbf16>, vector<128x128xbf16>, vector<8x128xf32> -> vector<8x128xf32>
    %174 = vector.broadcast %3 : vector<1x128xf32> to vector<8x128xf32>
    %175 = arith.addf %173, %174 : vector<8x128xf32>
    %cst_78 = arith.constant dense<0.000000e+00> : vector<8x128xf32>
    %176 = tpu.matmul %171, %1, %cst_78 {dimension_numbers = #tpu.dot_dimension_numbers<[1], [0], [0], [1], [0, 0, 1, 1], [], []>} : vector<8x128xbf16>, vector<128x128xbf16>, vector<8x128xf32> -> vector<8x128xf32>
    %177 = arith.addf %13, %176 : vector<8x128xf32>
    %cst_79 = arith.constant 8.000000e-01 : f32
    %178 = vector.broadcast %cst_79 : f32 to vector<8x128xf32>
    %179 = arith.mulf %178, %163 : vector<8x128xf32>
    %180 = arith.addf %179, %175 : vector<8x128xf32>
    %cst_80 = arith.constant 0.000000e+00 : f32
    %cst_81 = arith.constant 1.000000e+00 : f32
    %181 = vector.broadcast %cst_80 : f32 to vector<8x128xf32>
    %182 = arith.maximumf %181, %180 : vector<8x128xf32>
    %183 = vector.broadcast %cst_81 : f32 to vector<8x128xf32>
    %184 = arith.minimumf %183, %182 : vector<8x128xf32>
    %cst_82 = arith.constant 8.000000e-01 : f32
    %185 = vector.broadcast %cst_82 : f32 to vector<8x128xf32>
    %186 = arith.mulf %185, %170 : vector<8x128xf32>
    %187 = arith.addf %186, %177 : vector<8x128xf32>
    %cst_83 = arith.constant 0.000000e+00 : f32
    %cst_84 = arith.constant 1.000000e+00 : f32
    %188 = vector.broadcast %cst_83 : f32 to vector<8x128xf32>
    %189 = arith.maximumf %188, %187 : vector<8x128xf32>
    %190 = vector.broadcast %cst_84 : f32 to vector<8x128xf32>
    %191 = arith.minimumf %190, %189 : vector<8x128xf32>
    %192 = arith.truncf %184 : vector<8x128xf32> to vector<8x128xbf16>
    %193 = arith.truncf %191 : vector<8x128xf32> to vector<8x128xbf16>
    %c8_i32 = arith.constant 8 : i32
    %cst_85 = arith.constant dense<0.000000e+00> : vector<8x128xf32>
    %194 = tpu.matmul %193, %0, %cst_85 {dimension_numbers = #tpu.dot_dimension_numbers<[1], [0], [0], [1], [0, 0, 1, 1], [], []>} : vector<8x128xbf16>, vector<128x128xbf16>, vector<8x128xf32> -> vector<8x128xf32>
    %195 = vector.broadcast %3 : vector<1x128xf32> to vector<8x128xf32>
    %196 = arith.addf %194, %195 : vector<8x128xf32>
    %cst_86 = arith.constant dense<0.000000e+00> : vector<8x128xf32>
    %197 = tpu.matmul %192, %1, %cst_86 {dimension_numbers = #tpu.dot_dimension_numbers<[1], [0], [0], [1], [0, 0, 1, 1], [], []>} : vector<8x128xbf16>, vector<128x128xbf16>, vector<8x128xf32> -> vector<8x128xf32>
    %198 = arith.addf %13, %197 : vector<8x128xf32>
    %cst_87 = arith.constant 8.000000e-01 : f32
    %199 = vector.broadcast %cst_87 : f32 to vector<8x128xf32>
    %200 = arith.mulf %199, %184 : vector<8x128xf32>
    %201 = arith.addf %200, %196 : vector<8x128xf32>
    %cst_88 = arith.constant 0.000000e+00 : f32
    %cst_89 = arith.constant 1.000000e+00 : f32
    %202 = vector.broadcast %cst_88 : f32 to vector<8x128xf32>
    %203 = arith.maximumf %202, %201 : vector<8x128xf32>
    %204 = vector.broadcast %cst_89 : f32 to vector<8x128xf32>
    %205 = arith.minimumf %204, %203 : vector<8x128xf32>
    %cst_90 = arith.constant 8.000000e-01 : f32
    %206 = vector.broadcast %cst_90 : f32 to vector<8x128xf32>
    %207 = arith.mulf %206, %191 : vector<8x128xf32>
    %208 = arith.addf %207, %198 : vector<8x128xf32>
    %cst_91 = arith.constant 0.000000e+00 : f32
    %cst_92 = arith.constant 1.000000e+00 : f32
    %209 = vector.broadcast %cst_91 : f32 to vector<8x128xf32>
    %210 = arith.maximumf %209, %208 : vector<8x128xf32>
    %211 = vector.broadcast %cst_92 : f32 to vector<8x128xf32>
    %212 = arith.minimumf %211, %210 : vector<8x128xf32>
    %213 = arith.truncf %205 : vector<8x128xf32> to vector<8x128xbf16>
    %214 = arith.truncf %212 : vector<8x128xf32> to vector<8x128xbf16>
    %c9_i32 = arith.constant 9 : i32
    %cst_93 = arith.constant dense<0.000000e+00> : vector<8x128xf32>
    %215 = tpu.matmul %214, %0, %cst_93 {dimension_numbers = #tpu.dot_dimension_numbers<[1], [0], [0], [1], [0, 0, 1, 1], [], []>} : vector<8x128xbf16>, vector<128x128xbf16>, vector<8x128xf32> -> vector<8x128xf32>
    %216 = vector.broadcast %3 : vector<1x128xf32> to vector<8x128xf32>
    %217 = arith.addf %215, %216 : vector<8x128xf32>
    %cst_94 = arith.constant dense<0.000000e+00> : vector<8x128xf32>
    %218 = tpu.matmul %213, %1, %cst_94 {dimension_numbers = #tpu.dot_dimension_numbers<[1], [0], [0], [1], [0, 0, 1, 1], [], []>} : vector<8x128xbf16>, vector<128x128xbf16>, vector<8x128xf32> -> vector<8x128xf32>
    %219 = arith.addf %13, %218 : vector<8x128xf32>
    %cst_95 = arith.constant 8.000000e-01 : f32
    %220 = vector.broadcast %cst_95 : f32 to vector<8x128xf32>
    %221 = arith.mulf %220, %205 : vector<8x128xf32>
    %222 = arith.addf %221, %217 : vector<8x128xf32>
    %cst_96 = arith.constant 0.000000e+00 : f32
    %cst_97 = arith.constant 1.000000e+00 : f32
    %223 = vector.broadcast %cst_96 : f32 to vector<8x128xf32>
    %224 = arith.maximumf %223, %222 : vector<8x128xf32>
    %225 = vector.broadcast %cst_97 : f32 to vector<8x128xf32>
    %226 = arith.minimumf %225, %224 : vector<8x128xf32>
    %cst_98 = arith.constant 8.000000e-01 : f32
    %227 = vector.broadcast %cst_98 : f32 to vector<8x128xf32>
    %228 = arith.mulf %227, %212 : vector<8x128xf32>
    %229 = arith.addf %228, %219 : vector<8x128xf32>
    %cst_99 = arith.constant 0.000000e+00 : f32
    %cst_100 = arith.constant 1.000000e+00 : f32
    %230 = vector.broadcast %cst_99 : f32 to vector<8x128xf32>
    %231 = arith.maximumf %230, %229 : vector<8x128xf32>
    %232 = vector.broadcast %cst_100 : f32 to vector<8x128xf32>
    %233 = arith.minimumf %232, %231 : vector<8x128xf32>
    %234 = arith.truncf %226 : vector<8x128xf32> to vector<8x128xbf16>
    %235 = arith.truncf %233 : vector<8x128xf32> to vector<8x128xbf16>
    %c0_101 = arith.constant 0 : index
    %c0_102 = arith.constant 0 : index
    %236 = vector.load %arg9[%c0_101, %c0_102] : memref<8x128xf32, #tpu.memory_space<vmem>>, vector<8x128xf32>
    tpu.vector_store %arg9[%c0_101, %c0_102], %226 {strides = array<i32>} : memref<8x128xf32, #tpu.memory_space<vmem>>, vector<8x128xf32>,
    %c0_103 = arith.constant 0 : index
    %c0_104 = arith.constant 0 : index
    %237 = vector.load %arg10[%c0_103, %c0_104] : memref<8x128xf32, #tpu.memory_space<vmem>>, vector<8x128xf32>
    tpu.vector_store %arg10[%c0_103, %c0_104], %233 {strides = array<i32>} : memref<8x128xf32, #tpu.memory_space<vmem>>, vector<8x128xf32>,
    return
  }
  func.func @transform_0(%arg0: i32) -> (i32, i32) {
    %c0_i32 = arith.constant 0 : i32
    %c0_i32_0 = arith.constant 0 : i32
    return %arg0, %c0_i32 : i32, i32
  }
  func.func @transform_1(%arg0: i32) -> (i32, i32) {
    %c0_i32 = arith.constant 0 : i32
    %c0_i32_0 = arith.constant 0 : i32
    return %arg0, %c0_i32 : i32, i32
  }
  func.func @transform_2(%arg0: i32) -> (i32, i32) {
    %c0_i32 = arith.constant 0 : i32
    %c0_i32_0 = arith.constant 0 : i32
    return %arg0, %c0_i32 : i32, i32
  }
  func.func @transform_3(%arg0: i32) -> (i32, i32) {
    %c0_i32 = arith.constant 0 : i32
    %c0_i32_0 = arith.constant 0 : i32
    %c0_i32_1 = arith.constant 0 : i32
    return %c0_i32, %c0_i32_0 : i32, i32
  }
  func.func @transform_4(%arg0: i32) -> (i32, i32) {
    %c0_i32 = arith.constant 0 : i32
    %c0_i32_0 = arith.constant 0 : i32
    %c0_i32_1 = arith.constant 0 : i32
    return %c0_i32, %c0_i32_0 : i32, i32
  }
  func.func @transform_5(%arg0: i32) -> (i32, i32) {
    %c0_i32 = arith.constant 0 : i32
    %c0_i32_0 = arith.constant 0 : i32
    %c0_i32_1 = arith.constant 0 : i32
    return %c0_i32, %c0_i32_0 : i32, i32
  }
  func.func @transform_6(%arg0: i32) -> (i32, i32) {
    %c0_i32 = arith.constant 0 : i32
    %c0_i32_0 = arith.constant 0 : i32
    %c0_i32_1 = arith.constant 0 : i32
    return %c0_i32, %c0_i32_0 : i32, i32
  }
  func.func @transform_7(%arg0: i32) -> (i32, i32) {
    %c0_i32 = arith.constant 0 : i32
    %c0_i32_0 = arith.constant 0 : i32
    %c0_i32_1 = arith.constant 0 : i32
    return %c0_i32, %c0_i32_0 : i32, i32
  }
  func.func @transform_8(%arg0: i32) -> (i32, i32) {
    %c0_i32 = arith.constant 0 : i32
    %c0_i32_0 = arith.constant 0 : i32
    return %arg0, %c0_i32 : i32, i32
  }
  func.func @transform_9(%arg0: i32) -> (i32, i32) {
    %c0_i32 = arith.constant 0 : i32
    %c0_i32_0 = arith.constant 0 : i32
    return %arg0, %c0_i32 : i32, i32
  }
}

</mosaic_0001>

<bundles_post_ra>
// kernel: tpu_custom_call.1
= control target key start
LH: loop header
LB: loop body
LE: loop exit
PB: predicated region body
PF: predicated region fallthrough
CT: control target
= control target key end

     0   :  { %15 = vsyncpa [#allocation3], 0  ;;  %s2817_s0 = inlined_call_operand.hbm [shape: f32[8,128], index: 0, kind: input, shape index: {}]   ;;  %s2818_s1 = inlined_call_operand.hbm [shape: f32[8,128], index: 1, kind: input, shape index: {}]   ;;  %s2819_s2 = inlined_call_operand.hbm [shape: f32[8,128], index: 2, kind: input, shape index: {}]   ;;  %s2820_s3 = inlined_call_operand.hbm [shape: bf16[128,128], index: 3, kind: input, shape index: {}]   ;;  %s2821_s4 = inlined_call_operand.hbm [shape: bf16[128,128], index: 4, kind: input, shape index: {}]   ;;  %s2822_s5 = inlined_call_operand.hbm [shape: bf16[128,128], index: 5, kind: input, shape index: {}]   ;;  %s2823_s6 = inlined_call_operand.vmem [shape: f32[1,128], index: 6, kind: input, shape index: {}]   ;;  %s2824_s7 = inlined_call_operand.vmem [shape: f32[1,128], index: 7, kind: input, shape index: {}]   ;;  %s2825_s8 = inlined_call_operand.hbm [shape: f32[8,128], index: 8, kind: output, shape index: {0}]   ;;  %s2826_s9 = inlined_call_operand.hbm [shape: f32[8,128], index: 9, kind: output, shape index: {1}]  }
   0x1   :  { %16 = vsyncpa [#allocation6], 0 }
   0x2   :  { %17 = vsyncpa [#allocation9], 0 }
   0x3   :  { %18 = vsyncpa [#allocation12], 0 }
   0x4   :  { %19 = vsyncpa [#allocation4], 0 }
   0x5   :  { %20 = vsyncpa [#allocation15], 0  ;;  %s2176_s30 = smov [#allocation5]   ;;  %s2177_s11 = smov [#allocation8]  }
   0x6   :  { %s37_s10 = sshll.u32 %s2176_s30, 4  ;;  %s56_s12 = sshll.u32 %s2177_s11, 4  ;;  %s38_s10 = int_to_ptr.vmem [resolvable:$true] %s37_s10  ;;  %s2238_s12 = int_to_ptr.vmem [resolvable:$true] %s56_s12 }
   0x7   :  { %s1988_s15 = scalar_lea.hbm %s2818_s1, 128 }
   0x8   :  { %p1989_p0 = scmp.ne.s32.totalorder %s2818_s1, %s1988_s15  ;;  %p1992_p1 = scmp.lt.u32.totalorder %s1988_s15, %s2818_s1 }
   0xa   :  { %p1994_p2 = pnand %p1992_p1, %p1989_p0 }
   0xc   :  { %1997 = shalt.err (!%p1994_p2)
}
   0xd   :  { %s1998_s20 = scalar_lea.vmem %s38_s10, 128  ;;  %p2003_p4 = scmp.lt.s32.totalorder %s38_s10, %s38_s10 }
   0xe   :  { %p1999_p3 = scmp.ne.s32.totalorder %s38_s10, %s1998_s20  ;;  %p2004_p5 = scmp.lt.s32.totalorder %s1998_s20, %s1998_s20 }
  0x10   :  { %p2005_p6 = por %p2004_p5, %p2003_p4 }
  0x12   :  { %p2006_p7 = pnand %p2005_p6, %p1999_p3 }
  0x14   :  { %2009 = shalt.err (!%p2006_p7)
}
  0x15   :  { %40 = dma.hbm_to_vmem [thread:$0]  %s2818_s1, 128, %s38_s10, [#allocation6]  }
  0x16   :  { %s2010_s25 = scalar_lea.hbm %s2820_s3, 1024 }
  0x17   :  { %p2011_p8 = scmp.ne.s32.totalorder %s2820_s3, %s2010_s25  ;;  %p2014_p9 = scmp.lt.u32.totalorder %s2010_s25, %s2820_s3 }
  0x19   :  { %p2016_p10 = pnand %p2014_p9, %p2011_p8 }
  0x1b   :  { %2019 = shalt.err (!%p2016_p10)
}
  0x1c   :  { %s2020_s30 = scalar_lea.vmem %s2238_s12, 1024  ;;  %p2025_p12 = scmp.lt.s32.totalorder %s2238_s12, %s2238_s12 }
  0x1d   :  { %p2021_p11 = scmp.ne.s32.totalorder %s2238_s12, %s2020_s30  ;;  %p2026_p13 = scmp.lt.s32.totalorder %s2020_s30, %s2020_s30 }
  0x1f   :  { %p2027_p0 = por %p2026_p13, %p2025_p12 }
  0x21   :  { %p2028_p1 = pnand %p2027_p0, %p2021_p11 }
  0x23   :  { %2031 = shalt.err (!%p2028_p1)
}
  0x24   :  { %s2178_s1 = smov 64   ;;  %s2179_s10 = smov 4  }
  0x25   :  { %62 = dma.hbm_to_vmem [thread:$0]  %s2820_s3, 1024, %s2238_s12, [#allocation9], %s2178_s1, %s2178_s1, %s2179_s10  }
  0x26   :  { %s2180_s14 = smov [#allocation2]   ;;  %s2181_s16 = smov [#allocation7]  }
  0x27   :  { %s27_s15 = sshll.u32 %s2180_s14, 4  ;;  %s47_s17 = sshll.u32 %s2181_s16, 4  ;;  %s28_s15 = int_to_ptr.vmem [resolvable:$true] %s27_s15  ;;  %s48_s17 = int_to_ptr.vmem [resolvable:$true] %s47_s17 }
  0x28   :  { %s2032_s20 = scalar_lea.hbm %s2817_s0, 128 }
  0x29   :  { %p2033_p2 = scmp.ne.s32.totalorder %s2817_s0, %s2032_s20  ;;  %p2036_p3 = scmp.lt.u32.totalorder %s2032_s20, %s2817_s0 }
  0x2b   :  { %p2038_p4 = pnand %p2036_p3, %p2033_p2 }
  0x2d   :  { %2041 = shalt.err (!%p2038_p4)
}
  0x2e   :  { %s2042_s3 = scalar_lea.vmem %s28_s15, 128  ;;  %p2047_p6 = scmp.lt.s32.totalorder %s28_s15, %s28_s15 }
  0x2f   :  { %p2043_p5 = scmp.ne.s32.totalorder %s28_s15, %s2042_s3  ;;  %p2048_p7 = scmp.lt.s32.totalorder %s2042_s3, %s2042_s3 }
  0x31   :  { %p2049_p8 = por %p2048_p7, %p2047_p6 }
  0x33   :  { %p2050_p9 = pnand %p2049_p8, %p2043_p5 }
  0x35   :  { %2053 = shalt.err (!%p2050_p9)
}
  0x36   :  { %30 = dma.hbm_to_vmem [thread:$0]  %s2817_s0, 128, %s28_s15, [#allocation3]  }
  0x37   :  { %s2054_s28 = scalar_lea.hbm %s2819_s2, 128 }
  0x38   :  { %p2055_p10 = scmp.ne.s32.totalorder %s2819_s2, %s2054_s28  ;;  %p2058_p11 = scmp.lt.u32.totalorder %s2054_s28, %s2819_s2 }
  0x3a   :  { %p2060_p12 = pnand %p2058_p11, %p2055_p10 }
  0x3c   :  { %2063 = shalt.err (!%p2060_p12)
}
  0x3d   :  { %s2064_s14 = scalar_lea.vmem %s48_s17, 128  ;;  %p2069_p0 = scmp.lt.s32.totalorder %s48_s17, %s48_s17 }
  0x3e   :  { %p2065_p13 = scmp.ne.s32.totalorder %s48_s17, %s2064_s14  ;;  %p2070_p1 = scmp.lt.s32.totalorder %s2064_s14, %s2064_s14 }
  0x40   :  { %p2071_p2 = por %p2070_p1, %p2069_p0 }
  0x42   :  { %p2072_p3 = pnand %p2071_p2, %p2065_p13 }
  0x44   :  { %2075 = shalt.err (!%p2072_p3)
}
  0x45   :  { %50 = dma.hbm_to_vmem [thread:$0]  %s2819_s2, 128, %s48_s17, [#allocation6]  }
  0x46   :  { %s2182_s16 = smov [#allocation10]   ;;  %s2183_s19 = smov [#allocation11]  }
  0x47   :  { %s68_s18 = sshll.u32 %s2182_s16, 4  ;;  %s80_s20 = sshll.u32 %s2183_s19, 4  ;;  %s69_s18 = int_to_ptr.vmem [resolvable:$true] %s68_s18  ;;  %s2296_s20 = int_to_ptr.vmem [resolvable:$true] %s80_s20 }
  0x48   :  { %s2076_s23 = scalar_lea.hbm %s2821_s4, 1024 }
  0x49   :  { %p2077_p4 = scmp.ne.s32.totalorder %s2821_s4, %s2076_s23  ;;  %p2080_p5 = scmp.lt.u32.totalorder %s2076_s23, %s2821_s4 }
  0x4b   :  { %p2082_p6 = pnand %p2080_p5, %p2077_p4 }
  0x4d   :  { %2085 = shalt.err (!%p2082_p6)
}
  0x4e   :  { %s2086_s2 = scalar_lea.vmem %s69_s18, 1024  ;;  %p2091_p8 = scmp.lt.s32.totalorder %s69_s18, %s69_s18 }
  0x4f   :  { %p2087_p7 = scmp.ne.s32.totalorder %s69_s18, %s2086_s2  ;;  %p2092_p9 = scmp.lt.s32.totalorder %s2086_s2, %s2086_s2 }
  0x51   :  { %p2093_p10 = por %p2092_p9, %p2091_p8 }
  0x53   :  { %p2094_p11 = pnand %p2093_p10, %p2087_p7 }
  0x55   :  { %2097 = shalt.err (!%p2094_p11)
}
  0x56   :  { %74 = dma.hbm_to_vmem [thread:$0]  %s2821_s4, 1024, %s69_s18, [#allocation9], %s2178_s1, %s2178_s1, %s2179_s10  }
  0x57   :  { %s2098_s29 = scalar_lea.hbm %s2822_s5, 1024 }
  0x58   :  { %p2099_p12 = scmp.ne.s32.totalorder %s2822_s5, %s2098_s29  ;;  %p2102_p13 = scmp.lt.u32.totalorder %s2098_s29, %s2822_s5 }
  0x5a   :  { %p2104_p0 = pnand %p2102_p13, %p2099_p12 }
  0x5c   :  { %2107 = shalt.err (!%p2104_p0)
}
  0x5d   :  { %s2108_s0 = scalar_lea.vmem %s2296_s20, 1024  ;;  %p2113_p2 = scmp.lt.s32.totalorder %s2296_s20, %s2296_s20 }
  0x5e   :  { %p2109_p1 = scmp.ne.s32.totalorder %s2296_s20, %s2108_s0  ;;  %p2114_p3 = scmp.lt.s32.totalorder %s2108_s0, %s2108_s0 }
  0x60   :  { %p2115_p4 = por %p2114_p3, %p2113_p2 }
  0x62   :  { %p2116_p5 = pnand %p2115_p4, %p2109_p1 }
  0x64   :  { %2119 = shalt.err (!%p2116_p5)
}
  0x65   :  { %86 = dma.hbm_to_vmem [thread:$0]  %s2822_s5, 1024, %s2296_s20, [#allocation12], %s2178_s1, %s2178_s1, %s2179_s10  }
  0x66   :  { %2164 = dma.done.wait [#allocation3], 128  }
  0x67   :  { %2165 = vsyncadd [#allocation3], 4294967168 }
  0x68   :  { %2166 = dma.done.wait [#allocation6], 256  }
  0x69   :  { %2167 = vsyncadd [#allocation6], 4294967040 }
  0x6a   :  { %2168 = dma.done.wait [#allocation9], 2048  }
  0x6b   :  { %2169 = vsyncadd [#allocation9], 4294965248 }
  0x6c   :  { %2170 = dma.done.wait [#allocation12], 1024  }
  0x6d   :  { %2171 = vsyncadd [#allocation12], 4294966272  ;;  %v2184_v0 = vmov 0.0   ;;  %vm2185_vm0 = vmmov 0   ;;  %v1957_v1 = vld [vmem:[#allocation11] sm:$0xff]   ;;  %v1959_v3 = vld [vmem:[#allocation11 + $0x8] sm:$0xff]  }
  0x6e   :  { %1525 = vmatprep.subr.bf16.mxu0 %v2184_v0  ;;  %1545 = vmatprep.subr.bf16.mxu1 %v2184_v0  ;;  %v2339_v2 = vld [vmem:[#allocation8] sm:$0xff]   ;;  %v2343_v4 = vld [vmem:[#allocation8 + $0x8] sm:$0xff]   ;;  %v1961_v5 = vld [vmem:[#allocation11 + $0x10] sm:$0xff]  }
  0x6f   :  { %1541 = vmatprep.mubr.msk.bf16.mxu0 %vm2185_vm0, %v2184_v0  ;;  %1561 = vmatprep.mubr.msk.bf16.mxu1 %vm2185_vm0, %v2184_v0  ;;  %v2348_v6 = vld [vmem:[#allocation8 + $0x10] sm:$0xff]   ;;  %v1963_v7 = vld [vmem:[#allocation11 + $0x18] sm:$0xff]   ;;  %v1965_v9 = vld [vmem:[#allocation11 + $0x20] sm:$0xff]  }
  0x70   :  { %1526 = vmatpush3.bf16.msra.mxu0 %v1957_v1  ;;  %1546 = vmatpush3.bf16.msra.mxu1 %v2339_v2  ;;  %v2353_v8 = vld [vmem:[#allocation8 + $0x18] sm:$0xff]   ;;  %v2358_v10 = vld [vmem:[#allocation8 + $0x20] sm:$0xff]   ;;  %v1967_v11 = vld [vmem:[#allocation11 + $0x28] sm:$0xff]  }
  0x71   :  { %1527 = vmatprep.subr.bf16.mxu0 %v2184_v0  ;;  %1547 = vmatprep.subr.bf16.mxu1 %v2184_v0  ;;  %v160_v12 = vld [vmem:[#allocation2] sm:$0xff]  ;;  %v2365_v14 = vld [vmem:[#allocation7] sm:$0xff]  ;;  %v1969_v16 = vld [vmem:[#allocation11 + $0x30] sm:$0xff]  }
  0x72   :  { %v2363_v13 = vld [vmem:[#allocation8 + $0x28] sm:$0xff]   ;;  %v161_v15 = vmax.f32 %v160_v12, 0.0  ;;  %v263_v17 = vmax.f32 %v2365_v14, 0.0  ;;  %v2371_v18 = vld [vmem:[#allocation8 + $0x30] sm:$0xff]   ;;  %v1971_v20 = vld [vmem:[#allocation11 + $0x38] sm:$0xff]  }
  0x73   :  { %v2376_v22 = vld [vmem:[#allocation8 + $0x38] sm:$0xff]   ;;  %v2379_v25 = vld [vmem:[#allocation10] sm:$0xff]   ;;  %v2385_v26 = vld [vmem:[#allocation10 + $0x8] sm:$0xff]   ;;  %v453_v54 = vmul.f32 0.8, %v2365_v14 }
  0x74   :  { %1528 = vmatpush3.bf16.msra.mxu0 %v1959_v3  ;;  %1548 = vmatpush3.bf16.msra.mxu1 %v2343_v4  ;;  %v162_v19 = vmin.f32 %v161_v15, 1.0  ;;  %v264_v21 = vmin.f32 %v263_v17, 1.0  ;;  %v2395_v27 = vld [vmem:[#allocation10 + $0x10] sm:$0xff]   ;;  %v2401_v28 = vld [vmem:[#allocation10 + $0x18] sm:$0xff]   ;;  %v2407_v29 = vld [vmem:[#allocation10 + $0x20] sm:$0xff]  }
  0x75   :  { %1529 = vmatprep.subr.bf16.mxu0 %v2184_v0  ;;  %1549 = vmatprep.subr.bf16.mxu1 %v2184_v0  ;;  %v2413_v30 = vld [vmem:[#allocation10 + $0x28] sm:$0xff]   ;;  %v258_v31 = vld [vmem:[#allocation5] sm:$0xff]  ;;  %v2425_v35 = vld [vmem:[#allocation10 + $0x38] sm:$0xff]  }
  0x76   :  { %v163_v23 = vpack.c.bf16 %v162_v19, %v162_v19  ;;  %v265_v24 = vpack.c.bf16 %v264_v21, %v264_v21  ;;  %v260_v32 = vmax.f32 %v258_v31, 0.0  ;;  %v2419_v33 = vld [vmem:[#allocation10 + $0x30] sm:$0xff]   ;;  %v2455_v37 = vld [vmem:[%s2823_s6] ss:$0 sm:$0xff]  ;;  %v449_v39 = vmul.f32 0.8, %v258_v31 }
  0x77   :  { %v1310_v52 = vld [vmem:[%s2824_s7] ss:$0 sm:$0xff]  ;;  %s2186_s7 = smov [#allocation14]  }
  0x78   :  { %1530 = vmatpush3.bf16.msra.mxu0 %v1961_v5  ;;  %1550 = vmatpush3.bf16.msra.mxu1 %v2348_v6  ;;  %v261_v34 = vmin.f32 %v260_v32, 1.0  ;;  %s1294_s16 = sshll.u32 %s2186_s7, 4  ;;  %s1295_s16 = int_to_ptr.vmem [resolvable:$true] %s1294_s16 }
  0x79   :  { %1531 = vmatprep.subr.bf16.mxu0 %v2184_v0  ;;  %1551 = vmatprep.subr.bf16.mxu1 %v2184_v0  ;;  %s2120_s18 = scalar_lea.vmem %s1295_s16, 128  ;;  %p2125_p7 = scmp.lt.s32.totalorder %s1295_s16, %s1295_s16 }
  0x7a   :  { %v262_v36 = vpack.c.bf16 %v261_v34, %v261_v34  ;;  %p2121_p6 = scmp.ne.s32.totalorder %s1295_s16, %s2120_s18  ;;  %p2126_p8 = scmp.lt.s32.totalorder %s2120_s18, %s2120_s18 }
  0x7c   :  { %1532 = vmatpush3.bf16.msra.mxu0 %v1963_v7  ;;  %1552 = vmatpush3.bf16.msra.mxu1 %v2353_v8  ;;  %p2127_p9 = por %p2126_p8, %p2125_p7 }
  0x7d   :  { %1533 = vmatprep.subr.bf16.mxu0 %v2184_v0  ;;  %1553 = vmatprep.subr.bf16.mxu1 %v2184_v0 }
  0x7e   :  { %p2128_p10 = pnand %p2127_p9, %p2121_p6 }
  0x80   :  { %1534 = vmatpush3.bf16.msra.mxu0 %v1965_v9  ;;  %1554 = vmatpush3.bf16.msra.mxu1 %v2358_v10 }
  0x81   :  { %1535 = vmatprep.subr.bf16.mxu0 %v2184_v0  ;;  %1555 = vmatprep.subr.bf16.mxu1 %v2184_v0 }
  0x84   :  { %1536 = vmatpush3.bf16.msra.mxu0 %v1967_v11  ;;  %1556 = vmatpush3.bf16.msra.mxu1 %v2363_v13 }
  0x85   :  { %1537 = vmatprep.subr.bf16.mxu0 %v2184_v0  ;;  %1557 = vmatprep.subr.bf16.mxu1 %v2184_v0 }
  0x88   :  { %1538 = vmatpush3.bf16.msra.mxu0 %v1969_v16  ;;  %1558 = vmatpush3.bf16.msra.mxu1 %v2371_v18 }
  0x89   :  { %1539 = vmatprep.subr.bf16.mxu0 %v2184_v0  ;;  %1559 = vmatprep.subr.bf16.mxu1 %v2184_v0 }
  0x8c   :  { %1540 = vmatpush3.bf16.msra.mxu0 %v1971_v20  ;;  %1560 = vmatpush3.bf16.msra.mxu1 %v2376_v22 }
  0x8d   :  { %1565 = vmatprep.subr.bf16.mxu0 %v2184_v0  ;;  %1585 = vmatprep.subr.bf16.mxu1 %v2184_v0 }
  0x8f   :  { %1542 = vmatmul.mubr.bf16.vlgmr.msra.gmra.mrb[0].mxu0 %v163_v23  ;;  %1562 = vmatmul.mubr.bf16.vlgmr.msra.gmra.mrb[0].mxu1 %v265_v24 }
  0x90   :  { %1566 = vmatpush3.bf16.msra.mxu0 %v2379_v25  ;;  %1581 = vmatprep.mubr.msk.bf16.mxu0 %vm2185_vm0, %v2184_v0 }
  0x91   :  { %1567 = vmatprep.subr.bf16.mxu0 %v2184_v0  ;;  %1586 = vmatpush3.bf16.msra.mxu1 %v2339_v2 }
  0x92   :  { %1601 = vmatprep.mubr.msk.bf16.mxu1 %vm2185_vm0, %v2184_v0  ;;  %1587 = vmatprep.subr.bf16.mxu1 %v2184_v0 }
  0x94   :  { %1568 = vmatpush3.bf16.msra.mxu0 %v2385_v26 }
  0x95   :  { %1569 = vmatprep.subr.bf16.mxu0 %v2184_v0  ;;  %1588 = vmatpush3.bf16.msra.mxu1 %v2343_v4 }
  0x96   :  { %1589 = vmatprep.subr.bf16.mxu1 %v2184_v0 }
  0x98   :  { %1570 = vmatpush3.bf16.msra.mxu0 %v2395_v27 }
  0x99   :  { %1571 = vmatprep.subr.bf16.mxu0 %v2184_v0  ;;  %1590 = vmatpush3.bf16.msra.mxu1 %v2348_v6 }
  0x9a   :  { %1591 = vmatprep.subr.bf16.mxu1 %v2184_v0 }
  0x9c   :  { %1572 = vmatpush3.bf16.msra.mxu0 %v2401_v28 }
  0x9d   :  { %1573 = vmatprep.subr.bf16.mxu0 %v2184_v0  ;;  %1592 = vmatpush3.bf16.msra.mxu1 %v2353_v8 }
  0x9e   :  { %1593 = vmatprep.subr.bf16.mxu1 %v2184_v0 }
  0xa0   :  { %1574 = vmatpush3.bf16.msra.mxu0 %v2407_v29 }
  0xa1   :  { %1575 = vmatprep.subr.bf16.mxu0 %v2184_v0  ;;  %1594 = vmatpush3.bf16.msra.mxu1 %v2358_v10 }
  0xa2   :  { %1595 = vmatprep.subr.bf16.mxu1 %v2184_v0 }
  0xa4   :  { %1576 = vmatpush3.bf16.msra.mxu0 %v2413_v30 }
  0xa5   :  { %1577 = vmatprep.subr.bf16.mxu0 %v2184_v0  ;;  %1596 = vmatpush3.bf16.msra.mxu1 %v2363_v13 }
  0xa6   :  { %1597 = vmatprep.subr.bf16.mxu1 %v2184_v0 }
  0xa8   :  { %1578 = vmatpush3.bf16.msra.mxu0 %v2419_v33 }
  0xa9   :  { %1579 = vmatprep.subr.bf16.mxu0 %v2184_v0  ;;  %1598 = vmatpush3.bf16.msra.mxu1 %v2371_v18 }
  0xaa   :  { %1599 = vmatprep.subr.bf16.mxu1 %v2184_v0 }
  0xac   :  { %1580 = vmatpush3.bf16.msra.mxu0 %v2425_v35 }
  0xad   :  { %1605 = vmatprep.subr.bf16.mxu0 %v2184_v0  ;;  %1600 = vmatpush3.bf16.msra.mxu1 %v2376_v22 }
  0xae   :  { %1625 = vmatprep.subr.bf16.mxu1 %v2184_v0 }
  0xaf   :  { %1582 = vmatmul.mubr.bf16.vlgmr.msra.gmra.mrb[4].mxu0 %v262_v36 }
  0xb0   :  { %1606 = vmatpush3.bf16.msra.mxu0 %v2379_v25  ;;  %1621 = vmatprep.mubr.msk.bf16.mxu0 %vm2185_vm0, %v2184_v0 }
  0xb1   :  { %1607 = vmatprep.subr.bf16.mxu0 %v2184_v0 }
  0xb4   :  { %1608 = vmatpush3.bf16.msra.mxu0 %v2385_v26 }
  0xb5   :  { %1609 = vmatprep.subr.bf16.mxu0 %v2184_v0 }
  0xb8   :  { %1610 = vmatpush3.bf16.msra.mxu0 %v2395_v27 }
  0xb9   :  { %1611 = vmatprep.subr.bf16.mxu0 %v2184_v0 }
  0xbc   :  { %1612 = vmatpush3.bf16.msra.mxu0 %v2401_v28 }
  0xbd   :  { %1613 = vmatprep.subr.bf16.mxu0 %v2184_v0 }
  0xc0   :  { %1614 = vmatpush3.bf16.msra.mxu0 %v2407_v29 }
  0xc1   :  { %1615 = vmatprep.subr.bf16.mxu0 %v2184_v0 }
  0xc4   :  { %1616 = vmatpush3.bf16.msra.mxu0 %v2413_v30 }
  0xc5   :  { %1617 = vmatprep.subr.bf16.mxu0 %v2184_v0 }
  0xc8   :  { %1618 = vmatpush3.bf16.msra.mxu0 %v2419_v33 }
  0xc9   :  { %1619 = vmatprep.subr.bf16.mxu0 %v2184_v0 }
  0xcc   :  { %1620 = vmatpush3.bf16.msra.mxu0 %v2425_v35 }
  0xcd   :  { %1645 = vmatprep.subr.bf16.mxu0 %v2184_v0 }
 0x162   :  { %v252_v38 = vpop.f32.mrb[0].mxu0  ;;  %v354_v40 = vpop.f32.mrb[0].mxu1 }
 0x163   :  { %v1543_v41 = vpop.f32.mrb[1].mxu0  ;;  %v355_v42 = vadd.f32 %v2455_v37, %v354_v40  ;;  %v1563_v44 = vpop.f32.mrb[1].mxu1  ;;  %v2477_v53 = vadd.f32 %v1310_v52, %v252_v38 }
 0x164   :  { %v255_v43 = vpop.f32.mrb[2].mxu0  ;;  %v357_v46 = vpop.f32.mrb[2].mxu1 }
 0x165   :  { %v1544_v45 = vpop.f32.mrb[3].mxu0  ;;  %v450_v47 = vadd.f32 %v449_v39, %v355_v42  ;;  %v1564_v48 = vpop.f32.mrb[3].mxu1 }
 0x167   :  { %v451_v49 = vmax.f32 %v450_v47, 0.0 }
 0x169   :  { %v2458_v50 = vmin.f32 %v451_v49, 1.0 }
 0x16b   :  { %v457_v51 = vpack.c.bf16 %v2458_v50, %v2458_v50  ;;  %v540_v20 = vmul.f32 0.8, %v2458_v50 }
 0x16d   :  { %1622 = vmatmul.mubr.bf16.vlgmr.msra.gmra.mrb[8].mxu0 %v457_v51 }
 0x16e   :  { %1646 = vmatpush3.bf16.msra.mxu0 %v2379_v25  ;;  %1661 = vmatprep.mubr.msk.bf16.mxu0 %vm2185_vm0, %v2184_v0 }
 0x16f   :  { %1647 = vmatprep.subr.bf16.mxu0 %v2184_v0 }
 0x172   :  { %1648 = vmatpush3.bf16.msra.mxu0 %v2385_v26 }
 0x173   :  { %1649 = vmatprep.subr.bf16.mxu0 %v2184_v0 }
 0x176   :  { %1650 = vmatpush3.bf16.msra.mxu0 %v2395_v27 }
 0x177   :  { %1651 = vmatprep.subr.bf16.mxu0 %v2184_v0 }
 0x17a   :  { %1652 = vmatpush3.bf16.msra.mxu0 %v2401_v28 }
 0x17b   :  { %1653 = vmatprep.subr.bf16.mxu0 %v2184_v0 }
 0x17e   :  { %1654 = vmatpush3.bf16.msra.mxu0 %v2407_v29 }
 0x17f   :  { %1655 = vmatprep.subr.bf16.mxu0 %v2184_v0 }
 0x182   :  { %v442_v55 = vpop.f32.mrb[4].mxu0  ;;  %1656 = vmatpush3.bf16.msra.mxu0 %v2413_v30 }
 0x183   :  { %v448_v56 = vadd.f32 %v442_v55, %v2477_v53  ;;  %v1583_v57 = vpop.f32.mrb[5].mxu0  ;;  %1657 = vmatprep.subr.bf16.mxu0 %v2184_v0 }
 0x184   :  { %v445_v58 = vpop.f32.mrb[6].mxu0 }
 0x185   :  { %v454_v59 = vadd.f32 %v453_v54, %v448_v56  ;;  %v1584_v60 = vpop.f32.mrb[7].mxu0 }
 0x186   :  { %1658 = vmatpush3.bf16.msra.mxu0 %v2419_v33 }
 0x187   :  { %v455_v61 = vmax.f32 %v454_v59, 0.0  ;;  %1659 = vmatprep.subr.bf16.mxu0 %v2184_v0 }
 0x189   :  { %v456_v62 = vmin.f32 %v455_v61, 1.0 }
 0x18a   :  { %1660 = vmatpush3.bf16.msra.mxu0 %v2425_v35 }
 0x18b   :  { %v458_v63 = vpack.c.bf16 %v456_v62, %v456_v62  ;;  %1685 = vmatprep.subr.bf16.mxu0 %v2184_v0  ;;  %v544_v5 = vmul.f32 0.8, %v456_v62 }
 0x18d   :  { %1602 = vmatmul.mubr.bf16.vlgmr.msra.gmra.mrb[4].mxu1 %v458_v63 }
 0x18e   :  { %1626 = vmatpush3.bf16.msra.mxu1 %v2339_v2  ;;  %1641 = vmatprep.mubr.msk.bf16.mxu1 %vm2185_vm0, %v2184_v0 }
 0x18f   :  { %1627 = vmatprep.subr.bf16.mxu1 %v2184_v0 }
 0x192   :  { %1628 = vmatpush3.bf16.msra.mxu1 %v2343_v4 }
 0x193   :  { %1629 = vmatprep.subr.bf16.mxu1 %v2184_v0 }
 0x196   :  { %1630 = vmatpush3.bf16.msra.mxu1 %v2348_v6 }
 0x197   :  { %1631 = vmatprep.subr.bf16.mxu1 %v2184_v0 }
 0x19a   :  { %1632 = vmatpush3.bf16.msra.mxu1 %v2353_v8 }
 0x19b   :  { %1633 = vmatprep.subr.bf16.mxu1 %v2184_v0 }
 0x19e   :  { %1634 = vmatpush3.bf16.msra.mxu1 %v2358_v10 }
 0x19f   :  { %1635 = vmatprep.subr.bf16.mxu1 %v2184_v0 }
 0x1a2   :  { %1636 = vmatpush3.bf16.msra.mxu1 %v2363_v13 }
 0x1a3   :  { %1637 = vmatprep.subr.bf16.mxu1 %v2184_v0 }
 0x1a6   :  { %1638 = vmatpush3.bf16.msra.mxu1 %v2371_v18 }
 0x1a7   :  { %1639 = vmatprep.subr.bf16.mxu1 %v2184_v0 }
 0x1aa   :  { %1640 = vmatpush3.bf16.msra.mxu1 %v2376_v22 }
 0x1ab   :  { %1665 = vmatprep.subr.bf16.mxu1 %v2184_v0 }
 0x240   :  { %v533_v1 = vpop.f32.mrb[8].mxu0 }
 0x241   :  { %v539_v3 = vadd.f32 %v533_v1, %v2477_v53  ;;  %v1623_v7 = vpop.f32.mrb[9].mxu0 }
 0x242   :  { %v536_v9 = vpop.f32.mrb[10].mxu0 }
 0x243   :  { %v545_v11 = vadd.f32 %v544_v5, %v539_v3  ;;  %v1624_v12 = vpop.f32.mrb[11].mxu0 }
 0x245   :  { %v546_v14 = vmax.f32 %v545_v11, 0.0 }
 0x247   :  { %v2506_v15 = vmin.f32 %v546_v14, 1.0 }
 0x249   :  { %v549_v16 = vpack.c.bf16 %v2506_v15, %v2506_v15  ;;  %v635_v50 = vmul.f32 0.8, %v2506_v15 }
 0x24b   :  { %1642 = vmatmul.mubr.bf16.vlgmr.msra.gmra.mrb[8].mxu1 %v549_v16 }
 0x24c   :  { %1666 = vmatpush3.bf16.msra.mxu1 %v2339_v2  ;;  %1681 = vmatprep.mubr.msk.bf16.mxu1 %vm2185_vm0, %v2184_v0 }
 0x24d   :  { %1667 = vmatprep.subr.bf16.mxu1 %v2184_v0 }
 0x250   :  { %1668 = vmatpush3.bf16.msra.mxu1 %v2343_v4 }
 0x251   :  { %1669 = vmatprep.subr.bf16.mxu1 %v2184_v0 }
 0x254   :  { %1670 = vmatpush3.bf16.msra.mxu1 %v2348_v6 }
 0x255   :  { %1671 = vmatprep.subr.bf16.mxu1 %v2184_v0 }
 0x258   :  { %1672 = vmatpush3.bf16.msra.mxu1 %v2353_v8 }
 0x259   :  { %1673 = vmatprep.subr.bf16.mxu1 %v2184_v0 }
 0x25c   :  { %1674 = vmatpush3.bf16.msra.mxu1 %v2358_v10 }
 0x25d   :  { %1675 = vmatprep.subr.bf16.mxu1 %v2184_v0 }
 0x260   :  { %v493_v17 = vpop.f32.mrb[4].mxu1  ;;  %1676 = vmatpush3.bf16.msra.mxu1 %v2363_v13 }
 0x261   :  { %v494_v19 = vadd.f32 %v2455_v37, %v493_v17  ;;  %v1603_v21 = vpop.f32.mrb[5].mxu1  ;;  %1677 = vmatprep.subr.bf16.mxu1 %v2184_v0 }
 0x262   :  { %v496_v23 = vpop.f32.mrb[6].mxu1 }
 0x263   :  { %v541_v24 = vadd.f32 %v540_v20, %v494_v19  ;;  %v1604_v31 = vpop.f32.mrb[7].mxu1 }
 0x264   :  { %1678 = vmatpush3.bf16.msra.mxu1 %v2371_v18 }
 0x265   :  { %v542_v32 = vmax.f32 %v541_v24, 0.0  ;;  %1679 = vmatprep.subr.bf16.mxu1 %v2184_v0 }
 0x267   :  { %v543_v34 = vmin.f32 %v542_v32, 1.0 }
 0x268   :  { %1680 = vmatpush3.bf16.msra.mxu1 %v2376_v22 }
 0x269   :  { %v548_v36 = vpack.c.bf16 %v543_v34, %v543_v34  ;;  %1705 = vmatprep.subr.bf16.mxu1 %v2184_v0  ;;  %v631_v40 = vmul.f32 0.8, %v543_v34 }
 0x26b   :  { %1662 = vmatmul.mubr.bf16.vlgmr.msra.gmra.mrb[12].mxu0 %v548_v36 }
 0x26c   :  { %1686 = vmatpush3.bf16.msra.mxu0 %v2379_v25  ;;  %1701 = vmatprep.mubr.msk.bf16.mxu0 %vm2185_vm0, %v2184_v0 }
 0x26d   :  { %1687 = vmatprep.subr.bf16.mxu0 %v2184_v0 }
 0x270   :  { %1688 = vmatpush3.bf16.msra.mxu0 %v2385_v26 }
 0x271   :  { %1689 = vmatprep.subr.bf16.mxu0 %v2184_v0 }
 0x274   :  { %1690 = vmatpush3.bf16.msra.mxu0 %v2395_v27 }
 0x275   :  { %1691 = vmatprep.subr.bf16.mxu0 %v2184_v0 }
 0x278   :  { %1692 = vmatpush3.bf16.msra.mxu0 %v2401_v28 }
 0x279   :  { %1693 = vmatprep.subr.bf16.mxu0 %v2184_v0 }
 0x27c   :  { %1694 = vmatpush3.bf16.msra.mxu0 %v2407_v29 }
 0x27d   :  { %1695 = vmatprep.subr.bf16.mxu0 %v2184_v0 }
 0x280   :  { %1696 = vmatpush3.bf16.msra.mxu0 %v2413_v30 }
 0x281   :  { %1697 = vmatprep.subr.bf16.mxu0 %v2184_v0 }
 0x284   :  { %1698 = vmatpush3.bf16.msra.mxu0 %v2419_v33 }
 0x285   :  { %1699 = vmatprep.subr.bf16.mxu0 %v2184_v0 }
 0x288   :  { %1700 = vmatpush3.bf16.msra.mxu0 %v2425_v35 }
 0x289   :  { %1725 = vmatprep.subr.bf16.mxu0 %v2184_v0 }
 0x31e   :  { %v584_v38 = vpop.f32.mrb[8].mxu1 }
 0x31f   :  { %v585_v39 = vadd.f32 %v2455_v37, %v584_v38  ;;  %v1643_v41 = vpop.f32.mrb[9].mxu1 }
 0x320   :  { %v587_v42 = vpop.f32.mrb[10].mxu1 }
 0x321   :  { %v632_v43 = vadd.f32 %v631_v40, %v585_v39  ;;  %v1644_v44 = vpop.f32.mrb[11].mxu1 }
 0x323   :  { %v633_v45 = vmax.f32 %v632_v43, 0.0 }
 0x325   :  { %v2549_v46 = vmin.f32 %v633_v45, 1.0 }
 0x327   :  { %v639_v47 = vpack.c.bf16 %v2549_v46, %v2549_v46  ;;  %v722_v14 = vmul.f32 0.8, %v2549_v46 }
 0x329   :  { %1702 = vmatmul.mubr.bf16.vlgmr.msra.gmra.mrb[16].mxu0 %v639_v47 }
 0x32a   :  { %1726 = vmatpush3.bf16.msra.mxu0 %v2379_v25  ;;  %1741 = vmatprep.mubr.msk.bf16.mxu0 %vm2185_vm0, %v2184_v0 }
 0x32b   :  { %1727 = vmatprep.subr.bf16.mxu0 %v2184_v0 }
 0x32e   :  { %1728 = vmatpush3.bf16.msra.mxu0 %v2385_v26 }
 0x32f   :  { %1729 = vmatprep.subr.bf16.mxu0 %v2184_v0 }
 0x332   :  { %1730 = vmatpush3.bf16.msra.mxu0 %v2395_v27 }
 0x333   :  { %1731 = vmatprep.subr.bf16.mxu0 %v2184_v0 }
 0x336   :  { %1732 = vmatpush3.bf16.msra.mxu0 %v2401_v28 }
 0x337   :  { %1733 = vmatprep.subr.bf16.mxu0 %v2184_v0 }
 0x33a   :  { %1734 = vmatpush3.bf16.msra.mxu0 %v2407_v29 }
 0x33b   :  { %1735 = vmatprep.subr.bf16.mxu0 %v2184_v0 }
 0x33e   :  { %v624_v48 = vpop.f32.mrb[12].mxu0  ;;  %1736 = vmatpush3.bf16.msra.mxu0 %v2413_v30 }
 0x33f   :  { %v630_v49 = vadd.f32 %v624_v48, %v2477_v53  ;;  %v1663_v51 = vpop.f32.mrb[13].mxu0  ;;  %1737 = vmatprep.subr.bf16.mxu0 %v2184_v0 }
 0x340   :  { %v627_v52 = vpop.f32.mrb[14].mxu0 }
 0x341   :  { %v636_v54 = vadd.f32 %v635_v50, %v630_v49  ;;  %v1664_v55 = vpop.f32.mrb[15].mxu0 }
 0x342   :  { %1738 = vmatpush3.bf16.msra.mxu0 %v2419_v33 }
 0x343   :  { %v637_v56 = vmax.f32 %v636_v54, 0.0  ;;  %1739 = vmatprep.subr.bf16.mxu0 %v2184_v0 }
 0x345   :  { %v638_v57 = vmin.f32 %v637_v56, 1.0 }
 0x346   :  { %1740 = vmatpush3.bf16.msra.mxu0 %v2425_v35 }
 0x347   :  { %v640_v58 = vpack.c.bf16 %v638_v57, %v638_v57  ;;  %1765 = vmatprep.subr.bf16.mxu0 %v2184_v0  ;;  %v726_v61 = vmul.f32 0.8, %v638_v57 }
 0x349   :  { %1682 = vmatmul.mubr.bf16.vlgmr.msra.gmra.mrb[12].mxu1 %v640_v58 }
 0x34a   :  { %1706 = vmatpush3.bf16.msra.mxu1 %v2339_v2  ;;  %1721 = vmatprep.mubr.msk.bf16.mxu1 %vm2185_vm0, %v2184_v0 }
 0x34b   :  { %1707 = vmatprep.subr.bf16.mxu1 %v2184_v0 }
 0x34e   :  { %1708 = vmatpush3.bf16.msra.mxu1 %v2343_v4 }
 0x34f   :  { %1709 = vmatprep.subr.bf16.mxu1 %v2184_v0 }
 0x352   :  { %1710 = vmatpush3.bf16.msra.mxu1 %v2348_v6 }
 0x353   :  { %1711 = vmatprep.subr.bf16.mxu1 %v2184_v0 }
 0x356   :  { %1712 = vmatpush3.bf16.msra.mxu1 %v2353_v8 }
 0x357   :  { %1713 = vmatprep.subr.bf16.mxu1 %v2184_v0 }
 0x35a   :  { %1714 = vmatpush3.bf16.msra.mxu1 %v2358_v10 }
 0x35b   :  { %1715 = vmatprep.subr.bf16.mxu1 %v2184_v0 }
 0x35e   :  { %1716 = vmatpush3.bf16.msra.mxu1 %v2363_v13 }
 0x35f   :  { %1717 = vmatprep.subr.bf16.mxu1 %v2184_v0 }
 0x362   :  { %1718 = vmatpush3.bf16.msra.mxu1 %v2371_v18 }
 0x363   :  { %1719 = vmatprep.subr.bf16.mxu1 %v2184_v0 }
 0x366   :  { %1720 = vmatpush3.bf16.msra.mxu1 %v2376_v22 }
 0x367   :  { %1745 = vmatprep.subr.bf16.mxu1 %v2184_v0 }
 0x3fc   :  { %v715_v59 = vpop.f32.mrb[16].mxu0 }
 0x3fd   :  { %v721_v60 = vadd.f32 %v715_v59, %v2477_v53  ;;  %v1703_v62 = vpop.f32.mrb[17].mxu0 }
 0x3fe   :  { %v718_v63 = vpop.f32.mrb[18].mxu0 }
 0x3ff   :  { %v727_v1 = vadd.f32 %v726_v61, %v721_v60  ;;  %v1704_v3 = vpop.f32.mrb[19].mxu0 }
 0x401   :  { %v728_v5 = vmax.f32 %v727_v1, 0.0 }
 0x403   :  { %v2592_v7 = vmin.f32 %v728_v5, 1.0 }
 0x405   :  { %v731_v9 = vpack.c.bf16 %v2592_v7, %v2592_v7  ;;  %v817_v45 = vmul.f32 0.8, %v2592_v7 }
 0x407   :  { %1722 = vmatmul.mubr.bf16.vlgmr.msra.gmra.mrb[16].mxu1 %v731_v9 }
 0x408   :  { %1746 = vmatpush3.bf16.msra.mxu1 %v2339_v2  ;;  %1761 = vmatprep.mubr.msk.bf16.mxu1 %vm2185_vm0, %v2184_v0 }
 0x409   :  { %1747 = vmatprep.subr.bf16.mxu1 %v2184_v0 }
 0x40c   :  { %1748 = vmatpush3.bf16.msra.mxu1 %v2343_v4 }
 0x40d   :  { %1749 = vmatprep.subr.bf16.mxu1 %v2184_v0 }
 0x410   :  { %1750 = vmatpush3.bf16.msra.mxu1 %v2348_v6 }
 0x411   :  { %1751 = vmatprep.subr.bf16.mxu1 %v2184_v0 }
 0x414   :  { %1752 = vmatpush3.bf16.msra.mxu1 %v2353_v8 }
 0x415   :  { %1753 = vmatprep.subr.bf16.mxu1 %v2184_v0 }
 0x418   :  { %1754 = vmatpush3.bf16.msra.mxu1 %v2358_v10 }
 0x419   :  { %1755 = vmatprep.subr.bf16.mxu1 %v2184_v0 }
 0x41c   :  { %v675_v11 = vpop.f32.mrb[12].mxu1  ;;  %1756 = vmatpush3.bf16.msra.mxu1 %v2363_v13 }
 0x41d   :  { %v676_v12 = vadd.f32 %v2455_v37, %v675_v11  ;;  %v1683_v15 = vpop.f32.mrb[13].mxu1  ;;  %1757 = vmatprep.subr.bf16.mxu1 %v2184_v0 }
 0x41e   :  { %v678_v16 = vpop.f32.mrb[14].mxu1 }
 0x41f   :  { %v723_v17 = vadd.f32 %v722_v14, %v676_v12  ;;  %v1684_v19 = vpop.f32.mrb[15].mxu1 }
 0x420   :  { %1758 = vmatpush3.bf16.msra.mxu1 %v2371_v18 }
 0x421   :  { %v724_v20 = vmax.f32 %v723_v17, 0.0  ;;  %1759 = vmatprep.subr.bf16.mxu1 %v2184_v0 }
 0x423   :  { %v725_v21 = vmin.f32 %v724_v20, 1.0 }
 0x424   :  { %1760 = vmatpush3.bf16.msra.mxu1 %v2376_v22 }
 0x425   :  { %v730_v23 = vpack.c.bf16 %v725_v21, %v725_v21  ;;  %1785 = vmatprep.subr.bf16.mxu1 %v2184_v0  ;;  %v813_v32 = vmul.f32 0.8, %v725_v21 }
 0x427   :  { %1742 = vmatmul.mubr.bf16.vlgmr.msra.gmra.mrb[20].mxu0 %v730_v23 }
 0x428   :  { %1766 = vmatpush3.bf16.msra.mxu0 %v2379_v25  ;;  %1781 = vmatprep.mubr.msk.bf16.mxu0 %vm2185_vm0, %v2184_v0 }
 0x429   :  { %1767 = vmatprep.subr.bf16.mxu0 %v2184_v0 }
 0x42c   :  { %1768 = vmatpush3.bf16.msra.mxu0 %v2385_v26 }
 0x42d   :  { %1769 = vmatprep.subr.bf16.mxu0 %v2184_v0 }
 0x430   :  { %1770 = vmatpush3.bf16.msra.mxu0 %v2395_v27 }
 0x431   :  { %1771 = vmatprep.subr.bf16.mxu0 %v2184_v0 }
 0x434   :  { %1772 = vmatpush3.bf16.msra.mxu0 %v2401_v28 }
 0x435   :  { %1773 = vmatprep.subr.bf16.mxu0 %v2184_v0 }
 0x438   :  { %1774 = vmatpush3.bf16.msra.mxu0 %v2407_v29 }
 0x439   :  { %1775 = vmatprep.subr.bf16.mxu0 %v2184_v0 }
 0x43c   :  { %1776 = vmatpush3.bf16.msra.mxu0 %v2413_v30 }
 0x43d   :  { %1777 = vmatprep.subr.bf16.mxu0 %v2184_v0 }
 0x440   :  { %1778 = vmatpush3.bf16.msra.mxu0 %v2419_v33 }
 0x441   :  { %1779 = vmatprep.subr.bf16.mxu0 %v2184_v0 }
 0x444   :  { %1780 = vmatpush3.bf16.msra.mxu0 %v2425_v35 }
 0x445   :  { %1805 = vmatprep.subr.bf16.mxu0 %v2184_v0 }
 0x4da   :  { %v766_v24 = vpop.f32.mrb[16].mxu1 }
 0x4db   :  { %v767_v31 = vadd.f32 %v2455_v37, %v766_v24  ;;  %v1723_v34 = vpop.f32.mrb[17].mxu1 }
 0x4dc   :  { %v769_v36 = vpop.f32.mrb[18].mxu1 }
 0x4dd   :  { %v814_v38 = vadd.f32 %v813_v32, %v767_v31  ;;  %v1724_v39 = vpop.f32.mrb[19].mxu1 }
 0x4df   :  { %v815_v40 = vmax.f32 %v814_v38, 0.0 }
 0x4e1   :  { %v2635_v41 = vmin.f32 %v815_v40, 1.0 }
 0x4e3   :  { %v821_v42 = vpack.c.bf16 %v2635_v41, %v2635_v41  ;;  %v904_v3 = vmul.f32 0.8, %v2635_v41 }
 0x4e5   :  { %1782 = vmatmul.mubr.bf16.vlgmr.msra.gmra.mrb[24].mxu0 %v821_v42 }
 0x4e6   :  { %1806 = vmatpush3.bf16.msra.mxu0 %v2379_v25  ;;  %1821 = vmatprep.mubr.msk.bf16.mxu0 %vm2185_vm0, %v2184_v0 }
 0x4e7   :  { %1807 = vmatprep.subr.bf16.mxu0 %v2184_v0 }
 0x4ea   :  { %1808 = vmatpush3.bf16.msra.mxu0 %v2385_v26 }
 0x4eb   :  { %1809 = vmatprep.subr.bf16.mxu0 %v2184_v0 }
 0x4ee   :  { %1810 = vmatpush3.bf16.msra.mxu0 %v2395_v27 }
 0x4ef   :  { %1811 = vmatprep.subr.bf16.mxu0 %v2184_v0 }
 0x4f2   :  { %1812 = vmatpush3.bf16.msra.mxu0 %v2401_v28 }
 0x4f3   :  { %1813 = vmatprep.subr.bf16.mxu0 %v2184_v0 }
 0x4f6   :  { %1814 = vmatpush3.bf16.msra.mxu0 %v2407_v29 }
 0x4f7   :  { %1815 = vmatprep.subr.bf16.mxu0 %v2184_v0 }
 0x4fa   :  { %v806_v43 = vpop.f32.mrb[20].mxu0  ;;  %1816 = vmatpush3.bf16.msra.mxu0 %v2413_v30 }
 0x4fb   :  { %v812_v44 = vadd.f32 %v806_v43, %v2477_v53  ;;  %v1743_v46 = vpop.f32.mrb[21].mxu0  ;;  %1817 = vmatprep.subr.bf16.mxu0 %v2184_v0 }
 0x4fc   :  { %v809_v47 = vpop.f32.mrb[22].mxu0  ;;  %v1983_v46 = vld [vmem:[#allocation8 + $0x10] sm:$0xff]  }
 0x4fd   :  { %v818_v48 = vadd.f32 %v817_v45, %v812_v44  ;;  %v1744_v49 = vpop.f32.mrb[23].mxu0  ;;  %v1981_v44 = vld [vmem:[#allocation8] sm:$0xff]   ;;  %v1982_v45 = vld [vmem:[#allocation8 + $0x8] sm:$0xff]   ;;  %v1984_v47 = vld [vmem:[#allocation8 + $0x18] sm:$0xff]  }
 0x4fe   :  { %1818 = vmatpush3.bf16.msra.mxu0 %v2419_v33 }
 0x4ff   :  { %v819_v50 = vmax.f32 %v818_v48, 0.0  ;;  %1819 = vmatprep.subr.bf16.mxu0 %v2184_v0 }
 0x501   :  { %v820_v51 = vmin.f32 %v819_v50, 1.0 }
 0x502   :  { %1820 = vmatpush3.bf16.msra.mxu0 %v2425_v35 }
 0x503   :  { %v822_v52 = vpack.c.bf16 %v820_v51, %v820_v51  ;;  %1845 = vmatprep.subr.bf16.mxu0 %v2184_v0  ;;  %v908_v56 = vmul.f32 0.8, %v820_v51 }
 0x505   :  { %1762 = vmatmul.mubr.bf16.vlgmr.msra.gmra.mrb[20].mxu1 %v822_v52 }
 0x506   :  { %1786 = vmatpush3.bf16.msra.mxu1 %v2339_v2  ;;  %1801 = vmatprep.mubr.msk.bf16.mxu1 %vm2185_vm0, %v2184_v0 }
 0x507   :  { %1787 = vmatprep.subr.bf16.mxu1 %v2184_v0 }
 0x50a   :  { %1788 = vmatpush3.bf16.msra.mxu1 %v2343_v4 }
 0x50b   :  { %1789 = vmatprep.subr.bf16.mxu1 %v2184_v0 }
 0x50e   :  { %1790 = vmatpush3.bf16.msra.mxu1 %v2348_v6 }
 0x50f   :  { %1791 = vmatprep.subr.bf16.mxu1 %v2184_v0 }
 0x512   :  { %1792 = vmatpush3.bf16.msra.mxu1 %v2353_v8 }
 0x513   :  { %1793 = vmatprep.subr.bf16.mxu1 %v2184_v0 }
 0x516   :  { %1794 = vmatpush3.bf16.msra.mxu1 %v2358_v10 }
 0x517   :  { %1795 = vmatprep.subr.bf16.mxu1 %v2184_v0 }
 0x51a   :  { %1796 = vmatpush3.bf16.msra.mxu1 %v2363_v13 }
 0x51b   :  { %1797 = vmatprep.subr.bf16.mxu1 %v2184_v0 }
 0x51e   :  { %1798 = vmatpush3.bf16.msra.mxu1 %v2371_v18 }
 0x51f   :  { %1799 = vmatprep.subr.bf16.mxu1 %v2184_v0 }
 0x522   :  { %1800 = vmatpush3.bf16.msra.mxu1 %v2376_v22 }
 0x523   :  { %1825 = vmatprep.subr.bf16.mxu1 %v2184_v0 }
 0x5b8   :  { %v897_v54 = vpop.f32.mrb[24].mxu0 }
 0x5b9   :  { %v903_v55 = vadd.f32 %v897_v54, %v2477_v53  ;;  %v1783_v57 = vpop.f32.mrb[25].mxu0 }
 0x5ba   :  { %v900_v58 = vpop.f32.mrb[26].mxu0 }
 0x5bb   :  { %v909_v59 = vadd.f32 %v908_v56, %v903_v55  ;;  %v1784_v60 = vpop.f32.mrb[27].mxu0 }
 0x5bd   :  { %v910_v61 = vmax.f32 %v909_v59, 0.0 }
 0x5bf   :  { %v2678_v62 = vmin.f32 %v910_v61, 1.0  ;;  %v1986_v61 = vld [vmem:[#allocation8 + $0x28] sm:$0xff]  }
 0x5c1   :  { %v913_v63 = vpack.c.bf16 %v2678_v62, %v2678_v62  ;;  %v999_v34 = vmul.f32 0.8, %v2678_v62 }
 0x5c3   :  { %1802 = vmatmul.mubr.bf16.vlgmr.msra.gmra.mrb[24].mxu1 %v913_v63 }
 0x5c4   :  { %1826 = vmatpush3.bf16.msra.mxu1 %v2339_v2  ;;  %1841 = vmatprep.mubr.msk.bf16.mxu1 %vm2185_vm0, %v2184_v0 }
 0x5c5   :  { %1827 = vmatprep.subr.bf16.mxu1 %v2184_v0 }
 0x5c8   :  { %1828 = vmatpush3.bf16.msra.mxu1 %v2343_v4 }
 0x5c9   :  { %1829 = vmatprep.subr.bf16.mxu1 %v2184_v0 }
 0x5cc   :  { %1830 = vmatpush3.bf16.msra.mxu1 %v2348_v6 }
 0x5cd   :  { %1831 = vmatprep.subr.bf16.mxu1 %v2184_v0 }
 0x5d0   :  { %1832 = vmatpush3.bf16.msra.mxu1 %v2353_v8 }
 0x5d1   :  { %1833 = vmatprep.subr.bf16.mxu1 %v2184_v0 }
 0x5d4   :  { %1834 = vmatpush3.bf16.msra.mxu1 %v2358_v10 }
 0x5d5   :  { %1835 = vmatprep.subr.bf16.mxu1 %v2184_v0 }
 0x5d8   :  { %v857_v2 = vpop.f32.mrb[20].mxu1  ;;  %1836 = vmatpush3.bf16.msra.mxu1 %v2363_v13 }
 0x5d9   :  { %v858_v1 = vadd.f32 %v2455_v37, %v857_v2  ;;  %v1763_v4 = vpop.f32.mrb[21].mxu1  ;;  %1837 = vmatprep.subr.bf16.mxu1 %v2184_v0 }
 0x5da   :  { %v860_v5 = vpop.f32.mrb[22].mxu1 }
 0x5db   :  { %v905_v6 = vadd.f32 %v904_v3, %v858_v1  ;;  %v1764_v7 = vpop.f32.mrb[23].mxu1  ;;  %v1987_v3 = vld [vmem:[#allocation8 + $0x30] sm:$0xff]  }
 0x5dc   :  { %1838 = vmatpush3.bf16.msra.mxu1 %v2371_v18 }
 0x5dd   :  { %v906_v8 = vmax.f32 %v905_v6, 0.0  ;;  %1839 = vmatprep.subr.bf16.mxu1 %v2184_v0 }
 0x5df   :  { %v907_v9 = vmin.f32 %v906_v8, 1.0 }
 0x5e0   :  { %1840 = vmatpush3.bf16.msra.mxu1 %v2376_v22 }
 0x5e1   :  { %v912_v11 = vpack.c.bf16 %v907_v9, %v907_v9  ;;  %1865 = vmatprep.subr.bf16.mxu1 %v2184_v0  ;;  %v995_v15 = vmul.f32 0.8, %v907_v9 }
 0x5e3   :  { %1822 = vmatmul.mubr.bf16.vlgmr.msra.gmra.mrb[28].mxu0 %v912_v11 }
 0x5e4   :  { %1846 = vmatpush3.bf16.msra.mxu0 %v2379_v25  ;;  %1861 = vmatprep.mubr.msk.bf16.mxu0 %vm2185_vm0, %v2184_v0 }
 0x5e5   :  { %1847 = vmatprep.subr.bf16.mxu0 %v2184_v0 }
 0x5e8   :  { %1848 = vmatpush3.bf16.msra.mxu0 %v2385_v26 }
 0x5e9   :  { %1849 = vmatprep.subr.bf16.mxu0 %v2184_v0 }
 0x5ec   :  { %1850 = vmatpush3.bf16.msra.mxu0 %v2395_v27 }
 0x5ed   :  { %1851 = vmatprep.subr.bf16.mxu0 %v2184_v0 }
 0x5f0   :  { %1852 = vmatpush3.bf16.msra.mxu0 %v2401_v28 }
 0x5f1   :  { %1853 = vmatprep.subr.bf16.mxu0 %v2184_v0 }
 0x5f4   :  { %1854 = vmatpush3.bf16.msra.mxu0 %v2407_v29 }
 0x5f5   :  { %1855 = vmatprep.subr.bf16.mxu0 %v2184_v0 }
 0x5f8   :  { %1856 = vmatpush3.bf16.msra.mxu0 %v2413_v30 }
 0x5f9   :  { %1857 = vmatprep.subr.bf16.mxu0 %v2184_v0 }
 0x5fc   :  { %1858 = vmatpush3.bf16.msra.mxu0 %v2419_v33 }
 0x5fd   :  { %1859 = vmatprep.subr.bf16.mxu0 %v2184_v0 }
 0x600   :  { %1860 = vmatpush3.bf16.msra.mxu0 %v2425_v35 }
 0x601   :  { %1885 = vmatprep.subr.bf16.mxu0 %v2184_v0 }
 0x696   :  { %v948_v12 = vpop.f32.mrb[24].mxu1 }
 0x697   :  { %v949_v14 = vadd.f32 %v2455_v37, %v948_v12  ;;  %v1803_v16 = vpop.f32.mrb[25].mxu1 }
 0x698   :  { %v951_v17 = vpop.f32.mrb[26].mxu1 }
 0x699   :  { %v996_v19 = vadd.f32 %v995_v15, %v949_v14  ;;  %v1804_v20 = vpop.f32.mrb[27].mxu1 }
 0x69b   :  { %v997_v21 = vmax.f32 %v996_v19, 0.0 }
 0x69d   :  { %v2721_v23 = vmin.f32 %v997_v21, 1.0 }
 0x69f   :  { %v1003_v24 = vpack.c.bf16 %v2721_v23, %v2721_v23  ;;  %v1086_v59 = vmul.f32 0.8, %v2721_v23 }
 0x6a1   :  { %1862 = vmatmul.mubr.bf16.vlgmr.msra.gmra.mrb[32].mxu0 %v1003_v24 }
 0x6a2   :  { %1886 = vmatpush3.bf16.msra.mxu0 %v2379_v25  ;;  %1901 = vmatprep.mubr.msk.bf16.mxu0 %vm2185_vm0, %v2184_v0 }
 0x6a3   :  { %1887 = vmatprep.subr.bf16.mxu0 %v2184_v0 }
 0x6a6   :  { %1888 = vmatpush3.bf16.msra.mxu0 %v2385_v26 }
 0x6a7   :  { %1889 = vmatprep.subr.bf16.mxu0 %v2184_v0 }
 0x6aa   :  { %1890 = vmatpush3.bf16.msra.mxu0 %v2395_v27 }
 0x6ab   :  { %1891 = vmatprep.subr.bf16.mxu0 %v2184_v0 }
 0x6ae   :  { %1892 = vmatpush3.bf16.msra.mxu0 %v2401_v28 }
 0x6af   :  { %1893 = vmatprep.subr.bf16.mxu0 %v2184_v0 }
 0x6b2   :  { %1894 = vmatpush3.bf16.msra.mxu0 %v2407_v29 }
 0x6b3   :  { %1895 = vmatprep.subr.bf16.mxu0 %v2184_v0 }
 0x6b6   :  { %v988_v31 = vpop.f32.mrb[28].mxu0  ;;  %1896 = vmatpush3.bf16.msra.mxu0 %v2413_v30 }
 0x6b7   :  { %v994_v32 = vadd.f32 %v988_v31, %v2477_v53  ;;  %v1823_v36 = vpop.f32.mrb[29].mxu0  ;;  %1897 = vmatprep.subr.bf16.mxu0 %v2184_v0 }
 0x6b8   :  { %v991_v38 = vpop.f32.mrb[30].mxu0 }
 0x6b9   :  { %v1000_v39 = vadd.f32 %v999_v34, %v994_v32  ;;  %v1824_v40 = vpop.f32.mrb[31].mxu0 }
 0x6ba   :  { %1898 = vmatpush3.bf16.msra.mxu0 %v2419_v33 }
 0x6bb   :  { %v1001_v41 = vmax.f32 %v1000_v39, 0.0  ;;  %1899 = vmatprep.subr.bf16.mxu0 %v2184_v0 }
 0x6bd   :  { %v1002_v42 = vmin.f32 %v1001_v41, 1.0 }
 0x6be   :  { %1900 = vmatpush3.bf16.msra.mxu0 %v2425_v35 }
 0x6bf   :  { %v1004_v43 = vpack.c.bf16 %v1002_v42, %v1002_v42  ;;  %1925 = vmatprep.subr.bf16.mxu0 %v2184_v0  ;;  %v1090_v50 = vmul.f32 0.8, %v1002_v42 }
 0x6c1   :  { %1842 = vmatmul.mubr.bf16.vlgmr.msra.gmra.mrb[28].mxu1 %v1004_v43 }
 0x6c2   :  { %1866 = vmatpush3.bf16.msra.mxu1 %v1981_v44  ;;  %1881 = vmatprep.mubr.msk.bf16.mxu1 %vm2185_vm0, %v2184_v0 }
 0x6c3   :  { %1867 = vmatprep.subr.bf16.mxu1 %v2184_v0 }
 0x6c6   :  { %1868 = vmatpush3.bf16.msra.mxu1 %v1982_v45 }
 0x6c7   :  { %1869 = vmatprep.subr.bf16.mxu1 %v2184_v0 }
 0x6ca   :  { %1870 = vmatpush3.bf16.msra.mxu1 %v1983_v46 }
 0x6cb   :  { %1871 = vmatprep.subr.bf16.mxu1 %v2184_v0 }
 0x6ce   :  { %1872 = vmatpush3.bf16.msra.mxu1 %v1984_v47 }
 0x6cf   :  { %1873 = vmatprep.subr.bf16.mxu1 %v2184_v0 }
 0x6d2   :  { %1874 = vmatpush3.bf16.msra.mxu1 %v2358_v10 }
 0x6d3   :  { %1875 = vmatprep.subr.bf16.mxu1 %v2184_v0 }
 0x6d6   :  { %1876 = vmatpush3.bf16.msra.mxu1 %v2363_v13 }
 0x6d7   :  { %1877 = vmatprep.subr.bf16.mxu1 %v2184_v0 }
 0x6da   :  { %1878 = vmatpush3.bf16.msra.mxu1 %v2371_v18  ;;  %v1985_v18 = vld [vmem:[#allocation8 + $0x20] sm:$0xff]  }
 0x6db   :  { %1879 = vmatprep.subr.bf16.mxu1 %v2184_v0 }
 0x6de   :  { %1880 = vmatpush3.bf16.msra.mxu1 %v2376_v22 }
 0x6df   :  { %1905 = vmatprep.subr.bf16.mxu1 %v2184_v0 }
 0x774   :  { %v1079_v48 = vpop.f32.mrb[32].mxu0 }
 0x775   :  { %v1085_v49 = vadd.f32 %v1079_v48, %v2477_v53  ;;  %v1863_v51 = vpop.f32.mrb[33].mxu0 }
 0x776   :  { %v1082_v10 = vpop.f32.mrb[34].mxu0 }
 0x777   :  { %v1091_v52 = vadd.f32 %v1090_v50, %v1085_v49  ;;  %v1864_v54 = vpop.f32.mrb[35].mxu0 }
 0x779   :  { %v1092_v55 = vmax.f32 %v1091_v52, 0.0 }
 0x77b   :  { %v1093_v13 = vmin.f32 %v1092_v55, 1.0 }
 0x77d   :  { %v1095_v56 = vpack.c.bf16 %v1093_v13, %v1093_v13 }
 0x77f   :  { %1882 = vmatmul.mubr.bf16.vlgmr.msra.gmra.mrb[32].mxu1 %v1095_v56 }
 0x780   :  { %1906 = vmatpush3.bf16.msra.mxu1 %v1981_v44  ;;  %1921 = vmatprep.mubr.msk.bf16.mxu1 %vm2185_vm0, %v2184_v0 }
 0x781   :  { %1907 = vmatprep.subr.bf16.mxu1 %v2184_v0 }
 0x784   :  { %1908 = vmatpush3.bf16.msra.mxu1 %v1982_v45 }
 0x785   :  { %1909 = vmatprep.subr.bf16.mxu1 %v2184_v0 }
 0x788   :  { %1910 = vmatpush3.bf16.msra.mxu1 %v1983_v46 }
 0x789   :  { %1911 = vmatprep.subr.bf16.mxu1 %v2184_v0 }
 0x78c   :  { %1912 = vmatpush3.bf16.msra.mxu1 %v1984_v47 }
 0x78d   :  { %1913 = vmatprep.subr.bf16.mxu1 %v2184_v0 }
 0x790   :  { %1914 = vmatpush3.bf16.msra.mxu1 %v1985_v18 }
 0x791   :  { %1915 = vmatprep.subr.bf16.mxu1 %v2184_v0 }
 0x794   :  { %v1039_v57 = vpop.f32.mrb[28].mxu1  ;;  %1916 = vmatpush3.bf16.msra.mxu1 %v1986_v61 }
 0x795   :  { %v1040_v58 = vadd.f32 %v2455_v37, %v1039_v57  ;;  %v1843_v60 = vpop.f32.mrb[29].mxu1  ;;  %1917 = vmatprep.subr.bf16.mxu1 %v2184_v0 }
 0x796   :  { %v1042_v62 = vpop.f32.mrb[30].mxu1 }
 0x797   :  { %v1087_v63 = vadd.f32 %v1086_v59, %v1040_v58  ;;  %v1844_v2 = vpop.f32.mrb[31].mxu1 }
 0x798   :  { %1918 = vmatpush3.bf16.msra.mxu1 %v1987_v3 }
 0x799   :  { %v1088_v1 = vmax.f32 %v1087_v63, 0.0  ;;  %1919 = vmatprep.subr.bf16.mxu1 %v2184_v0 }
 0x79b   :  { %v1089_v4 = vmin.f32 %v1088_v1, 1.0 }
 0x79c   :  { %1920 = vmatpush3.bf16.msra.mxu1 %v2376_v22 }
 0x79d   :  { %v1094_v5 = vpack.c.bf16 %v1089_v4, %v1089_v4 }
 0x79f   :  { %1902 = vmatmul.mubr.bf16.vlgmr.msra.gmra.mrb[36].mxu0 %v1094_v5 }
 0x7a0   :  { %1926 = vmatpush3.bf16.msra.mxu0 %v2379_v25  ;;  %1941 = vmatprep.mubr.msk.bf16.mxu0 %vm2185_vm0, %v2184_v0 }
 0x7a1   :  { %1927 = vmatprep.subr.bf16.mxu0 %v2184_v0 }
 0x7a4   :  { %1928 = vmatpush3.bf16.msra.mxu0 %v2385_v26  ;;  %v1177_v26 = vmul.f32 0.8, %v1089_v4 }
 0x7a5   :  { %1929 = vmatprep.subr.bf16.mxu0 %v2184_v0 }
 0x7a8   :  { %1930 = vmatpush3.bf16.msra.mxu0 %v2395_v27 }
 0x7a9   :  { %1931 = vmatprep.subr.bf16.mxu0 %v2184_v0 }
 0x7ac   :  { %1932 = vmatpush3.bf16.msra.mxu0 %v2401_v28 }
 0x7ad   :  { %1933 = vmatprep.subr.bf16.mxu0 %v2184_v0 }
 0x7b0   :  { %1934 = vmatpush3.bf16.msra.mxu0 %v2407_v29 }
 0x7b1   :  { %1935 = vmatprep.subr.bf16.mxu0 %v2184_v0 }
 0x7b4   :  { %1936 = vmatpush3.bf16.msra.mxu0 %v2413_v30 }
 0x7b5   :  { %1937 = vmatprep.subr.bf16.mxu0 %v2184_v0 }
 0x7b8   :  { %1938 = vmatpush3.bf16.msra.mxu0 %v2419_v33  ;;  %v1181_v33 = vmul.f32 0.8, %v1093_v13 }
 0x7b9   :  { %1939 = vmatprep.subr.bf16.mxu0 %v2184_v0 }
 0x7bc   :  { %1940 = vmatpush3.bf16.msra.mxu0 %v2425_v35 }
 0x852   :  { %v1130_v22 = vpop.f32.mrb[32].mxu1 }
 0x853   :  { %v1131_v25 = vadd.f32 %v2455_v37, %v1130_v22  ;;  %v1883_v27 = vpop.f32.mrb[33].mxu1 }
 0x854   :  { %v1133_v28 = vpop.f32.mrb[34].mxu1 }
 0x855   :  { %v1178_v6 = vadd.f32 %v1177_v26, %v1131_v25  ;;  %v1884_v29 = vpop.f32.mrb[35].mxu1 }
 0x857   :  { %v1179_v7 = vmax.f32 %v1178_v6, 0.0 }
 0x859   :  { %v1180_v8 = vmin.f32 %v1179_v7, 1.0 }
 0x85b   :  { %v1185_v9 = vpack.c.bf16 %v1180_v8, %v1180_v8 }
 0x85d   :  { %1942 = vmatmul.mubr.bf16.vlgmr.msra.gmra.mrb[40].mxu0 %v1185_v9 }
 0x872   :  { %v1170_v30 = vpop.f32.mrb[36].mxu0 }
 0x873   :  { %v1176_v11 = vadd.f32 %v1170_v30, %v2477_v53  ;;  %v1903_v12 = vpop.f32.mrb[37].mxu0 }
 0x874   :  { %v1173_v0 = vpop.f32.mrb[38].mxu0 }
 0x875   :  { %v1182_v14 = vadd.f32 %v1181_v33, %v1176_v11  ;;  %v1904_v35 = vpop.f32.mrb[39].mxu0 }
 0x877   :  { %v1183_v15 = vmax.f32 %v1182_v14, 0.0 }
 0x879   :  { %v1184_v16 = vmin.f32 %v1183_v15, 1.0 }
 0x87b   :  { %v1186_v17 = vpack.c.bf16 %v1184_v16, %v1184_v16  ;;  %v1272_v21 = vmul.f32 0.8, %v1184_v16 }
 0x87d   :  { %1922 = vmatmul.mubr.bf16.vlgmr.msra.gmra.mrb[36].mxu1 %v1186_v17 }
 0x930   :  { %v1261_v19 = vpop.f32.mrb[40].mxu0 }
 0x931   :  { %v1267_v20 = vadd.f32 %v1261_v19, %v2477_v53  ;;  %v1943_v23 = vpop.f32.mrb[41].mxu0 }
 0x932   :  { %v1264_v24 = vpop.f32.mrb[42].mxu0 }
 0x933   :  { %v1273_v31 = vadd.f32 %v1272_v21, %v1267_v20  ;;  %v1944_v32 = vpop.f32.mrb[43].mxu0 }
 0x935   :  { %v1274_v34 = vmax.f32 %v1273_v31, 0.0 }
 0x937   :  { %v1275_v36 = vmin.f32 %v1274_v34, 1.0 }
 0x939   :  { %1277 = vst [vmem:[#allocation14] sm:$0xff] %v1275_v36 }
 0x93a   :  { %2131 = shalt.err (!%p2128_p10)
}
 0x93b   :  { %s2132_s21 = scalar_lea.hbm %s2826_s9, 128 }
 0x93c   :  { %p2133_p11 = scmp.ne.s32.totalorder %s2826_s9, %s2132_s21  ;;  %p2136_p12 = scmp.lt.u32.totalorder %s2132_s21, %s2826_s9 }
 0x93e   :  { %p2138_p13 = pnand %p2136_p12, %p2133_p11 }
 0x940   :  { %2141 = shalt.err (!%p2138_p13)
}
 0x941   :  { %1297 = dma.vmem_to_hbm [thread:$0]  %s1295_s16, 128, %s2826_s9, [#allocation15]   ;;  %v1268_v39 = vmul.f32 0.8, %v1180_v8 }
 0x942   :  { %s2187_s2 = smov [#allocation13]  }
 0x943   :  { %s1284_s17 = sshll.u32 %s2187_s2, 4  ;;  %s1285_s17 = int_to_ptr.vmem [resolvable:$true] %s1284_s17 }
 0x944   :  { %s2142_s26 = scalar_lea.vmem %s1285_s17, 128  ;;  %p2147_p1 = scmp.lt.s32.totalorder %s1285_s17, %s1285_s17 }
 0x945   :  { %p2143_p0 = scmp.ne.s32.totalorder %s1285_s17, %s2142_s26  ;;  %p2148_p2 = scmp.lt.s32.totalorder %s2142_s26, %s2142_s26 }
 0x947   :  { %p2149_p3 = por %p2148_p2, %p2147_p1 }
 0x949   :  { %p2150_p4 = pnand %p2149_p3, %p2143_p0 }
 0x950   :  { %v1221_v53 = vpop.f32.mrb[36].mxu1 }
 0x951   :  { %v1222_v38 = vadd.f32 %v2455_v37, %v1221_v53  ;;  %v1923_v40 = vpop.f32.mrb[37].mxu1 }
 0x952   :  { %v1224_v41 = vpop.f32.mrb[38].mxu1 }
 0x953   :  { %v1269_v42 = vadd.f32 %v1268_v39, %v1222_v38  ;;  %v1924_v43 = vpop.f32.mrb[39].mxu1 }
 0x955   :  { %v1270_v44 = vmax.f32 %v1269_v42, 0.0 }
 0x957   :  { %v1271_v45 = vmin.f32 %v1270_v44, 1.0 }
 0x959   :  { %1276 = vst [vmem:[#allocation13] sm:$0xff] %v1271_v45 }
 0x95a   :  { %2153 = shalt.err (!%p2150_p4)
}
 0x95b   :  { %s2154_s28 = scalar_lea.hbm %s2825_s8, 128 }
 0x95c   :  { %p2155_p5 = scmp.ne.s32.totalorder %s2825_s8, %s2154_s28  ;;  %p2158_p6 = scmp.lt.u32.totalorder %s2154_s28, %s2825_s8 }
 0x95e   :  { %p2160_p7 = pnand %p2158_p6, %p2155_p5 }
 0x960   :  { %2163 = shalt.err (!%p2160_p7)
}
 0x961   :  { %1287 = dma.vmem_to_hbm [thread:$0]  %s1285_s17, 128, %s2825_s8, [#allocation4]  }
 0x962   :  { %2172 = dma.done.wait [#allocation4], 128  }
 0x963   :  { %2173 = vsyncadd [#allocation4], 4294967168 }
 0x964   :  { %2174 = dma.done.wait [#allocation15], 128  }
 0x965   :  { %2175 = vsyncadd [#allocation15], 4294967168 }
 0x966   :  { %1304 = vsyncpa [#allocation3], 1 }
 0x967   :  { %1305 = vsyncpa [#allocation6], 1 }
 0x968   :  { %1306 = vsyncpa [#allocation9], 1 }
 0x969   :  { %1307 = vsyncpa [#allocation12], 1 }
 0x96a   :  { %1308 = vsyncpa [#allocation4], 1 }
 0x96b   :  { %1309 = vsyncpa [#allocation15], 1 }

// kernel: tpu_custom_call.1
= control target key start
LH: loop header
LB: loop body
LE: loop exit
PB: predicated region body
PF: predicated region fallthrough
CT: control target
= control target key end

     0   :  { %15 = vsyncpa [#allocation3], 0  ;;  %s2817_s0 = inlined_call_operand.hbm [shape: f32[8,128], index: 0, kind: input, shape index: {}]   ;;  %s2818_s1 = inlined_call_operand.hbm [shape: f32[8,128], index: 1, kind: input, shape index: {}]   ;;  %s2819_s2 = inlined_call_operand.hbm [shape: f32[8,128], index: 2, kind: input, shape index: {}]   ;;  %s2820_s3 = inlined_call_operand.hbm [shape: bf16[128,128], index: 3, kind: input, shape index: {}]   ;;  %s2821_s4 = inlined_call_operand.hbm [shape: bf16[128,128], index: 4, kind: input, shape index: {}]   ;;  %s2822_s5 = inlined_call_operand.hbm [shape: bf16[128,128], index: 5, kind: input, shape index: {}]   ;;  %s2823_s6 = inlined_call_operand.vmem [shape: f32[1,128], index: 6, kind: input, shape index: {}]   ;;  %s2824_s7 = inlined_call_operand.vmem [shape: f32[1,128], index: 7, kind: input, shape index: {}]   ;;  %s2825_s8 = inlined_call_operand.hbm [shape: f32[8,128], index: 8, kind: output, shape index: {0}]   ;;  %s2826_s9 = inlined_call_operand.hbm [shape: f32[8,128], index: 9, kind: output, shape index: {1}]  }
   0x1   :  { %16 = vsyncpa [#allocation6], 0 }
   0x2   :  { %17 = vsyncpa [#allocation9], 0 }
   0x3   :  { %18 = vsyncpa [#allocation12], 0 }
   0x4   :  { %19 = vsyncpa [#allocation4], 0 }
   0x5   :  { %20 = vsyncpa [#allocation15], 0  ;;  %s2176_s30 = smov [#allocation5]   ;;  %s2177_s11 = smov [#allocation8]  }
   0x6   :  { %s37_s10 = sshll.u32 %s2176_s30, 4  ;;  %s56_s12 = sshll.u32 %s2177_s11, 4  ;;  %s38_s10 = int_to_ptr.vmem [resolvable:$true] %s37_s10  ;;  %s2238_s12 = int_to_ptr.vmem [resolvable:$true] %s56_s12 }
   0x7   :  { %s1988_s15 = scalar_lea.hbm %s2818_s1, 128 }
   0x8   :  { %p1989_p0 = scmp.ne.s32.totalorder %s2818_s1, %s1988_s15  ;;  %p1992_p1 = scmp.lt.u32.totalorder %s1988_s15, %s2818_s1 }
   0xa   :  { %p1994_p2 = pnand %p1992_p1, %p1989_p0 }
   0xc   :  { %1997 = shalt.err (!%p1994_p2)
}
   0xd   :  { %s1998_s20 = scalar_lea.vmem %s38_s10, 128  ;;  %p2003_p4 = scmp.lt.s32.totalorder %s38_s10, %s38_s10 }
   0xe   :  { %p1999_p3 = scmp.ne.s32.totalorder %s38_s10, %s1998_s20  ;;  %p2004_p5 = scmp.lt.s32.totalorder %s1998_s20, %s1998_s20 }
  0x10   :  { %p2005_p6 = por %p2004_p5, %p2003_p4 }
  0x12   :  { %p2006_p7 = pnand %p2005_p6, %p1999_p3 }
  0x14   :  { %2009 = shalt.err (!%p2006_p7)
}
  0x15   :  { %40 = dma.hbm_to_vmem [thread:$0]  %s2818_s1, 128, %s38_s10, [#allocation6]  }
  0x16   :  { %s2010_s25 = scalar_lea.hbm %s2820_s3, 1024 }
  0x17   :  { %p2011_p8 = scmp.ne.s32.totalorder %s2820_s3, %s2010_s25  ;;  %p2014_p9 = scmp.lt.u32.totalorder %s2010_s25, %s2820_s3 }
  0x19   :  { %p2016_p10 = pnand %p2014_p9, %p2011_p8 }
  0x1b   :  { %2019 = shalt.err (!%p2016_p10)
}
  0x1c   :  { %s2020_s30 = scalar_lea.vmem %s2238_s12, 1024  ;;  %p2025_p12 = scmp.lt.s32.totalorder %s2238_s12, %s2238_s12 }
  0x1d   :  { %p2021_p11 = scmp.ne.s32.totalorder %s2238_s12, %s2020_s30  ;;  %p2026_p13 = scmp.lt.s32.totalorder %s2020_s30, %s2020_s30 }
  0x1f   :  { %p2027_p0 = por %p2026_p13, %p2025_p12 }
  0x21   :  { %p2028_p1 = pnand %p2027_p0, %p2021_p11 }
  0x23   :  { %2031 = shalt.err (!%p2028_p1)
}
  0x24   :  { %s2178_s1 = smov 64   ;;  %s2179_s10 = smov 4  }
  0x25   :  { %62 = dma.hbm_to_vmem [thread:$0]  %s2820_s3, 1024, %s2238_s12, [#allocation9], %s2178_s1, %s2178_s1, %s2179_s10  }
  0x26   :  { %s2180_s14 = smov [#allocation2]   ;;  %s2181_s16 = smov [#allocation7]  }
  0x27   :  { %s27_s15 = sshll.u32 %s2180_s14, 4  ;;  %s47_s17 = sshll.u32 %s2181_s16, 4  ;;  %s28_s15 = int_to_ptr.vmem [resolvable:$true] %s27_s15  ;;  %s48_s17 = int_to_ptr.vmem [resolvable:$true] %s47_s17 }
  0x28   :  { %s2032_s20 = scalar_lea.hbm %s2817_s0, 128 }
  0x29   :  { %p2033_p2 = scmp.ne.s32.totalorder %s2817_s0, %s2032_s20  ;;  %p2036_p3 = scmp.lt.u32.totalorder %s2032_s20, %s2817_s0 }
  0x2b   :  { %p2038_p4 = pnand %p2036_p3, %p2033_p2 }
  0x2d   :  { %2041 = shalt.err (!%p2038_p4)
}
  0x2e   :  { %s2042_s3 = scalar_lea.vmem %s28_s15, 128  ;;  %p2047_p6 = scmp.lt.s32.totalorder %s28_s15, %s28_s15 }
  0x2f   :  { %p2043_p5 = scmp.ne.s32.totalorder %s28_s15, %s2042_s3  ;;  %p2048_p7 = scmp.lt.s32.totalorder %s2042_s3, %s2042_s3 }
  0x31   :  { %p2049_p8 = por %p2048_p7, %p2047_p6 }
  0x33   :  { %p2050_p9 = pnand %p2049_p8, %p2043_p5 }
  0x35   :  { %2053 = shalt.err (!%p2050_p9)
}
  0x36   :  { %30 = dma.hbm_to_vmem [thread:$0]  %s2817_s0, 128, %s28_s15, [#allocation3]  }
  0x37   :  { %s2054_s28 = scalar_lea.hbm %s2819_s2, 128 }
  0x38   :  { %p2055_p10 = scmp.ne.s32.totalorder %s2819_s2, %s2054_s28  ;;  %p2058_p11 = scmp.lt.u32.totalorder %s2054_s28, %s2819_s2 }
  0x3a   :  { %p2060_p12 = pnand %p2058_p11, %p2055_p10 }
  0x3c   :  { %2063 = shalt.err (!%p2060_p12)
}
  0x3d   :  { %s2064_s14 = scalar_lea.vmem %s48_s17, 128  ;;  %p2069_p0 = scmp.lt.s32.totalorder %s48_s17, %s48_s17 }
  0x3e   :  { %p2065_p13 = scmp.ne.s32.totalorder %s48_s17, %s2064_s14  ;;  %p2070_p1 = scmp.lt.s32.totalorder %s2064_s14, %s2064_s14 }
  0x40   :  { %p2071_p2 = por %p2070_p1, %p2069_p0 }
  0x42   :  { %p2072_p3 = pnand %p2071_p2, %p2065_p13 }
  0x44   :  { %2075 = shalt.err (!%p2072_p3)
}
  0x45   :  { %50 = dma.hbm_to_vmem [thread:$0]  %s2819_s2, 128, %s48_s17, [#allocation6]  }
  0x46   :  { %s2182_s16 = smov [#allocation10]   ;;  %s2183_s19 = smov [#allocation11]  }
  0x47   :  { %s68_s18 = sshll.u32 %s2182_s16, 4  ;;  %s80_s20 = sshll.u32 %s2183_s19, 4  ;;  %s69_s18 = int_to_ptr.vmem [resolvable:$true] %s68_s18  ;;  %s2296_s20 = int_to_ptr.vmem [resolvable:$true] %s80_s20 }
  0x48   :  { %s2076_s23 = scalar_lea.hbm %s2821_s4, 1024 }
  0x49   :  { %p2077_p4 = scmp.ne.s32.totalorder %s2821_s4, %s2076_s23  ;;  %p2080_p5 = scmp.lt.u32.totalorder %s2076_s23, %s2821_s4 }
  0x4b   :  { %p2082_p6 = pnand %p2080_p5, %p2077_p4 }
  0x4d   :  { %2085 = shalt.err (!%p2082_p6)
}
  0x4e   :  { %s2086_s2 = scalar_lea.vmem %s69_s18, 1024  ;;  %p2091_p8 = scmp.lt.s32.totalorder %s69_s18, %s69_s18 }
  0x4f   :  { %p2087_p7 = scmp.ne.s32.totalorder %s69_s18, %s2086_s2  ;;  %p2092_p9 = scmp.lt.s32.totalorder %s2086_s2, %s2086_s2 }
  0x51   :  { %p2093_p10 = por %p2092_p9, %p2091_p8 }
  0x53   :  { %p2094_p11 = pnand %p2093_p10, %p2087_p7 }
  0x55   :  { %2097 = shalt.err (!%p2094_p11)
}
  0x56   :  { %74 = dma.hbm_to_vmem [thread:$0]  %s2821_s4, 1024, %s69_s18, [#allocation9], %s2178_s1, %s2178_s1, %s2179_s10  }
  0x57   :  { %s2098_s29 = scalar_lea.hbm %s2822_s5, 1024 }
  0x58   :  { %p2099_p12 = scmp.ne.s32.totalorder %s2822_s5, %s2098_s29  ;;  %p2102_p13 = scmp.lt.u32.totalorder %s2098_s29, %s2822_s5 }
  0x5a   :  { %p2104_p0 = pnand %p2102_p13, %p2099_p12 }
  0x5c   :  { %2107 = shalt.err (!%p2104_p0)
}
  0x5d   :  { %s2108_s0 = scalar_lea.vmem %s2296_s20, 1024  ;;  %p2113_p2 = scmp.lt.s32.totalorder %s2296_s20, %s2296_s20 }
  0x5e   :  { %p2109_p1 = scmp.ne.s32.totalorder %s2296_s20, %s2108_s0  ;;  %p2114_p3 = scmp.lt.s32.totalorder %s2108_s0, %s2108_s0 }
  0x60   :  { %p2115_p4 = por %p2114_p3, %p2113_p2 }
  0x62   :  { %p2116_p5 = pnand %p2115_p4, %p2109_p1 }
  0x64   :  { %2119 = shalt.err (!%p2116_p5)
}
  0x65   :  { %86 = dma.hbm_to_vmem [thread:$0]  %s2822_s5, 1024, %s2296_s20, [#allocation12], %s2178_s1, %s2178_s1, %s2179_s10  }
  0x66   :  { %2164 = dma.done.wait [#allocation3], 128  }
  0x67   :  { %2165 = vsyncadd [#allocation3], 4294967168 }
  0x68   :  { %2166 = dma.done.wait [#allocation6], 256  }
  0x69   :  { %2167 = vsyncadd [#allocation6], 4294967040 }
  0x6a   :  { %2168 = dma.done.wait [#allocation9], 2048  }
  0x6b   :  { %2169 = vsyncadd [#allocation9], 4294965248 }
  0x6c   :  { %2170 = dma.done.wait [#allocation12], 1024  }
  0x6d   :  { %2171 = vsyncadd [#allocation12], 4294966272  ;;  %v2184_v0 = vmov 0.0   ;;  %vm2185_vm0 = vmmov 0   ;;  %v1957_v1 = vld [vmem:[#allocation11] sm:$0xff]   ;;  %v1959_v3 = vld [vmem:[#allocation11 + $0x8] sm:$0xff]  }
  0x6e   :  { %1525 = vmatprep.subr.bf16.mxu0 %v2184_v0  ;;  %1545 = vmatprep.subr.bf16.mxu1 %v2184_v0  ;;  %v2339_v2 = vld [vmem:[#allocation8] sm:$0xff]   ;;  %v2343_v4 = vld [vmem:[#allocation8 + $0x8] sm:$0xff]   ;;  %v1961_v5 = vld [vmem:[#allocation11 + $0x10] sm:$0xff]  }
  0x6f   :  { %1541 = vmatprep.mubr.msk.bf16.mxu0 %vm2185_vm0, %v2184_v0  ;;  %1561 = vmatprep.mubr.msk.bf16.mxu1 %vm2185_vm0, %v2184_v0  ;;  %v2348_v6 = vld [vmem:[#allocation8 + $0x10] sm:$0xff]   ;;  %v1963_v7 = vld [vmem:[#allocation11 + $0x18] sm:$0xff]   ;;  %v1965_v9 = vld [vmem:[#allocation11 + $0x20] sm:$0xff]  }
  0x70   :  { %1526 = vmatpush3.bf16.msra.mxu0 %v1957_v1  ;;  %1546 = vmatpush3.bf16.msra.mxu1 %v2339_v2  ;;  %v2353_v8 = vld [vmem:[#allocation8 + $0x18] sm:$0xff]   ;;  %v2358_v10 = vld [vmem:[#allocation8 + $0x20] sm:$0xff]   ;;  %v1967_v11 = vld [vmem:[#allocation11 + $0x28] sm:$0xff]  }
  0x71   :  { %1527 = vmatprep.subr.bf16.mxu0 %v2184_v0  ;;  %1547 = vmatprep.subr.bf16.mxu1 %v2184_v0  ;;  %v160_v12 = vld [vmem:[#allocation2] sm:$0xff]  ;;  %v2365_v14 = vld [vmem:[#allocation7] sm:$0xff]  ;;  %v1969_v16 = vld [vmem:[#allocation11 + $0x30] sm:$0xff]  }
  0x72   :  { %v2363_v13 = vld [vmem:[#allocation8 + $0x28] sm:$0xff]   ;;  %v161_v15 = vmax.f32 %v160_v12, 0.0  ;;  %v263_v17 = vmax.f32 %v2365_v14, 0.0  ;;  %v2371_v18 = vld [vmem:[#allocation8 + $0x30] sm:$0xff]   ;;  %v1971_v20 = vld [vmem:[#allocation11 + $0x38] sm:$0xff]  }
  0x73   :  { %v2376_v22 = vld [vmem:[#allocation8 + $0x38] sm:$0xff]   ;;  %v2379_v25 = vld [vmem:[#allocation10] sm:$0xff]   ;;  %v2385_v26 = vld [vmem:[#allocation10 + $0x8] sm:$0xff]   ;;  %v453_v54 = vmul.f32 0.8, %v2365_v14 }
  0x74   :  { %1528 = vmatpush3.bf16.msra.mxu0 %v1959_v3  ;;  %1548 = vmatpush3.bf16.msra.mxu1 %v2343_v4  ;;  %v162_v19 = vmin.f32 %v161_v15, 1.0  ;;  %v264_v21 = vmin.f32 %v263_v17, 1.0  ;;  %v2395_v27 = vld [vmem:[#allocation10 + $0x10] sm:$0xff]   ;;  %v2401_v28 = vld [vmem:[#allocation10 + $0x18] sm:$0xff]   ;;  %v2407_v29 = vld [vmem:[#allocation10 + $0x20] sm:$0xff]  }
  0x75   :  { %1529 = vmatprep.subr.bf16.mxu0 %v2184_v0  ;;  %1549 = vmatprep.subr.bf16.mxu1 %v2184_v0  ;;  %v2413_v30 = vld [vmem:[#allocation10 + $0x28] sm:$0xff]   ;;  %v258_v31 = vld [vmem:[#allocation5] sm:$0xff]  ;;  %v2425_v35 = vld [vmem:[#allocation10 + $0x38] sm:$0xff]  }
  0x76   :  { %v163_v23 = vpack.c.bf16 %v162_v19, %v162_v19  ;;  %v265_v24 = vpack.c.bf16 %v264_v21, %v264_v21  ;;  %v260_v32 = vmax.f32 %v258_v31, 0.0  ;;  %v2419_v33 = vld [vmem:[#allocation10 + $0x30] sm:$0xff]   ;;  %v2455_v37 = vld [vmem:[%s2823_s6] ss:$0 sm:$0xff]  ;;  %v449_v39 = vmul.f32 0.8, %v258_v31 }
  0x77   :  { %v1310_v52 = vld [vmem:[%s2824_s7] ss:$0 sm:$0xff]  ;;  %s2186_s7 = smov [#allocation14]  }
  0x78   :  { %1530 = vmatpush3.bf16.msra.mxu0 %v1961_v5  ;;  %1550 = vmatpush3.bf16.msra.mxu1 %v2348_v6  ;;  %v261_v34 = vmin.f32 %v260_v32, 1.0  ;;  %s1294_s16 = sshll.u32 %s2186_s7, 4  ;;  %s1295_s16 = int_to_ptr.vmem [resolvable:$true] %s1294_s16 }
  0x79   :  { %1531 = vmatprep.subr.bf16.mxu0 %v2184_v0  ;;  %1551 = vmatprep.subr.bf16.mxu1 %v2184_v0  ;;  %s2120_s18 = scalar_lea.vmem %s1295_s16, 128  ;;  %p2125_p7 = scmp.lt.s32.totalorder %s1295_s16, %s1295_s16 }
  0x7a   :  { %v262_v36 = vpack.c.bf16 %v261_v34, %v261_v34  ;;  %p2121_p6 = scmp.ne.s32.totalorder %s1295_s16, %s2120_s18  ;;  %p2126_p8 = scmp.lt.s32.totalorder %s2120_s18, %s2120_s18 }
  0x7c   :  { %1532 = vmatpush3.bf16.msra.mxu0 %v1963_v7  ;;  %1552 = vmatpush3.bf16.msra.mxu1 %v2353_v8  ;;  %p2127_p9 = por %p2126_p8, %p2125_p7 }
  0x7d   :  { %1533 = vmatprep.subr.bf16.mxu0 %v2184_v0  ;;  %1553 = vmatprep.subr.bf16.mxu1 %v2184_v0 }
  0x7e   :  { %p2128_p10 = pnand %p2127_p9, %p2121_p6 }
  0x80   :  { %1534 = vmatpush3.bf16.msra.mxu0 %v1965_v9  ;;  %1554 = vmatpush3.bf16.msra.mxu1 %v2358_v10 }
  0x81   :  { %1535 = vmatprep.subr.bf16.mxu0 %v2184_v0  ;;  %1555 = vmatprep.subr.bf16.mxu1 %v2184_v0 }
  0x84   :  { %1536 = vmatpush3.bf16.msra.mxu0 %v1967_v11  ;;  %1556 = vmatpush3.bf16.msra.mxu1 %v2363_v13 }
  0x85   :  { %1537 = vmatprep.subr.bf16.mxu0 %v2184_v0  ;;  %1557 = vmatprep.subr.bf16.mxu1 %v2184_v0 }
  0x88   :  { %1538 = vmatpush3.bf16.msra.mxu0 %v1969_v16  ;;  %1558 = vmatpush3.bf16.msra.mxu1 %v2371_v18 }
  0x89   :  { %1539 = vmatprep.subr.bf16.mxu0 %v2184_v0  ;;  %1559 = vmatprep.subr.bf16.mxu1 %v2184_v0 }
  0x8c   :  { %1540 = vmatpush3.bf16.msra.mxu0 %v1971_v20  ;;  %1560 = vmatpush3.bf16.msra.mxu1 %v2376_v22 }
  0x8d   :  { %1565 = vmatprep.subr.bf16.mxu0 %v2184_v0  ;;  %1585 = vmatprep.subr.bf16.mxu1 %v2184_v0 }
  0x8f   :  { %1542 = vmatmul.mubr.bf16.vlgmr.msra.gmra.mrb[0].mxu0 %v163_v23  ;;  %1562 = vmatmul.mubr.bf16.vlgmr.msra.gmra.mrb[0].mxu1 %v265_v24 }
  0x90   :  { %1566 = vmatpush3.bf16.msra.mxu0 %v2379_v25  ;;  %1581 = vmatprep.mubr.msk.bf16.mxu0 %vm2185_vm0, %v2184_v0 }
  0x91   :  { %1567 = vmatprep.subr.bf16.mxu0 %v2184_v0  ;;  %1586 = vmatpush3.bf16.msra.mxu1 %v2339_v2 }
  0x92   :  { %1601 = vmatprep.mubr.msk.bf16.mxu1 %vm2185_vm0, %v2184_v0  ;;  %1587 = vmatprep.subr.bf16.mxu1 %v2184_v0 }
  0x94   :  { %1568 = vmatpush3.bf16.msra.mxu0 %v2385_v26 }
  0x95   :  { %1569 = vmatprep.subr.bf16.mxu0 %v2184_v0  ;;  %1588 = vmatpush3.bf16.msra.mxu1 %v2343_v4 }
  0x96   :  { %1589 = vmatprep.subr.bf16.mxu1 %v2184_v0 }
  0x98   :  { %1570 = vmatpush3.bf16.msra.mxu0 %v2395_v27 }
  0x99   :  { %1571 = vmatprep.subr.bf16.mxu0 %v2184_v0  ;;  %1590 = vmatpush3.bf16.msra.mxu1 %v2348_v6 }
  0x9a   :  { %1591 = vmatprep.subr.bf16.mxu1 %v2184_v0 }
  0x9c   :  { %1572 = vmatpush3.bf16.msra.mxu0 %v2401_v28 }
  0x9d   :  { %1573 = vmatprep.subr.bf16.mxu0 %v2184_v0  ;;  %1592 = vmatpush3.bf16.msra.mxu1 %v2353_v8 }
  0x9e   :  { %1593 = vmatprep.subr.bf16.mxu1 %v2184_v0 }
  0xa0   :  { %1574 = vmatpush3.bf16.msra.mxu0 %v2407_v29 }
  0xa1   :  { %1575 = vmatprep.subr.bf16.mxu0 %v2184_v0  ;;  %1594 = vmatpush3.bf16.msra.mxu1 %v2358_v10 }
  0xa2   :  { %1595 = vmatprep.subr.bf16.mxu1 %v2184_v0 }
  0xa4   :  { %1576 = vmatpush3.bf16.msra.mxu0 %v2413_v30 }
  0xa5   :  { %1577 = vmatprep.subr.bf16.mxu0 %v2184_v0  ;;  %1596 = vmatpush3.bf16.msra.mxu1 %v2363_v13 }
  0xa6   :  { %1597 = vmatprep.subr.bf16.mxu1 %v2184_v0 }
  0xa8   :  { %1578 = vmatpush3.bf16.msra.mxu0 %v2419_v33 }
  0xa9   :  { %1579 = vmatprep.subr.bf16.mxu0 %v2184_v0  ;;  %1598 = vmatpush3.bf16.msra.mxu1 %v2371_v18 }
  0xaa   :  { %1599 = vmatprep.subr.bf16.mxu1 %v2184_v0 }
  0xac   :  { %1580 = vmatpush3.bf16.msra.mxu0 %v2425_v35 }
  0xad   :  { %1605 = vmatprep.subr.bf16.mxu0 %v2184_v0  ;;  %1600 = vmatpush3.bf16.msra.mxu1 %v2376_v22 }
  0xae   :  { %1625 = vmatprep.subr.bf16.mxu1 %v2184_v0 }
  0xaf   :  { %1582 = vmatmul.mubr.bf16.vlgmr.msra.gmra.mrb[4].mxu0 %v262_v36 }
  0xb0   :  { %1606 = vmatpush3.bf16.msra.mxu0 %v2379_v25  ;;  %1621 = vmatprep.mubr.msk.bf16.mxu0 %vm2185_vm0, %v2184_v0 }
  0xb1   :  { %1607 = vmatprep.subr.bf16.mxu0 %v2184_v0 }
  0xb4   :  { %1608 = vmatpush3.bf16.msra.mxu0 %v2385_v26 }
  0xb5   :  { %1609 = vmatprep.subr.bf16.mxu0 %v2184_v0 }
  0xb8   :  { %1610 = vmatpush3.bf16.msra.mxu0 %v2395_v27 }
  0xb9   :  { %1611 = vmatprep.subr.bf16.mxu0 %v2184_v0 }
  0xbc   :  { %1612 = vmatpush3.bf16.msra.mxu0 %v2401_v28 }
  0xbd   :  { %1613 = vmatprep.subr.bf16.mxu0 %v2184_v0 }
  0xc0   :  { %1614 = vmatpush3.bf16.msra.mxu0 %v2407_v29 }
  0xc1   :  { %1615 = vmatprep.subr.bf16.mxu0 %v2184_v0 }
  0xc4   :  { %1616 = vmatpush3.bf16.msra.mxu0 %v2413_v30 }
  0xc5   :  { %1617 = vmatprep.subr.bf16.mxu0 %v2184_v0 }
  0xc8   :  { %1618 = vmatpush3.bf16.msra.mxu0 %v2419_v33 }
  0xc9   :  { %1619 = vmatprep.subr.bf16.mxu0 %v2184_v0 }
  0xcc   :  { %1620 = vmatpush3.bf16.msra.mxu0 %v2425_v35 }
  0xcd   :  { %1645 = vmatprep.subr.bf16.mxu0 %v2184_v0 }
 0x162   :  { %v252_v38 = vpop.f32.mrb[0].mxu0  ;;  %v354_v40 = vpop.f32.mrb[0].mxu1 }
 0x163   :  { %v1543_v41 = vpop.f32.mrb[1].mxu0  ;;  %v355_v42 = vadd.f32 %v2455_v37, %v354_v40  ;;  %v1563_v44 = vpop.f32.mrb[1].mxu1  ;;  %v2477_v53 = vadd.f32 %v1310_v52, %v252_v38 }
 0x164   :  { %v255_v43 = vpop.f32.mrb[2].mxu0  ;;  %v357_v46 = vpop.f32.mrb[2].mxu1 }
 0x165   :  { %v1544_v45 = vpop.f32.mrb[3].mxu0  ;;  %v450_v47 = vadd.f32 %v449_v39, %v355_v42  ;;  %v1564_v48 = vpop.f32.mrb[3].mxu1 }
 0x167   :  { %v451_v49 = vmax.f32 %v450_v47, 0.0 }
 0x169   :  { %v2458_v50 = vmin.f32 %v451_v49, 1.0 }
 0x16b   :  { %v457_v51 = vpack.c.bf16 %v2458_v50, %v2458_v50  ;;  %v540_v20 = vmul.f32 0.8, %v2458_v50 }
 0x16d   :  { %1622 = vmatmul.mubr.bf16.vlgmr.msra.gmra.mrb[8].mxu0 %v457_v51 }
 0x16e   :  { %1646 = vmatpush3.bf16.msra.mxu0 %v2379_v25  ;;  %1661 = vmatprep.mubr.msk.bf16.mxu0 %vm2185_vm0, %v2184_v0 }
 0x16f   :  { %1647 = vmatprep.subr.bf16.mxu0 %v2184_v0 }
 0x172   :  { %1648 = vmatpush3.bf16.msra.mxu0 %v2385_v26 }
 0x173   :  { %1649 = vmatprep.subr.bf16.mxu0 %v2184_v0 }
 0x176   :  { %1650 = vmatpush3.bf16.msra.mxu0 %v2395_v27 }
 0x177   :  { %1651 = vmatprep.subr.bf16.mxu0 %v2184_v0 }
 0x17a   :  { %1652 = vmatpush3.bf16.msra.mxu0 %v2401_v28 }
 0x17b   :  { %1653 = vmatprep.subr.bf16.mxu0 %v2184_v0 }
 0x17e   :  { %1654 = vmatpush3.bf16.msra.mxu0 %v2407_v29 }
 0x17f   :  { %1655 = vmatprep.subr.bf16.mxu0 %v2184_v0 }
 0x182   :  { %v442_v55 = vpop.f32.mrb[4].mxu0  ;;  %1656 = vmatpush3.bf16.msra.mxu0 %v2413_v30 }
 0x183   :  { %v448_v56 = vadd.f32 %v442_v55, %v2477_v53  ;;  %v1583_v57 = vpop.f32.mrb[5].mxu0  ;;  %1657 = vmatprep.subr.bf16.mxu0 %v2184_v0 }
 0x184   :  { %v445_v58 = vpop.f32.mrb[6].mxu0 }
 0x185   :  { %v454_v59 = vadd.f32 %v453_v54, %v448_v56  ;;  %v1584_v60 = vpop.f32.mrb[7].mxu0 }
 0x186   :  { %1658 = vmatpush3.bf16.msra.mxu0 %v2419_v33 }
 0x187   :  { %v455_v61 = vmax.f32 %v454_v59, 0.0  ;;  %1659 = vmatprep.subr.bf16.mxu0 %v2184_v0 }
 0x189   :  { %v456_v62 = vmin.f32 %v455_v61, 1.0 }
 0x18a   :  { %1660 = vmatpush3.bf16.msra.mxu0 %v2425_v35 }
 0x18b   :  { %v458_v63 = vpack.c.bf16 %v456_v62, %v456_v62  ;;  %1685 = vmatprep.subr.bf16.mxu0 %v2184_v0  ;;  %v544_v5 = vmul.f32 0.8, %v456_v62 }
 0x18d   :  { %1602 = vmatmul.mubr.bf16.vlgmr.msra.gmra.mrb[4].mxu1 %v458_v63 }
 0x18e   :  { %1626 = vmatpush3.bf16.msra.mxu1 %v2339_v2  ;;  %1641 = vmatprep.mubr.msk.bf16.mxu1 %vm2185_vm0, %v2184_v0 }
 0x18f   :  { %1627 = vmatprep.subr.bf16.mxu1 %v2184_v0 }
 0x192   :  { %1628 = vmatpush3.bf16.msra.mxu1 %v2343_v4 }
 0x193   :  { %1629 = vmatprep.subr.bf16.mxu1 %v2184_v0 }
 0x196   :  { %1630 = vmatpush3.bf16.msra.mxu1 %v2348_v6 }
 0x197   :  { %1631 = vmatprep.subr.bf16.mxu1 %v2184_v0 }
 0x19a   :  { %1632 = vmatpush3.bf16.msra.mxu1 %v2353_v8 }
 0x19b   :  { %1633 = vmatprep.subr.bf16.mxu1 %v2184_v0 }
 0x19e   :  { %1634 = vmatpush3.bf16.msra.mxu1 %v2358_v10 }
 0x19f   :  { %1635 = vmatprep.subr.bf16.mxu1 %v2184_v0 }
 0x1a2   :  { %1636 = vmatpush3.bf16.msra.mxu1 %v2363_v13 }
 0x1a3   :  { %1637 = vmatprep.subr.bf16.mxu1 %v2184_v0 }
 0x1a6   :  { %1638 = vmatpush3.bf16.msra.mxu1 %v2371_v18 }
 0x1a7   :  { %1639 = vmatprep.subr.bf16.mxu1 %v2184_v0 }
 0x1aa   :  { %1640 = vmatpush3.bf16.msra.mxu1 %v2376_v22 }
 0x1ab   :  { %1665 = vmatprep.subr.bf16.mxu1 %v2184_v0 }
 0x240   :  { %v533_v1 = vpop.f32.mrb[8].mxu0 }
 0x241   :  { %v539_v3 = vadd.f32 %v533_v1, %v2477_v53  ;;  %v1623_v7 = vpop.f32.mrb[9].mxu0 }
 0x242   :  { %v536_v9 = vpop.f32.mrb[10].mxu0 }
 0x243   :  { %v545_v11 = vadd.f32 %v544_v5, %v539_v3  ;;  %v1624_v12 = vpop.f32.mrb[11].mxu0 }
 0x245   :  { %v546_v14 = vmax.f32 %v545_v11, 0.0 }
 0x247   :  { %v2506_v15 = vmin.f32 %v546_v14, 1.0 }
 0x249   :  { %v549_v16 = vpack.c.bf16 %v2506_v15, %v2506_v15  ;;  %v635_v50 = vmul.f32 0.8, %v2506_v15 }
 0x24b   :  { %1642 = vmatmul.mubr.bf16.vlgmr.msra.gmra.mrb[8].mxu1 %v549_v16 }
 0x24c   :  { %1666 = vmatpush3.bf16.msra.mxu1 %v2339_v2  ;;  %1681 = vmatprep.mubr.msk.bf16.mxu1 %vm2185_vm0, %v2184_v0 }
 0x24d   :  { %1667 = vmatprep.subr.bf16.mxu1 %v2184_v0 }
 0x250   :  { %1668 = vmatpush3.bf16.msra.mxu1 %v2343_v4 }
 0x251   :  { %1669 = vmatprep.subr.bf16.mxu1 %v2184_v0 }
 0x254   :  { %1670 = vmatpush3.bf16.msra.mxu1 %v2348_v6 }
 0x255   :  { %1671 = vmatprep.subr.bf16.mxu1 %v2184_v0 }
 0x258   :  { %1672 = vmatpush3.bf16.msra.mxu1 %v2353_v8 }
 0x259   :  { %1673 = vmatprep.subr.bf16.mxu1 %v2184_v0 }
 0x25c   :  { %1674 = vmatpush3.bf16.msra.mxu1 %v2358_v10 }
 0x25d   :  { %1675 = vmatprep.subr.bf16.mxu1 %v2184_v0 }
 0x260   :  { %v493_v17 = vpop.f32.mrb[4].mxu1  ;;  %1676 = vmatpush3.bf16.msra.mxu1 %v2363_v13 }
 0x261   :  { %v494_v19 = vadd.f32 %v2455_v37, %v493_v17  ;;  %v1603_v21 = vpop.f32.mrb[5].mxu1  ;;  %1677 = vmatprep.subr.bf16.mxu1 %v2184_v0 }
 0x262   :  { %v496_v23 = vpop.f32.mrb[6].mxu1 }
 0x263   :  { %v541_v24 = vadd.f32 %v540_v20, %v494_v19  ;;  %v1604_v31 = vpop.f32.mrb[7].mxu1 }
 0x264   :  { %1678 = vmatpush3.bf16.msra.mxu1 %v2371_v18 }
 0x265   :  { %v542_v32 = vmax.f32 %v541_v24, 0.0  ;;  %1679 = vmatprep.subr.bf16.mxu1 %v2184_v0 }
 0x267   :  { %v543_v34 = vmin.f32 %v542_v32, 1.0 }
 0x268   :  { %1680 = vmatpush3.bf16.msra.mxu1 %v2376_v22 }
 0x269   :  { %v548_v36 = vpack.c.bf16 %v543_v34, %v543_v34  ;;  %1705 = vmatprep.subr.bf16.mxu1 %v2184_v0  ;;  %v631_v40 = vmul.f32 0.8, %v543_v34 }
 0x26b   :  { %1662 = vmatmul.mubr.bf16.vlgmr.msra.gmra.mrb[12].mxu0 %v548_v36 }
 0x26c   :  { %1686 = vmatpush3.bf16.msra.mxu0 %v2379_v25  ;;  %1701 = vmatprep.mubr.msk.bf16.mxu0 %vm2185_vm0, %v2184_v0 }
 0x26d   :  { %1687 = vmatprep.subr.bf16.mxu0 %v2184_v0 }
 0x270   :  { %1688 = vmatpush3.bf16.msra.mxu0 %v2385_v26 }
 0x271   :  { %1689 = vmatprep.subr.bf16.mxu0 %v2184_v0 }
 0x274   :  { %1690 = vmatpush3.bf16.msra.mxu0 %v2395_v27 }
 0x275   :  { %1691 = vmatprep.subr.bf16.mxu0 %v2184_v0 }
 0x278   :  { %1692 = vmatpush3.bf16.msra.mxu0 %v2401_v28 }
 0x279   :  { %1693 = vmatprep.subr.bf16.mxu0 %v2184_v0 }
 0x27c   :  { %1694 = vmatpush3.bf16.msra.mxu0 %v2407_v29 }
 0x27d   :  { %1695 = vmatprep.subr.bf16.mxu0 %v2184_v0 }
 0x280   :  { %1696 = vmatpush3.bf16.msra.mxu0 %v2413_v30 }
 0x281   :  { %1697 = vmatprep.subr.bf16.mxu0 %v2184_v0 }
 0x284   :  { %1698 = vmatpush3.bf16.msra.mxu0 %v2419_v33 }
 0x285   :  { %1699 = vmatprep.subr.bf16.mxu0 %v2184_v0 }
 0x288   :  { %1700 = vmatpush3.bf16.msra.mxu0 %v2425_v35 }
 0x289   :  { %1725 = vmatprep.subr.bf16.mxu0 %v2184_v0 }
 0x31e   :  { %v584_v38 = vpop.f32.mrb[8].mxu1 }
 0x31f   :  { %v585_v39 = vadd.f32 %v2455_v37, %v584_v38  ;;  %v1643_v41 = vpop.f32.mrb[9].mxu1 }
 0x320   :  { %v587_v42 = vpop.f32.mrb[10].mxu1 }
 0x321   :  { %v632_v43 = vadd.f32 %v631_v40, %v585_v39  ;;  %v1644_v44 = vpop.f32.mrb[11].mxu1 }
 0x323   :  { %v633_v45 = vmax.f32 %v632_v43, 0.0 }
 0x325   :  { %v2549_v46 = vmin.f32 %v633_v45, 1.0 }
 0x327   :  { %v639_v47 = vpack.c.bf16 %v2549_v46, %v2549_v46  ;;  %v722_v14 = vmul.f32 0.8, %v2549_v46 }
 0x329   :  { %1702 = vmatmul.mubr.bf16.vlgmr.msra.gmra.mrb[16].mxu0 %v639_v47 }
 0x32a   :  { %1726 = vmatpush3.bf16.msra.mxu0 %v2379_v25  ;;  %1741 = vmatprep.mubr.msk.bf16.mxu0 %vm2185_vm0, %v2184_v0 }
 0x32b   :  { %1727 = vmatprep.subr.bf16.mxu0 %v2184_v0 }
 0x32e   :  { %1728 = vmatpush3.bf16.msra.mxu0 %v2385_v26 }
 0x32f   :  { %1729 = vmatprep.subr.bf16.mxu0 %v2184_v0 }
 0x332   :  { %1730 = vmatpush3.bf16.msra.mxu0 %v2395_v27 }
 0x333   :  { %1731 = vmatprep.subr.bf16.mxu0 %v2184_v0 }
 0x336   :  { %1732 = vmatpush3.bf16.msra.mxu0 %v2401_v28 }
 0x337   :  { %1733 = vmatprep.subr.bf16.mxu0 %v2184_v0 }
 0x33a   :  { %1734 = vmatpush3.bf16.msra.mxu0 %v2407_v29 }
 0x33b   :  { %1735 = vmatprep.subr.bf16.mxu0 %v2184_v0 }
 0x33e   :  { %v624_v48 = vpop.f32.mrb[12].mxu0  ;;  %1736 = vmatpush3.bf16.msra.mxu0 %v2413_v30 }
 0x33f   :  { %v630_v49 = vadd.f32 %v624_v48, %v2477_v53  ;;  %v1663_v51 = vpop.f32.mrb[13].mxu0  ;;  %1737 = vmatprep.subr.bf16.mxu0 %v2184_v0 }
 0x340   :  { %v627_v52 = vpop.f32.mrb[14].mxu0 }
 0x341   :  { %v636_v54 = vadd.f32 %v635_v50, %v630_v49  ;;  %v1664_v55 = vpop.f32.mrb[15].mxu0 }
 0x342   :  { %1738 = vmatpush3.bf16.msra.mxu0 %v2419_v33 }
 0x343   :  { %v637_v56 = vmax.f32 %v636_v54, 0.0  ;;  %1739 = vmatprep.subr.bf16.mxu0 %v2184_v0 }
 0x345   :  { %v638_v57 = vmin.f32 %v637_v56, 1.0 }
 0x346   :  { %1740 = vmatpush3.bf16.msra.mxu0 %v2425_v35 }
 0x347   :  { %v640_v58 = vpack.c.bf16 %v638_v57, %v638_v57  ;;  %1765 = vmatprep.subr.bf16.mxu0 %v2184_v0  ;;  %v726_v61 = vmul.f32 0.8, %v638_v57 }
 0x349   :  { %1682 = vmatmul.mubr.bf16.vlgmr.msra.gmra.mrb[12].mxu1 %v640_v58 }
 0x34a   :  { %1706 = vmatpush3.bf16.msra.mxu1 %v2339_v2  ;;  %1721 = vmatprep.mubr.msk.bf16.mxu1 %vm2185_vm0, %v2184_v0 }
 0x34b   :  { %1707 = vmatprep.subr.bf16.mxu1 %v2184_v0 }
 0x34e   :  { %1708 = vmatpush3.bf16.msra.mxu1 %v2343_v4 }
 0x34f   :  { %1709 = vmatprep.subr.bf16.mxu1 %v2184_v0 }
 0x352   :  { %1710 = vmatpush3.bf16.msra.mxu1 %v2348_v6 }
 0x353   :  { %1711 = vmatprep.subr.bf16.mxu1 %v2184_v0 }
 0x356   :  { %1712 = vmatpush3.bf16.msra.mxu1 %v2353_v8 }
 0x357   :  { %1713 = vmatprep.subr.bf16.mxu1 %v2184_v0 }
 0x35a   :  { %1714 = vmatpush3.bf16.msra.mxu1 %v2358_v10 }
 0x35b   :  { %1715 = vmatprep.subr.bf16.mxu1 %v2184_v0 }
 0x35e   :  { %1716 = vmatpush3.bf16.msra.mxu1 %v2363_v13 }
 0x35f   :  { %1717 = vmatprep.subr.bf16.mxu1 %v2184_v0 }
 0x362   :  { %1718 = vmatpush3.bf16.msra.mxu1 %v2371_v18 }
 0x363   :  { %1719 = vmatprep.subr.bf16.mxu1 %v2184_v0 }
 0x366   :  { %1720 = vmatpush3.bf16.msra.mxu1 %v2376_v22 }
 0x367   :  { %1745 = vmatprep.subr.bf16.mxu1 %v2184_v0 }
 0x3fc   :  { %v715_v59 = vpop.f32.mrb[16].mxu0 }
 0x3fd   :  { %v721_v60 = vadd.f32 %v715_v59, %v2477_v53  ;;  %v1703_v62 = vpop.f32.mrb[17].mxu0 }
 0x3fe   :  { %v718_v63 = vpop.f32.mrb[18].mxu0 }
 0x3ff   :  { %v727_v1 = vadd.f32 %v726_v61, %v721_v60  ;;  %v1704_v3 = vpop.f32.mrb[19].mxu0 }
 0x401   :  { %v728_v5 = vmax.f32 %v727_v1, 0.0 }
 0x403   :  { %v2592_v7 = vmin.f32 %v728_v5, 1.0 }
 0x405   :  { %v731_v9 = vpack.c.bf16 %v2592_v7, %v2592_v7  ;;  %v817_v45 = vmul.f32 0.8, %v2592_v7 }
 0x407   :  { %1722 = vmatmul.mubr.bf16.vlgmr.msra.gmra.mrb[16].mxu1 %v731_v9 }
 0x408   :  { %1746 = vmatpush3.bf16.msra.mxu1 %v2339_v2  ;;  %1761 = vmatprep.mubr.msk.bf16.mxu1 %vm2185_vm0, %v2184_v0 }
 0x409   :  { %1747 = vmatprep.subr.bf16.mxu1 %v2184_v0 }
 0x40c   :  { %1748 = vmatpush3.bf16.msra.mxu1 %v2343_v4 }
 0x40d   :  { %1749 = vmatprep.subr.bf16.mxu1 %v2184_v0 }
 0x410   :  { %1750 = vmatpush3.bf16.msra.mxu1 %v2348_v6 }
 0x411   :  { %1751 = vmatprep.subr.bf16.mxu1 %v2184_v0 }
 0x414   :  { %1752 = vmatpush3.bf16.msra.mxu1 %v2353_v8 }
 0x415   :  { %1753 = vmatprep.subr.bf16.mxu1 %v2184_v0 }
 0x418   :  { %1754 = vmatpush3.bf16.msra.mxu1 %v2358_v10 }
 0x419   :  { %1755 = vmatprep.subr.bf16.mxu1 %v2184_v0 }
 0x41c   :  { %v675_v11 = vpop.f32.mrb[12].mxu1  ;;  %1756 = vmatpush3.bf16.msra.mxu1 %v2363_v13 }
 0x41d   :  { %v676_v12 = vadd.f32 %v2455_v37, %v675_v11  ;;  %v1683_v15 = vpop.f32.mrb[13].mxu1  ;;  %1757 = vmatprep.subr.bf16.mxu1 %v2184_v0 }
 0x41e   :  { %v678_v16 = vpop.f32.mrb[14].mxu1 }
 0x41f   :  { %v723_v17 = vadd.f32 %v722_v14, %v676_v12  ;;  %v1684_v19 = vpop.f32.mrb[15].mxu1 }
 0x420   :  { %1758 = vmatpush3.bf16.msra.mxu1 %v2371_v18 }
 0x421   :  { %v724_v20 = vmax.f32 %v723_v17, 0.0  ;;  %1759 = vmatprep.subr.bf16.mxu1 %v2184_v0 }
 0x423   :  { %v725_v21 = vmin.f32 %v724_v20, 1.0 }
 0x424   :  { %1760 = vmatpush3.bf16.msra.mxu1 %v2376_v22 }
 0x425   :  { %v730_v23 = vpack.c.bf16 %v725_v21, %v725_v21  ;;  %1785 = vmatprep.subr.bf16.mxu1 %v2184_v0  ;;  %v813_v32 = vmul.f32 0.8, %v725_v21 }
 0x427   :  { %1742 = vmatmul.mubr.bf16.vlgmr.msra.gmra.mrb[20].mxu0 %v730_v23 }
 0x428   :  { %1766 = vmatpush3.bf16.msra.mxu0 %v2379_v25  ;;  %1781 = vmatprep.mubr.msk.bf16.mxu0 %vm2185_vm0, %v2184_v0 }
 0x429   :  { %1767 = vmatprep.subr.bf16.mxu0 %v2184_v0 }
 0x42c   :  { %1768 = vmatpush3.bf16.msra.mxu0 %v2385_v26 }
 0x42d   :  { %1769 = vmatprep.subr.bf16.mxu0 %v2184_v0 }
 0x430   :  { %1770 = vmatpush3.bf16.msra.mxu0 %v2395_v27 }
 0x431   :  { %1771 = vmatprep.subr.bf16.mxu0 %v2184_v0 }
 0x434   :  { %1772 = vmatpush3.bf16.msra.mxu0 %v2401_v28 }
 0x435   :  { %1773 = vmatprep.subr.bf16.mxu0 %v2184_v0 }
 0x438   :  { %1774 = vmatpush3.bf16.msra.mxu0 %v2407_v29 }
 0x439   :  { %1775 = vmatprep.subr.bf16.mxu0 %v2184_v0 }
 0x43c   :  { %1776 = vmatpush3.bf16.msra.mxu0 %v2413_v30 }
 0x43d   :  { %1777 = vmatprep.subr.bf16.mxu0 %v2184_v0 }
 0x440   :  { %1778 = vmatpush3.bf16.msra.mxu0 %v2419_v33 }
 0x441   :  { %1779 = vmatprep.subr.bf16.mxu0 %v2184_v0 }
 0x444   :  { %1780 = vmatpush3.bf16.msra.mxu0 %v2425_v35 }
 0x445   :  { %1805 = vmatprep.subr.bf16.mxu0 %v2184_v0 }
 0x4da   :  { %v766_v24 = vpop.f32.mrb[16].mxu1 }
 0x4db   :  { %v767_v31 = vadd.f32 %v2455_v37, %v766_v24  ;;  %v1723_v34 = vpop.f32.mrb[17].mxu1 }
 0x4dc   :  { %v769_v36 = vpop.f32.mrb[18].mxu1 }
 0x4dd   :  { %v814_v38 = vadd.f32 %v813_v32, %v767_v31  ;;  %v1724_v39 = vpop.f32.mrb[19].mxu1 }
 0x4df   :  { %v815_v40 = vmax.f32 %v814_v38, 0.0 }
 0x4e1   :  { %v2635_v41 = vmin.f32 %v815_v40, 1.0 }
 0x4e3   :  { %v821_v42 = vpack.c.bf16 %v2635_v41, %v2635_v41  ;;  %v904_v3 = vmul.f32 0.8, %v2635_v41 }
 0x4e5   :  { %1782 = vmatmul.mubr.bf16.vlgmr.msra.gmra.mrb[24].mxu0 %v821_v42 }
 0x4e6   :  { %1806 = vmatpush3.bf16.msra.mxu0 %v2379_v25  ;;  %1821 = vmatprep.mubr.msk.bf16.mxu0 %vm2185_vm0, %v2184_v0 }
 0x4e7   :  { %1807 = vmatprep.subr.bf16.mxu0 %v2184_v0 }
 0x4ea   :  { %1808 = vmatpush3.bf16.msra.mxu0 %v2385_v26 }
 0x4eb   :  { %1809 = vmatprep.subr.bf16.mxu0 %v2184_v0 }
 0x4ee   :  { %1810 = vmatpush3.bf16.msra.mxu0 %v2395_v27 }
 0x4ef   :  { %1811 = vmatprep.subr.bf16.mxu0 %v2184_v0 }
 0x4f2   :  { %1812 = vmatpush3.bf16.msra.mxu0 %v2401_v28 }
 0x4f3   :  { %1813 = vmatprep.subr.bf16.mxu0 %v2184_v0 }
 0x4f6   :  { %1814 = vmatpush3.bf16.msra.mxu0 %v2407_v29 }
 0x4f7   :  { %1815 = vmatprep.subr.bf16.mxu0 %v2184_v0 }
 0x4fa   :  { %v806_v43 = vpop.f32.mrb[20].mxu0  ;;  %1816 = vmatpush3.bf16.msra.mxu0 %v2413_v30 }
 0x4fb   :  { %v812_v44 = vadd.f32 %v806_v43, %v2477_v53  ;;  %v1743_v46 = vpop.f32.mrb[21].mxu0  ;;  %1817 = vmatprep.subr.bf16.mxu0 %v2184_v0 }
 0x4fc   :  { %v809_v47 = vpop.f32.mrb[22].mxu0  ;;  %v1983_v46 = vld [vmem:[#allocation8 + $0x10] sm:$0xff]  }
 0x4fd   :  { %v818_v48 = vadd.f32 %v817_v45, %v812_v44  ;;  %v1744_v49 = vpop.f32.mrb[23].mxu0  ;;  %v1981_v44 = vld [vmem:[#allocation8] sm:$0xff]   ;;  %v1982_v45 = vld [vmem:[#allocation8 + $0x8] sm:$0xff]   ;;  %v1984_v47 = vld [vmem:[#allocation8 + $0x18] sm:$0xff]  }
 0x4fe   :  { %1818 = vmatpush3.bf16.msra.mxu0 %v2419_v33 }
 0x4ff   :  { %v819_v50 = vmax.f32 %v818_v48, 0.0  ;;  %1819 = vmatprep.subr.bf16.mxu0 %v2184_v0 }
 0x501   :  { %v820_v51 = vmin.f32 %v819_v50, 1.0 }
 0x502   :  { %1820 = vmatpush3.bf16.msra.mxu0 %v2425_v35 }
 0x503   :  { %v822_v52 = vpack.c.bf16 %v820_v51, %v820_v51  ;;  %1845 = vmatprep.subr.bf16.mxu0 %v2184_v0  ;;  %v908_v56 = vmul.f32 0.8, %v820_v51 }
 0x505   :  { %1762 = vmatmul.mubr.bf16.vlgmr.msra.gmra.mrb[20].mxu1 %v822_v52 }
 0x506   :  { %1786 = vmatpush3.bf16.msra.mxu1 %v2339_v2  ;;  %1801 = vmatprep.mubr.msk.bf16.mxu1 %vm2185_vm0, %v2184_v0 }
 0x507   :  { %1787 = vmatprep.subr.bf16.mxu1 %v2184_v0 }
 0x50a   :  { %1788 = vmatpush3.bf16.msra.mxu1 %v2343_v4 }
 0x50b   :  { %1789 = vmatprep.subr.bf16.mxu1 %v2184_v0 }
 0x50e   :  { %1790 = vmatpush3.bf16.msra.mxu1 %v2348_v6 }
 0x50f   :  { %1791 = vmatprep.subr.bf16.mxu1 %v2184_v0 }
 0x512   :  { %1792 = vmatpush3.bf16.msra.mxu1 %v2353_v8 }
 0x513   :  { %1793 = vmatprep.subr.bf16.mxu1 %v2184_v0 }
 0x516   :  { %1794 = vmatpush3.bf16.msra.mxu1 %v2358_v10 }
 0x517   :  { %1795 = vmatprep.subr.bf16.mxu1 %v2184_v0 }
 0x51a   :  { %1796 = vmatpush3.bf16.msra.mxu1 %v2363_v13 }
 0x51b   :  { %1797 = vmatprep.subr.bf16.mxu1 %v2184_v0 }
 0x51e   :  { %1798 = vmatpush3.bf16.msra.mxu1 %v2371_v18 }
 0x51f   :  { %1799 = vmatprep.subr.bf16.mxu1 %v2184_v0 }
 0x522   :  { %1800 = vmatpush3.bf16.msra.mxu1 %v2376_v22 }
 0x523   :  { %1825 = vmatprep.subr.bf16.mxu1 %v2184_v0 }
 0x5b8   :  { %v897_v54 = vpop.f32.mrb[24].mxu0 }
 0x5b9   :  { %v903_v55 = vadd.f32 %v897_v54, %v2477_v53  ;;  %v1783_v57 = vpop.f32.mrb[25].mxu0 }
 0x5ba   :  { %v900_v58 = vpop.f32.mrb[26].mxu0 }
 0x5bb   :  { %v909_v59 = vadd.f32 %v908_v56, %v903_v55  ;;  %v1784_v60 = vpop.f32.mrb[27].mxu0 }
 0x5bd   :  { %v910_v61 = vmax.f32 %v909_v59, 0.0 }
 0x5bf   :  { %v2678_v62 = vmin.f32 %v910_v61, 1.0  ;;  %v1986_v61 = vld [vmem:[#allocation8 + $0x28] sm:$0xff]  }
 0x5c1   :  { %v913_v63 = vpack.c.bf16 %v2678_v62, %v2678_v62  ;;  %v999_v34 = vmul.f32 0.8, %v2678_v62 }
 0x5c3   :  { %1802 = vmatmul.mubr.bf16.vlgmr.msra.gmra.mrb[24].mxu1 %v913_v63 }
 0x5c4   :  { %1826 = vmatpush3.bf16.msra.mxu1 %v2339_v2  ;;  %1841 = vmatprep.mubr.msk.bf16.mxu1 %vm2185_vm0, %v2184_v0 }
 0x5c5   :  { %1827 = vmatprep.subr.bf16.mxu1 %v2184_v0 }
 0x5c8   :  { %1828 = vmatpush3.bf16.msra.mxu1 %v2343_v4 }
 0x5c9   :  { %1829 = vmatprep.subr.bf16.mxu1 %v2184_v0 }
 0x5cc   :  { %1830 = vmatpush3.bf16.msra.mxu1 %v2348_v6 }
 0x5cd   :  { %1831 = vmatprep.subr.bf16.mxu1 %v2184_v0 }
 0x5d0   :  { %1832 = vmatpush3.bf16.msra.mxu1 %v2353_v8 }
 0x5d1   :  { %1833 = vmatprep.subr.bf16.mxu1 %v2184_v0 }
 0x5d4   :  { %1834 = vmatpush3.bf16.msra.mxu1 %v2358_v10 }
 0x5d5   :  { %1835 = vmatprep.subr.bf16.mxu1 %v2184_v0 }
 0x5d8   :  { %v857_v2 = vpop.f32.mrb[20].mxu1  ;;  %1836 = vmatpush3.bf16.msra.mxu1 %v2363_v13 }
 0x5d9   :  { %v858_v1 = vadd.f32 %v2455_v37, %v857_v2  ;;  %v1763_v4 = vpop.f32.mrb[21].mxu1  ;;  %1837 = vmatprep.subr.bf16.mxu1 %v2184_v0 }
 0x5da   :  { %v860_v5 = vpop.f32.mrb[22].mxu1 }
 0x5db   :  { %v905_v6 = vadd.f32 %v904_v3, %v858_v1  ;;  %v1764_v7 = vpop.f32.mrb[23].mxu1  ;;  %v1987_v3 = vld [vmem:[#allocation8 + $0x30] sm:$0xff]  }
 0x5dc   :  { %1838 = vmatpush3.bf16.msra.mxu1 %v2371_v18 }
 0x5dd   :  { %v906_v8 = vmax.f32 %v905_v6, 0.0  ;;  %1839 = vmatprep.subr.bf16.mxu1 %v2184_v0 }
 0x5df   :  { %v907_v9 = vmin.f32 %v906_v8, 1.0 }
 0x5e0   :  { %1840 = vmatpush3.bf16.msra.mxu1 %v2376_v22 }
 0x5e1   :  { %v912_v11 = vpack.c.bf16 %v907_v9, %v907_v9  ;;  %1865 = vmatprep.subr.bf16.mxu1 %v2184_v0  ;;  %v995_v15 = vmul.f32 0.8, %v907_v9 }
 0x5e3   :  { %1822 = vmatmul.mubr.bf16.vlgmr.msra.gmra.mrb[28].mxu0 %v912_v11 }
 0x5e4   :  { %1846 = vmatpush3.bf16.msra.mxu0 %v2379_v25  ;;  %1861 = vmatprep.mubr.msk.bf16.mxu0 %vm2185_vm0, %v2184_v0 }
 0x5e5   :  { %1847 = vmatprep.subr.bf16.mxu0 %v2184_v0 }
 0x5e8   :  { %1848 = vmatpush3.bf16.msra.mxu0 %v2385_v26 }
 0x5e9   :  { %1849 = vmatprep.subr.bf16.mxu0 %v2184_v0 }
 0x5ec   :  { %1850 = vmatpush3.bf16.msra.mxu0 %v2395_v27 }
 0x5ed   :  { %1851 = vmatprep.subr.bf16.mxu0 %v2184_v0 }
 0x5f0   :  { %1852 = vmatpush3.bf16.msra.mxu0 %v2401_v28 }
 0x5f1   :  { %1853 = vmatprep.subr.bf16.mxu0 %v2184_v0 }
 0x5f4   :  { %1854 = vmatpush3.bf16.msra.mxu0 %v2407_v29 }
 0x5f5   :  { %1855 = vmatprep.subr.bf16.mxu0 %v2184_v0 }
 0x5f8   :  { %1856 = vmatpush3.bf16.msra.mxu0 %v2413_v30 }
 0x5f9   :  { %1857 = vmatprep.subr.bf16.mxu0 %v2184_v0 }
 0x5fc   :  { %1858 = vmatpush3.bf16.msra.mxu0 %v2419_v33 }
 0x5fd   :  { %1859 = vmatprep.subr.bf16.mxu0 %v2184_v0 }
 0x600   :  { %1860 = vmatpush3.bf16.msra.mxu0 %v2425_v35 }
 0x601   :  { %1885 = vmatprep.subr.bf16.mxu0 %v2184_v0 }
 0x696   :  { %v948_v12 = vpop.f32.mrb[24].mxu1 }
 0x697   :  { %v949_v14 = vadd.f32 %v2455_v37, %v948_v12  ;;  %v1803_v16 = vpop.f32.mrb[25].mxu1 }
 0x698   :  { %v951_v17 = vpop.f32.mrb[26].mxu1 }
 0x699   :  { %v996_v19 = vadd.f32 %v995_v15, %v949_v14  ;;  %v1804_v20 = vpop.f32.mrb[27].mxu1 }
 0x69b   :  { %v997_v21 = vmax.f32 %v996_v19, 0.0 }
 0x69d   :  { %v2721_v23 = vmin.f32 %v997_v21, 1.0 }
 0x69f   :  { %v1003_v24 = vpack.c.bf16 %v2721_v23, %v2721_v23  ;;  %v1086_v59 = vmul.f32 0.8, %v2721_v23 }
 0x6a1   :  { %1862 = vmatmul.mubr.bf16.vlgmr.msra.gmra.mrb[32].mxu0 %v1003_v24 }
 0x6a2   :  { %1886 = vmatpush3.bf16.msra.mxu0 %v2379_v25  ;;  %1901 = vmatprep.mubr.msk.bf16.mxu0 %vm2185_vm0, %v2184_v0 }
 0x6a3   :  { %1887 = vmatprep.subr.bf16.mxu0 %v2184_v0 }
 0x6a6   :  { %1888 = vmatpush3.bf16.msra.mxu0 %v2385_v26 }
 0x6a7   :  { %1889 = vmatprep.subr.bf16.mxu0 %v2184_v0 }
 0x6aa   :  { %1890 = vmatpush3.bf16.msra.mxu0 %v2395_v27 }
 0x6ab   :  { %1891 = vmatprep.subr.bf16.mxu0 %v2184_v0 }
 0x6ae   :  { %1892 = vmatpush3.bf16.msra.mxu0 %v2401_v28 }
 0x6af   :  { %1893 = vmatprep.subr.bf16.mxu0 %v2184_v0 }
 0x6b2   :  { %1894 = vmatpush3.bf16.msra.mxu0 %v2407_v29 }
 0x6b3   :  { %1895 = vmatprep.subr.bf16.mxu0 %v2184_v0 }
 0x6b6   :  { %v988_v31 = vpop.f32.mrb[28].mxu0  ;;  %1896 = vmatpush3.bf16.msra.mxu0 %v2413_v30 }
 0x6b7   :  { %v994_v32 = vadd.f32 %v988_v31, %v2477_v53  ;;  %v1823_v36 = vpop.f32.mrb[29].mxu0  ;;  %1897 = vmatprep.subr.bf16.mxu0 %v2184_v0 }
 0x6b8   :  { %v991_v38 = vpop.f32.mrb[30].mxu0 }
 0x6b9   :  { %v1000_v39 = vadd.f32 %v999_v34, %v994_v32  ;;  %v1824_v40 = vpop.f32.mrb[31].mxu0 }
 0x6ba   :  { %1898 = vmatpush3.bf16.msra.mxu0 %v2419_v33 }
 0x6bb   :  { %v1001_v41 = vmax.f32 %v1000_v39, 0.0  ;;  %1899 = vmatprep.subr.bf16.mxu0 %v2184_v0 }
 0x6bd   :  { %v1002_v42 = vmin.f32 %v1001_v41, 1.0 }
 0x6be   :  { %1900 = vmatpush3.bf16.msra.mxu0 %v2425_v35 }
 0x6bf   :  { %v1004_v43 = vpack.c.bf16 %v1002_v42, %v1002_v42  ;;  %1925 = vmatprep.subr.bf16.mxu0 %v2184_v0  ;;  %v1090_v50 = vmul.f32 0.8, %v1002_v42 }
 0x6c1   :  { %1842 = vmatmul.mubr.bf16.vlgmr.msra.gmra.mrb[28].mxu1 %v1004_v43 }
 0x6c2   :  { %1866 = vmatpush3.bf16.msra.mxu1 %v1981_v44  ;;  %1881 = vmatprep.mubr.msk.bf16.mxu1 %vm2185_vm0, %v2184_v0 }
 0x6c3   :  { %1867 = vmatprep.subr.bf16.mxu1 %v2184_v0 }
 0x6c6   :  { %1868 = vmatpush3.bf16.msra.mxu1 %v1982_v45 }
 0x6c7   :  { %1869 = vmatprep.subr.bf16.mxu1 %v2184_v0 }
 0x6ca   :  { %1870 = vmatpush3.bf16.msra.mxu1 %v1983_v46 }
 0x6cb   :  { %1871 = vmatprep.subr.bf16.mxu1 %v2184_v0 }
 0x6ce   :  { %1872 = vmatpush3.bf16.msra.mxu1 %v1984_v47 }
 0x6cf   :  { %1873 = vmatprep.subr.bf16.mxu1 %v2184_v0 }
 0x6d2   :  { %1874 = vmatpush3.bf16.msra.mxu1 %v2358_v10 }
 0x6d3   :  { %1875 = vmatprep.subr.bf16.mxu1 %v2184_v0 }
 0x6d6   :  { %1876 = vmatpush3.bf16.msra.mxu1 %v2363_v13 }
 0x6d7   :  { %1877 = vmatprep.subr.bf16.mxu1 %v2184_v0 }
 0x6da   :  { %1878 = vmatpush3.bf16.msra.mxu1 %v2371_v18  ;;  %v1985_v18 = vld [vmem:[#allocation8 + $0x20] sm:$0xff]  }
 0x6db   :  { %1879 = vmatprep.subr.bf16.mxu1 %v2184_v0 }
 0x6de   :  { %1880 = vmatpush3.bf16.msra.mxu1 %v2376_v22 }
 0x6df   :  { %1905 = vmatprep.subr.bf16.mxu1 %v2184_v0 }
 0x774   :  { %v1079_v48 = vpop.f32.mrb[32].mxu0 }
 0x775   :  { %v1085_v49 = vadd.f32 %v1079_v48, %v2477_v53  ;;  %v1863_v51 = vpop.f32.mrb[33].mxu0 }
 0x776   :  { %v1082_v10 = vpop.f32.mrb[34].mxu0 }
 0x777   :  { %v1091_v52 = vadd.f32 %v1090_v50, %v1085_v49  ;;  %v1864_v54 = vpop.f32.mrb[35].mxu0 }
 0x779   :  { %v1092_v55 = vmax.f32 %v1091_v52, 0.0 }
 0x77b   :  { %v1093_v13 = vmin.f32 %v1092_v55, 1.0 }
 0x77d   :  { %v1095_v56 = vpack.c.bf16 %v1093_v13, %v1093_v13 }
 0x77f   :  { %1882 = vmatmul.mubr.bf16.vlgmr.msra.gmra.mrb[32].mxu1 %v1095_v56 }
 0x780   :  { %1906 = vmatpush3.bf16.msra.mxu1 %v1981_v44  ;;  %1921 = vmatprep.mubr.msk.bf16.mxu1 %vm2185_vm0, %v2184_v0 }
 0x781   :  { %1907 = vmatprep.subr.bf16.mxu1 %v2184_v0 }
 0x784   :  { %1908 = vmatpush3.bf16.msra.mxu1 %v1982_v45 }
 0x785   :  { %1909 = vmatprep.subr.bf16.mxu1 %v2184_v0 }
 0x788   :  { %1910 = vmatpush3.bf16.msra.mxu1 %v1983_v46 }
 0x789   :  { %1911 = vmatprep.subr.bf16.mxu1 %v2184_v0 }
 0x78c   :  { %1912 = vmatpush3.bf16.msra.mxu1 %v1984_v47 }
 0x78d   :  { %1913 = vmatprep.subr.bf16.mxu1 %v2184_v0 }
 0x790   :  { %1914 = vmatpush3.bf16.msra.mxu1 %v1985_v18 }
 0x791   :  { %1915 = vmatprep.subr.bf16.mxu1 %v2184_v0 }
 0x794   :  { %v1039_v57 = vpop.f32.mrb[28].mxu1  ;;  %1916 = vmatpush3.bf16.msra.mxu1 %v1986_v61 }
 0x795   :  { %v1040_v58 = vadd.f32 %v2455_v37, %v1039_v57  ;;  %v1843_v60 = vpop.f32.mrb[29].mxu1  ;;  %1917 = vmatprep.subr.bf16.mxu1 %v2184_v0 }
 0x796   :  { %v1042_v62 = vpop.f32.mrb[30].mxu1 }
 0x797   :  { %v1087_v63 = vadd.f32 %v1086_v59, %v1040_v58  ;;  %v1844_v2 = vpop.f32.mrb[31].mxu1 }
 0x798   :  { %1918 = vmatpush3.bf16.msra.mxu1 %v1987_v3 }
 0x799   :  { %v1088_v1 = vmax.f32 %v1087_v63, 0.0  ;;  %1919 = vmatprep.subr.bf16.mxu1 %v2184_v0 }
 0x79b   :  { %v1089_v4 = vmin.f32 %v1088_v1, 1.0 }
 0x79c   :  { %1920 = vmatpush3.bf16.msra.mxu1 %v2376_v22 }
 0x79d   :  { %v1094_v5 = vpack.c.bf16 %v1089_v4, %v1089_v4 }
 0x79f   :  { %1902 = vmatmul.mubr.bf16.vlgmr.msra.gmra.mrb[36].mxu0 %v1094_v5 }
 0x7a0   :  { %1926 = vmatpush3.bf16.msra.mxu0 %v2379_v25  ;;  %1941 = vmatprep.mubr.msk.bf16.mxu0 %vm2185_vm0, %v2184_v0 }
 0x7a1   :  { %1927 = vmatprep.subr.bf16.mxu0 %v2184_v0 }
 0x7a4   :  { %1928 = vmatpush3.bf16.msra.mxu0 %v2385_v26  ;;  %v1177_v26 = vmul.f32 0.8, %v1089_v4 }
 0x7a5   :  { %1929 = vmatprep.subr.bf16.mxu0 %v2184_v0 }
 0x7a8   :  { %1930 = vmatpush3.bf16.msra.mxu0 %v2395_v27 }
 0x7a9   :  { %1931 = vmatprep.subr.bf16.mxu0 %v2184_v0 }
 0x7ac   :  { %1932 = vmatpush3.bf16.msra.mxu0 %v2401_v28 }
 0x7ad   :  { %1933 = vmatprep.subr.bf16.mxu0 %v2184_v0 }
 0x7b0   :  { %1934 = vmatpush3.bf16.msra.mxu0 %v2407_v29 }
 0x7b1   :  { %1935 = vmatprep.subr.bf16.mxu0 %v2184_v0 }
 0x7b4   :  { %1936 = vmatpush3.bf16.msra.mxu0 %v2413_v30 }
 0x7b5   :  { %1937 = vmatprep.subr.bf16.mxu0 %v2184_v0 }
 0x7b8   :  { %1938 = vmatpush3.bf16.msra.mxu0 %v2419_v33  ;;  %v1181_v33 = vmul.f32 0.8, %v1093_v13 }
 0x7b9   :  { %1939 = vmatprep.subr.bf16.mxu0 %v2184_v0 }
 0x7bc   :  { %1940 = vmatpush3.bf16.msra.mxu0 %v2425_v35 }
 0x852   :  { %v1130_v22 = vpop.f32.mrb[32].mxu1 }
 0x853   :  { %v1131_v25 = vadd.f32 %v2455_v37, %v1130_v22  ;;  %v1883_v27 = vpop.f32.mrb[33].mxu1 }
 0x854   :  { %v1133_v28 = vpop.f32.mrb[34].mxu1 }
 0x855   :  { %v1178_v6 = vadd.f32 %v1177_v26, %v1131_v25  ;;  %v1884_v29 = vpop.f32.mrb[35].mxu1 }
 0x857   :  { %v1179_v7 = vmax.f32 %v1178_v6, 0.0 }
 0x859   :  { %v1180_v8 = vmin.f32 %v1179_v7, 1.0 }
 0x85b   :  { %v1185_v9 = vpack.c.bf16 %v1180_v8, %v1180_v8 }
 0x85d   :  { %1942 = vmatmul.mubr.bf16.vlgmr.msra.gmra.mrb[40].mxu0 %v1185_v9 }
 0x872   :  { %v1170_v30 = vpop.f32.mrb[36].mxu0 }
 0x873   :  { %v1176_v11 = vadd.f32 %v1170_v30, %v2477_v53  ;;  %v1903_v12 = vpop.f32.mrb[37].mxu0 }
 0x874   :  { %v1173_v0 = vpop.f32.mrb[38].mxu0 }
 0x875   :  { %v1182_v14 = vadd.f32 %v1181_v33, %v1176_v11  ;;  %v1904_v35 = vpop.f32.mrb[39].mxu0 }
 0x877   :  { %v1183_v15 = vmax.f32 %v1182_v14, 0.0 }
 0x879   :  { %v1184_v16 = vmin.f32 %v1183_v15, 1.0 }
 0x87b   :  { %v1186_v17 = vpack.c.bf16 %v1184_v16, %v1184_v16  ;;  %v1272_v21 = vmul.f32 0.8, %v1184_v16 }
 0x87d   :  { %1922 = vmatmul.mubr.bf16.vlgmr.msra.gmra.mrb[36].mxu1 %v1186_v17 }
 0x930   :  { %v1261_v19 = vpop.f32.mrb[40].mxu0 }
 0x931   :  { %v1267_v20 = vadd.f32 %v1261_v19, %v2477_v53  ;;  %v1943_v23 = vpop.f32.mrb[41].mxu0 }
 0x932   :  { %v1264_v24 = vpop.f32.mrb[42].mxu0 }
 0x933   :  { %v1273_v31 = vadd.f32 %v1272_v21, %v1267_v20  ;;  %v1944_v32 = vpop.f32.mrb[43].mxu0 }
 0x935   :  { %v1274_v34 = vmax.f32 %v1273_v31, 0.0 }
 0x937   :  { %v1275_v36 = vmin.f32 %v1274_v34, 1.0 }
 0x939   :  { %1277 = vst [vmem:[#allocation14] sm:$0xff] %v1275_v36 }
 0x93a   :  { %2131 = shalt.err (!%p2128_p10)
}
 0x93b   :  { %s2132_s21 = scalar_lea.hbm %s2826_s9, 128 }
 0x93c   :  { %p2133_p11 = scmp.ne.s32.totalorder %s2826_s9, %s2132_s21  ;;  %p2136_p12 = scmp.lt.u32.totalorder %s2132_s21, %s2826_s9 }
 0x93e   :  { %p2138_p13 = pnand %p2136_p12, %p2133_p11 }
 0x940   :  { %2141 = shalt.err (!%p2138_p13)
}
 0x941   :  { %1297 = dma.vmem_to_hbm [thread:$0]  %s1295_s16, 128, %s2826_s9, [#allocation15]   ;;  %v1268_v39 = vmul.f32 0.8, %v1180_v8 }
 0x942   :  { %s2187_s2 = smov [#allocation13]  }
 0x943   :  { %s1284_s17 = sshll.u32 %s2187_s2, 4  ;;  %s1285_s17 = int_to_ptr.vmem [resolvable:$true] %s1284_s17 }
 0x944   :  { %s2142_s26 = scalar_lea.vmem %s1285_s17, 128  ;;  %p2147_p1 = scmp.lt.s32.totalorder %s1285_s17, %s1285_s17 }
 0x945   :  { %p2143_p0 = scmp.ne.s32.totalorder %s1285_s17, %s2142_s26  ;;  %p2148_p2 = scmp.lt.s32.totalorder %s2142_s26, %s2142_s26 }
 0x947   :  { %p2149_p3 = por %p2148_p2, %p2147_p1 }
 0x949   :  { %p2150_p4 = pnand %p2149_p3, %p2143_p0 }
 0x950   :  { %v1221_v53 = vpop.f32.mrb[36].mxu1 }
 0x951   :  { %v1222_v38 = vadd.f32 %v2455_v37, %v1221_v53  ;;  %v1923_v40 = vpop.f32.mrb[37].mxu1 }
 0x952   :  { %v1224_v41 = vpop.f32.mrb[38].mxu1 }
 0x953   :  { %v1269_v42 = vadd.f32 %v1268_v39, %v1222_v38  ;;  %v1924_v43 = vpop.f32.mrb[39].mxu1 }
 0x955   :  { %v1270_v44 = vmax.f32 %v1269_v42, 0.0 }
 0x957   :  { %v1271_v45 = vmin.f32 %v1270_v44, 1.0 }
 0x959   :  { %1276 = vst [vmem:[#allocation13] sm:$0xff] %v1271_v45 }
 0x95a   :  { %2153 = shalt.err (!%p2150_p4)
}
 0x95b   :  { %s2154_s28 = scalar_lea.hbm %s2825_s8, 128 }
 0x95c   :  { %p2155_p5 = scmp.ne.s32.totalorder %s2825_s8, %s2154_s28  ;;  %p2158_p6 = scmp.lt.u32.totalorder %s2154_s28, %s2825_s8 }
 0x95e   :  { %p2160_p7 = pnand %p2158_p6, %p2155_p5 }
 0x960   :  { %2163 = shalt.err (!%p2160_p7)
}
 0x961   :  { %1287 = dma.vmem_to_hbm [thread:$0]  %s1285_s17, 128, %s2825_s8, [#allocation4]  }
 0x962   :  { %2172 = dma.done.wait [#allocation4], 128  }
 0x963   :  { %2173 = vsyncadd [#allocation4], 4294967168 }
 0x964   :  { %2174 = dma.done.wait [#allocation15], 128  }
 0x965   :  { %2175 = vsyncadd [#allocation15], 4294967168 }
 0x966   :  { %1304 = vsyncpa [#allocation3], 1 }
 0x967   :  { %1305 = vsyncpa [#allocation6], 1 }
 0x968   :  { %1306 = vsyncpa [#allocation9], 1 }
 0x969   :  { %1307 = vsyncpa [#allocation12], 1 }
 0x96a   :  { %1308 = vsyncpa [#allocation4], 1 }
 0x96b   :  { %1309 = vsyncpa [#allocation15], 1 }

</bundles_post_ra>
